<compile_context>
chip_gen: v7x
topology: tpu7x:2x2x1
jax: 0.10.0
libtpu: 0.0.40
codegen_flags: <defaults>
</compile_context>

<pallas_src>
import jax
import jax.numpy as jnp
from jax.experimental import pallas as pl
from jax.experimental.pallas import tpu as pltpu

# ----------------------------------------------------------------------------
# Static network dimensions (LeNet on 3x32x32, implied by the 16*5*5 flatten)
# ----------------------------------------------------------------------------
H = W = 32
KH = KW = 5
C_IN, C1, C2 = 3, 7, 16
H1 = H - KH + 1            # 28  conv1 output
P1 = H1 // 2               # 14  pool1 output
H2 = P1 - KH + 1           # 10  conv2 output
P2 = H2 // 2               # 5   pool2 output
FLAT = C2 * P2 * P2        # 400
FC1, FC2, FC3 = 120, 84, 10

# Lane-dense / MXU-friendly padded sizes
CIN_PAD = 8                # pad 3 input channels  -> 8 sublanes
C1_PAD = 8                 # pad 7 conv1 channels  -> 8 sublanes
PLANE1 = H * W             # 1024 = 8*128 : wide-plane width, stage 1
XCOLS = 1280               # >= PLANE1 + (KH-1)*W + (KW-1) = 1156, rounded to 128
PLANE2 = 640               # 5*128 : wide-plane width, stage 2
NPAD = 128                 # padded FC output width (lane-dense)


# ----------------------------------------------------------------------------
# Kernel 1: fused conv1+ReLU+pool1+conv2+ReLU+pool2 (one image per grid step)
# ----------------------------------------------------------------------------
def _pool2x2_wide(a, *, row_stride, col_stride):
    """2x2 / stride-2 max pool on a wide plane.

    a[:, p] holds logical position (h, w) at p = h*row_stride + w*col_stride.
    The pooled value for (ph, pw) lands at the column of its top-left element,
    p = 2*ph*row_stride + 2*pw*col_stride.  Other columns are garbage and are
    never read downstream (rolls are circular; valid reads never wrap).
    """
    width = a.shape[-1]

    def shifted(k):          # out[:, p] = a[:, p + k]
        return pltpu.roll(a, (-k) % width, 1)

    return jnp.maximum(jnp.maximum(a, shifted(col_stride)),
                       jnp.maximum(shifted(row_stride),
                                   shifted(row_stride + col_stride)))


def _conv_stage_kernel(x_ref, w1_ref, b1_ref, w2_ref, b2_ref, o_ref, p1_ref):
    # ---- conv1 (5x5 valid) + bias + ReLU on the 1024-wide plane -------------
    acc1 = jnp.zeros((C1_PAD, PLANE1), jnp.float32)
    for i in range(KH):
        for j in range(KW):
            off = i * W + j
            xs = x_ref[0, :, off:off + PLANE1]               # (8, 1024)
            acc1 = acc1 + jnp.dot(w1_ref[i * KW + j], xs,
                                  preferred_element_type=jnp.float32)
    acc1 = jnp.maximum(acc1 + b1_ref[...], 0.0)
    # fused 2x2 maxpool: valid (ph, pw) stored at column ph*64 + pw*2
    p1_ref[...] = _pool2x2_wide(acc1, row_stride=W, col_stride=1)

    # ---- conv2 (5x5 valid) + bias + ReLU on the 640-wide plane --------------
    acc2 = jnp.zeros((C2, PLANE2), jnp.float32)
    for i in range(KH):
        for j in range(KW):
            off = i * (2 * W) + j * 2
            xs = p1_ref[:, off:off + PLANE2]                 # (8, 640)
            acc2 = acc2 + jnp.dot(w2_ref[i * KW + j], xs,
                                  preferred_element_type=jnp.float32)
    acc2 = jnp.maximum(acc2 + b2_ref[...], 0.0)
    # fused 2x2 maxpool: valid (ph, pw) stored at column ph*128 + pw*4
    o_ref[0] = _pool2x2_wide(acc2, row_stride=2 * W, col_stride=2)


def _conv_stage(xp, w1t, b1c, w2t, b2c):
    B = xp.shape[0]
    return pl.pallas_call(
        _conv_stage_kernel,
        out_shape=jax.ShapeDtypeStruct((B, C2, PLANE2), jnp.float32),
        grid=(B,),
        in_specs=[
            pl.BlockSpec((1, CIN_PAD, XCOLS), lambda b: (b, 0, 0)),
            pl.BlockSpec((KH * KW, C1_PAD, CIN_PAD), lambda b: (0, 0, 0)),
            pl.BlockSpec((C1_PAD, 1), lambda b: (0, 0)),
            pl.BlockSpec((KH * KW, C2, C1_PAD), lambda b: (0, 0, 0)),
            pl.BlockSpec((C2, 1), lambda b: (0, 0)),
        ],
        out_specs=pl.BlockSpec((1, C2, PLANE2), lambda b: (b, 0, 0)),
        scratch_shapes=[pltpu.VMEM((C1_PAD, PLANE1), jnp.float32)],
        compiler_params=pltpu.CompilerParams(
            dimension_semantics=("parallel",)),
    )(xp, w1t, b1c, w2t, b2c)


# ----------------------------------------------------------------------------
# Kernel 2: fused FC tail fc1+ReLU -> fc2+ReLU -> fc3 (128-lane padded outputs)
# ----------------------------------------------------------------------------
def _fc_kernel(x_ref, w1_ref, b1_ref, w2_ref, b2_ref, w3_ref, b3_ref, o_ref):
    h = jnp.dot(x_ref[...], w1_ref[...], preferred_element_type=jnp.float32)
    h = jnp.maximum(h + b1_ref[...], 0.0)
    h = jnp.dot(h, w2_ref[...], preferred_element_type=jnp.float32)
    h = jnp.maximum(h + b2_ref[...], 0.0)
    h = jnp.dot(h, w3_ref[...], preferred_element_type=jnp.float32)
    o_ref[...] = h + b3_ref[...]


def _fc_stage(feat, w1k, b1k, w2k, b2k, w3k, b3k, tm):
    bp = feat.shape[0]
    return pl.pallas_call(
        _fc_kernel,
        out_shape=jax.ShapeDtypeStruct((bp, NPAD), jnp.float32),
        grid=(bp // tm,),
        in_specs=[
            pl.BlockSpec((tm, FLAT), lambda m: (m, 0)),
            pl.BlockSpec((FLAT, NPAD), lambda m: (0, 0)),
            pl.BlockSpec((1, NPAD), lambda m: (0, 0)),
            pl.BlockSpec((NPAD, NPAD), lambda m: (0, 0)),
            pl.BlockSpec((1, NPAD), lambda m: (0, 0)),
            pl.BlockSpec((NPAD, NPAD), lambda m: (0, 0)),
            pl.BlockSpec((1, NPAD), lambda m: (0, 0)),
        ],
        out_specs=pl.BlockSpec((tm, NPAD), lambda m: (m, 0)),
        compiler_params=pltpu.CompilerParams(
            dimension_semantics=("parallel",)),
    )(feat, w1k, b1k, w2k, b2k, w3k, b3k)


# ----------------------------------------------------------------------------
# Parameters: PyTorch-style init, then a ONE-TIME rearrangement to
# kernel-friendly layouts (no per-forward transposes).
# ----------------------------------------------------------------------------
def init_params(key):
    def uniform(k, shape, fan_in):
        bound = 1.0 / (fan_in ** 0.5)
        return jax.random.uniform(k, shape, jnp.float32, -bound, bound)

    keys = jax.random.split(key, 10)
    return {
        "conv1_w": uniform(keys[0], (C1, C_IN, KH, KW), C_IN * KH * KW),
        "conv1_b": uniform(keys[1], (C1,), C_IN * KH * KW),
        "conv2_w": uniform(keys[2], (C2, C1, KH, KW), C1 * KH * KW),
        "conv2_b": uniform(keys[3], (C2,), C1 * KH * KW),
        "fc1_w": uniform(keys[4], (FC1, FLAT), FLAT),   # PyTorch Linear: (out, in)
        "fc1_b": uniform(keys[5], (FC1,), FLAT),
        "fc2_w": uniform(keys[6], (FC2, FC1), FC1),
        "fc2_b": uniform(keys[7], (FC2,), FC1),
        "fc3_w": uniform(keys[8], (FC3, FC2), FC2),
        "fc3_b": uniform(keys[9], (FC3,), FC2),
    }


def prepare_params(p):
    f32 = jnp.float32

    def conv_taps(w, cout_pad, cin_pad):
        cout, cin = w.shape[0], w.shape[1]
        taps = w.transpose(2, 3, 0, 1).reshape(KH * KW, cout, cin)
        return jnp.zeros((KH * KW, cout_pad, cin_pad), f32).at[:, :cout, :cin].set(taps)

    def fc_mat(w, in_pad, out_pad):      # (out,in) torch layout -> padded (in,out)
        o, i = w.shape
        return jnp.zeros((in_pad, out_pad), f32).at[:i, :o].set(w.T)

    def fc_bias(b, out_pad):
        return jnp.zeros((1, out_pad), f32).at[0, :b.shape[0]].set(b)

    return {
        "w1t": conv_taps(p["conv1_w"], C1_PAD, CIN_PAD),
        "b1c": jnp.zeros((C1_PAD, 1), f32).at[:C1, 0].set(p["conv1_b"]),
        "w2t": conv_taps(p["conv2_w"], C2, C1_PAD),
        "b2c": p["conv2_b"].reshape(C2, 1).astype(f32),
        "w1k": fc_mat(p["fc1_w"], FLAT, NPAD),
        "b1k": fc_bias(p["fc1_b"], NPAD),
        "w2k": fc_mat(p["fc2_w"], NPAD, NPAD),
        "b2k": fc_bias(p["fc2_b"], NPAD),
        "w3k": fc_mat(p["fc3_w"], NPAD, NPAD),
        "b3k": fc_bias(p["fc3_b"], NPAD),
    }


# ----------------------------------------------------------------------------
# Forward pass (matches Net.forward)
# ----------------------------------------------------------------------------
def net_forward(prepared, x):
    B = x.shape[0]
    # One-time glue: NCHW image -> zero-padded (B, 8, 1280) wide plane.
    xp = x.reshape(B, C_IN, H * W).astype(jnp.float32)
    xp = jnp.pad(xp, ((0, 0), (0, CIN_PAD - C_IN), (0, XCOLS - H * W)))

    wide = _conv_stage(xp, prepared["w1t"], prepared["b1c"],
                       prepared["w2t"], prepared["b2c"])        # (B, 16, 640)

    # Pool2 value for (c, ph, pw) lives at column ph*128 + pw*4.
    feat = wide.reshape(B, C2, P2, PLANE2 // P2)[:, :, :, 0:4 * P2:4]
    feat = feat.reshape(B, FLAT)                                # torch flatten order

    # Fused FC tail, tiled over batch rows.
    tm = min(128, 8 * max(1, (B + 15) // 16))
    bp = ((B + tm - 1) // tm) * tm
    if bp != B:
        feat = jnp.pad(feat, ((0, bp - B), (0, 0)))
    out = _fc_stage(feat, prepared["w1k"], prepared["b1k"], prepared["w2k"],
                    prepared["b2k"], prepared["w3k"], prepared["b3k"], tm)
    return out[:B, :FC3]


# ----------------------------------------------------------------------------
# Plain-XLA reference of the PyTorch forward (for a numerical self-check)
# ----------------------------------------------------------------------------
def reference_forward(params, x):
    hp = jax.lax.Precision.HIGHEST

    def conv_relu(h, w, b):
        y = jax.lax.conv_general_dilated(
            h, w, window_strides=(1, 1), padding="VALID",
            dimension_numbers=("NCHW", "OIHW", "NCHW"), precision=hp)
        return jnp.maximum(y + b[None, :, None, None], 0.0)

    def pool(h):
        return jax.lax.reduce_window(h, -jnp.inf, jax.lax.max,
                                     (1, 1, 2, 2), (1, 1, 2, 2), "VALID")

    h = pool(conv_relu(x, params["conv1_w"], params["conv1_b"]))
    h = pool(conv_relu(h, params["conv2_w"], params["conv2_b"]))
    h = h.reshape(h.shape[0], -1)
    h = jnp.maximum(jnp.dot(h, params["fc1_w"].T, precision=hp) + params["fc1_b"], 0.0)
    h = jnp.maximum(jnp.dot(h, params["fc2_w"].T, precision=hp) + params["fc2_b"], 0.0)
    return jnp.dot(h, params["fc3_w"].T, precision=hp) + params["fc3_b"]


if __name__ == "__main__":
    key = jax.random.PRNGKey(0)
    pkey, xkey = jax.random.split(key)
    params = init_params(pkey)
    prepared = prepare_params(params)

    x = jax.random.normal(xkey, (2, 3, 32, 32), jnp.float32)

    fwd = jax.jit(net_forward)
    out = jax.block_until_ready(fwd(prepared, x))
    assert out.shape == (2, 10), out.shape
    assert out.dtype == jnp.float32

    # Numerical parity with the (plain-XLA) PyTorch-equivalent forward.
    ref = jax.block_until_ready(reference_forward(params, x))
    max_err = float(jnp.max(jnp.abs(out - ref)))
    assert max_err < 2e-2, f"mismatch vs reference: max abs err {max_err}"

    print("KERNEL_OK")
</pallas_src>

<mosaic_0001>
module attributes {stable_mosaic.version = 11 : i64} {
  func.func @_conv_stage_kernel(%arg0: i32, %arg1: memref<1x8x1280xf32, #tpu.memory_space<vmem>>, %arg2: memref<25x8x8xf32, #tpu.memory_space<vmem>>, %arg3: memref<8x1xf32, #tpu.memory_space<vmem>>, %arg4: memref<25x16x8xf32, #tpu.memory_space<vmem>>, %arg5: memref<16x1xf32, #tpu.memory_space<vmem>>, %arg6: memref<1x16x640xf32, #tpu.memory_space<vmem>>, %arg7: memref<8x1024xf32, #tpu.memory_space<vmem>>) attributes {dimension_semantics = [#tpu.dimension_semantics<parallel>], iteration_bounds = array<i64: 2>, scalar_prefetch = 0 : i64, scratch_operands = 1 : i64, tpu.core_type = #tpu.core_type<tc>, window_params = [{transform_indices = @transform_0, window_bounds = array<i64: 1, 8, 1280>}, {pipeline_mode = #tpu.pipeline_mode<synchronous>, transform_indices = @transform_1, window_bounds = array<i64: 25, 8, 8>}, {pipeline_mode = #tpu.pipeline_mode<synchronous>, transform_indices = @transform_2, window_bounds = array<i64: 8, 1>}, {pipeline_mode = #tpu.pipeline_mode<synchronous>, transform_indices = @transform_3, window_bounds = array<i64: 25, 16, 8>}, {pipeline_mode = #tpu.pipeline_mode<synchronous>, transform_indices = @transform_4, window_bounds = array<i64: 16, 1>}, {transform_indices = @transform_5, window_bounds = array<i64: 1, 16, 640>}]} {
    %cst = arith.constant 0.000000e+00 : f32
    %0 = vector.broadcast %cst : f32 to vector<8x1024xf32>
    %c0 = arith.constant 0 : index
    %c0_0 = arith.constant 0 : index
    %c0_1 = arith.constant 0 : index
    %1 = vector.load %arg1[%c0, %c0_0, %c0_1] : memref<1x8x1280xf32, #tpu.memory_space<vmem>>, vector<1x8x1024xf32>
    %2 = vector.shape_cast %1 : vector<1x8x1024xf32> to vector<8x1024xf32>
    %c0_2 = arith.constant 0 : index
    %c0_3 = arith.constant 0 : index
    %c0_4 = arith.constant 0 : index
    %3 = vector.load %arg2[%c0_2, %c0_3, %c0_4] : memref<25x8x8xf32, #tpu.memory_space<vmem>>, vector<1x8x8xf32>
    %4 = vector.shape_cast %3 : vector<1x8x8xf32> to vector<8x8xf32>
    %cst_5 = arith.constant dense<0.000000e+00> : vector<8x1024xf32>
    %5 = tpu.matmul %4, %2, %cst_5 {dimension_numbers = #tpu.dot_dimension_numbers<[1], [0], [0], [1], [0, 0, 1, 1], [], []>} : vector<8x8xf32>, vector<8x1024xf32>, vector<8x1024xf32> -> vector<8x1024xf32>
    %6 = arith.addf %0, %5 : vector<8x1024xf32>
    %c0_6 = arith.constant 0 : index
    %c0_7 = arith.constant 0 : index
    %c1 = arith.constant 1 : index
    %7 = vector.load %arg1[%c0_6, %c0_7, %c1] : memref<1x8x1280xf32, #tpu.memory_space<vmem>>, vector<1x8x1024xf32>
    %8 = vector.shape_cast %7 : vector<1x8x1024xf32> to vector<8x1024xf32>
    %c1_8 = arith.constant 1 : index
    %c0_9 = arith.constant 0 : index
    %c0_10 = arith.constant 0 : index
    %9 = vector.load %arg2[%c1_8, %c0_9, %c0_10] : memref<25x8x8xf32, #tpu.memory_space<vmem>>, vector<1x8x8xf32>
    %10 = vector.shape_cast %9 : vector<1x8x8xf32> to vector<8x8xf32>
    %cst_11 = arith.constant dense<0.000000e+00> : vector<8x1024xf32>
    %11 = tpu.matmul %10, %8, %cst_11 {dimension_numbers = #tpu.dot_dimension_numbers<[1], [0], [0], [1], [0, 0, 1, 1], [], []>} : vector<8x8xf32>, vector<8x1024xf32>, vector<8x1024xf32> -> vector<8x1024xf32>
    %12 = arith.addf %6, %11 : vector<8x1024xf32>
    %c0_12 = arith.constant 0 : index
    %c0_13 = arith.constant 0 : index
    %c2 = arith.constant 2 : index
    %13 = vector.load %arg1[%c0_12, %c0_13, %c2] : memref<1x8x1280xf32, #tpu.memory_space<vmem>>, vector<1x8x1024xf32>
    %14 = vector.shape_cast %13 : vector<1x8x1024xf32> to vector<8x1024xf32>
    %c2_14 = arith.constant 2 : index
    %c0_15 = arith.constant 0 : index
    %c0_16 = arith.constant 0 : index
    %15 = vector.load %arg2[%c2_14, %c0_15, %c0_16] : memref<25x8x8xf32, #tpu.memory_space<vmem>>, vector<1x8x8xf32>
    %16 = vector.shape_cast %15 : vector<1x8x8xf32> to vector<8x8xf32>
    %cst_17 = arith.constant dense<0.000000e+00> : vector<8x1024xf32>
    %17 = tpu.matmul %16, %14, %cst_17 {dimension_numbers = #tpu.dot_dimension_numbers<[1], [0], [0], [1], [0, 0, 1, 1], [], []>} : vector<8x8xf32>, vector<8x1024xf32>, vector<8x1024xf32> -> vector<8x1024xf32>
    %18 = arith.addf %12, %17 : vector<8x1024xf32>
    %c0_18 = arith.constant 0 : index
    %c0_19 = arith.constant 0 : index
    %c3 = arith.constant 3 : index
    %19 = vector.load %arg1[%c0_18, %c0_19, %c3] : memref<1x8x1280xf32, #tpu.memory_space<vmem>>, vector<1x8x1024xf32>
    %20 = vector.shape_cast %19 : vector<1x8x1024xf32> to vector<8x1024xf32>
    %c3_20 = arith.constant 3 : index
    %c0_21 = arith.constant 0 : index
    %c0_22 = arith.constant 0 : index
    %21 = vector.load %arg2[%c3_20, %c0_21, %c0_22] : memref<25x8x8xf32, #tpu.memory_space<vmem>>, vector<1x8x8xf32>
    %22 = vector.shape_cast %21 : vector<1x8x8xf32> to vector<8x8xf32>
    %cst_23 = arith.constant dense<0.000000e+00> : vector<8x1024xf32>
    %23 = tpu.matmul %22, %20, %cst_23 {dimension_numbers = #tpu.dot_dimension_numbers<[1], [0], [0], [1], [0, 0, 1, 1], [], []>} : vector<8x8xf32>, vector<8x1024xf32>, vector<8x1024xf32> -> vector<8x1024xf32>
    %24 = arith.addf %18, %23 : vector<8x1024xf32>
    %c0_24 = arith.constant 0 : index
    %c0_25 = arith.constant 0 : index
    %c4 = arith.constant 4 : index
    %25 = vector.load %arg1[%c0_24, %c0_25, %c4] : memref<1x8x1280xf32, #tpu.memory_space<vmem>>, vector<1x8x1024xf32>
    %26 = vector.shape_cast %25 : vector<1x8x1024xf32> to vector<8x1024xf32>
    %c4_26 = arith.constant 4 : index
    %c0_27 = arith.constant 0 : index
    %c0_28 = arith.constant 0 : index
    %27 = vector.load %arg2[%c4_26, %c0_27, %c0_28] : memref<25x8x8xf32, #tpu.memory_space<vmem>>, vector<1x8x8xf32>
    %28 = vector.shape_cast %27 : vector<1x8x8xf32> to vector<8x8xf32>
    %cst_29 = arith.constant dense<0.000000e+00> : vector<8x1024xf32>
    %29 = tpu.matmul %28, %26, %cst_29 {dimension_numbers = #tpu.dot_dimension_numbers<[1], [0], [0], [1], [0, 0, 1, 1], [], []>} : vector<8x8xf32>, vector<8x1024xf32>, vector<8x1024xf32> -> vector<8x1024xf32>
    %30 = arith.addf %24, %29 : vector<8x1024xf32>
    %c0_30 = arith.constant 0 : index
    %c0_31 = arith.constant 0 : index
    %c32 = arith.constant 32 : index
    %31 = vector.load %arg1[%c0_30, %c0_31, %c32] : memref<1x8x1280xf32, #tpu.memory_space<vmem>>, vector<1x8x1024xf32>
    %32 = vector.shape_cast %31 : vector<1x8x1024xf32> to vector<8x1024xf32>
    %c5 = arith.constant 5 : index
    %c0_32 = arith.constant 0 : index
    %c0_33 = arith.constant 0 : index
    %33 = vector.load %arg2[%c5, %c0_32, %c0_33] : memref<25x8x8xf32, #tpu.memory_space<vmem>>, vector<1x8x8xf32>
    %34 = vector.shape_cast %33 : vector<1x8x8xf32> to vector<8x8xf32>
    %cst_34 = arith.constant dense<0.000000e+00> : vector<8x1024xf32>
    %35 = tpu.matmul %34, %32, %cst_34 {dimension_numbers = #tpu.dot_dimension_numbers<[1], [0], [0], [1], [0, 0, 1, 1], [], []>} : vector<8x8xf32>, vector<8x1024xf32>, vector<8x1024xf32> -> vector<8x1024xf32>
    %36 = arith.addf %30, %35 : vector<8x1024xf32>
    %c0_35 = arith.constant 0 : index
    %c0_36 = arith.constant 0 : index
    %c33 = arith.constant 33 : index
    %37 = vector.load %arg1[%c0_35, %c0_36, %c33] : memref<1x8x1280xf32, #tpu.memory_space<vmem>>, vector<1x8x1024xf32>
    %38 = vector.shape_cast %37 : vector<1x8x1024xf32> to vector<8x1024xf32>
    %c6 = arith.constant 6 : index
    %c0_37 = arith.constant 0 : index
    %c0_38 = arith.constant 0 : index
    %39 = vector.load %arg2[%c6, %c0_37, %c0_38] : memref<25x8x8xf32, #tpu.memory_space<vmem>>, vector<1x8x8xf32>
    %40 = vector.shape_cast %39 : vector<1x8x8xf32> to vector<8x8xf32>
    %cst_39 = arith.constant dense<0.000000e+00> : vector<8x1024xf32>
    %41 = tpu.matmul %40, %38, %cst_39 {dimension_numbers = #tpu.dot_dimension_numbers<[1], [0], [0], [1], [0, 0, 1, 1], [], []>} : vector<8x8xf32>, vector<8x1024xf32>, vector<8x1024xf32> -> vector<8x1024xf32>
    %42 = arith.addf %36, %41 : vector<8x1024xf32>
    %c0_40 = arith.constant 0 : index
    %c0_41 = arith.constant 0 : index
    %c34 = arith.constant 34 : index
    %43 = vector.load %arg1[%c0_40, %c0_41, %c34] : memref<1x8x1280xf32, #tpu.memory_space<vmem>>, vector<1x8x1024xf32>
    %44 = vector.shape_cast %43 : vector<1x8x1024xf32> to vector<8x1024xf32>
    %c7 = arith.constant 7 : index
    %c0_42 = arith.constant 0 : index
    %c0_43 = arith.constant 0 : index
    %45 = vector.load %arg2[%c7, %c0_42, %c0_43] : memref<25x8x8xf32, #tpu.memory_space<vmem>>, vector<1x8x8xf32>
    %46 = vector.shape_cast %45 : vector<1x8x8xf32> to vector<8x8xf32>
    %cst_44 = arith.constant dense<0.000000e+00> : vector<8x1024xf32>
    %47 = tpu.matmul %46, %44, %cst_44 {dimension_numbers = #tpu.dot_dimension_numbers<[1], [0], [0], [1], [0, 0, 1, 1], [], []>} : vector<8x8xf32>, vector<8x1024xf32>, vector<8x1024xf32> -> vector<8x1024xf32>
    %48 = arith.addf %42, %47 : vector<8x1024xf32>
    %c0_45 = arith.constant 0 : index
    %c0_46 = arith.constant 0 : index
    %c35 = arith.constant 35 : index
    %49 = vector.load %arg1[%c0_45, %c0_46, %c35] : memref<1x8x1280xf32, #tpu.memory_space<vmem>>, vector<1x8x1024xf32>
    %50 = vector.shape_cast %49 : vector<1x8x1024xf32> to vector<8x1024xf32>
    %c8 = arith.constant 8 : index
    %c0_47 = arith.constant 0 : index
    %c0_48 = arith.constant 0 : index
    %51 = vector.load %arg2[%c8, %c0_47, %c0_48] : memref<25x8x8xf32, #tpu.memory_space<vmem>>, vector<1x8x8xf32>
    %52 = vector.shape_cast %51 : vector<1x8x8xf32> to vector<8x8xf32>
    %cst_49 = arith.constant dense<0.000000e+00> : vector<8x1024xf32>
    %53 = tpu.matmul %52, %50, %cst_49 {dimension_numbers = #tpu.dot_dimension_numbers<[1], [0], [0], [1], [0, 0, 1, 1], [], []>} : vector<8x8xf32>, vector<8x1024xf32>, vector<8x1024xf32> -> vector<8x1024xf32>
    %54 = arith.addf %48, %53 : vector<8x1024xf32>
    %c0_50 = arith.constant 0 : index
    %c0_51 = arith.constant 0 : index
    %c36 = arith.constant 36 : index
    %55 = vector.load %arg1[%c0_50, %c0_51, %c36] : memref<1x8x1280xf32, #tpu.memory_space<vmem>>, vector<1x8x1024xf32>
    %56 = vector.shape_cast %55 : vector<1x8x1024xf32> to vector<8x1024xf32>
    %c9 = arith.constant 9 : index
    %c0_52 = arith.constant 0 : index
    %c0_53 = arith.constant 0 : index
    %57 = vector.load %arg2[%c9, %c0_52, %c0_53] : memref<25x8x8xf32, #tpu.memory_space<vmem>>, vector<1x8x8xf32>
    %58 = vector.shape_cast %57 : vector<1x8x8xf32> to vector<8x8xf32>
    %cst_54 = arith.constant dense<0.000000e+00> : vector<8x1024xf32>
    %59 = tpu.matmul %58, %56, %cst_54 {dimension_numbers = #tpu.dot_dimension_numbers<[1], [0], [0], [1], [0, 0, 1, 1], [], []>} : vector<8x8xf32>, vector<8x1024xf32>, vector<8x1024xf32> -> vector<8x1024xf32>
    %60 = arith.addf %54, %59 : vector<8x1024xf32>
    %c0_55 = arith.constant 0 : index
    %c0_56 = arith.constant 0 : index
    %c64 = arith.constant 64 : index
    %61 = vector.load %arg1[%c0_55, %c0_56, %c64] : memref<1x8x1280xf32, #tpu.memory_space<vmem>>, vector<1x8x1024xf32>
    %62 = vector.shape_cast %61 : vector<1x8x1024xf32> to vector<8x1024xf32>
    %c10 = arith.constant 10 : index
    %c0_57 = arith.constant 0 : index
    %c0_58 = arith.constant 0 : index
    %63 = vector.load %arg2[%c10, %c0_57, %c0_58] : memref<25x8x8xf32, #tpu.memory_space<vmem>>, vector<1x8x8xf32>
    %64 = vector.shape_cast %63 : vector<1x8x8xf32> to vector<8x8xf32>
    %cst_59 = arith.constant dense<0.000000e+00> : vector<8x1024xf32>
    %65 = tpu.matmul %64, %62, %cst_59 {dimension_numbers = #tpu.dot_dimension_numbers<[1], [0], [0], [1], [0, 0, 1, 1], [], []>} : vector<8x8xf32>, vector<8x1024xf32>, vector<8x1024xf32> -> vector<8x1024xf32>
    %66 = arith.addf %60, %65 : vector<8x1024xf32>
    %c0_60 = arith.constant 0 : index
    %c0_61 = arith.constant 0 : index
    %c65 = arith.constant 65 : index
    %67 = vector.load %arg1[%c0_60, %c0_61, %c65] : memref<1x8x1280xf32, #tpu.memory_space<vmem>>, vector<1x8x1024xf32>
    %68 = vector.shape_cast %67 : vector<1x8x1024xf32> to vector<8x1024xf32>
    %c11 = arith.constant 11 : index
    %c0_62 = arith.constant 0 : index
    %c0_63 = arith.constant 0 : index
    %69 = vector.load %arg2[%c11, %c0_62, %c0_63] : memref<25x8x8xf32, #tpu.memory_space<vmem>>, vector<1x8x8xf32>
    %70 = vector.shape_cast %69 : vector<1x8x8xf32> to vector<8x8xf32>
    %cst_64 = arith.constant dense<0.000000e+00> : vector<8x1024xf32>
    %71 = tpu.matmul %70, %68, %cst_64 {dimension_numbers = #tpu.dot_dimension_numbers<[1], [0], [0], [1], [0, 0, 1, 1], [], []>} : vector<8x8xf32>, vector<8x1024xf32>, vector<8x1024xf32> -> vector<8x1024xf32>
    %72 = arith.addf %66, %71 : vector<8x1024xf32>
    %c0_65 = arith.constant 0 : index
    %c0_66 = arith.constant 0 : index
    %c66 = arith.constant 66 : index
    %73 = vector.load %arg1[%c0_65, %c0_66, %c66] : memref<1x8x1280xf32, #tpu.memory_space<vmem>>, vector<1x8x1024xf32>
    %74 = vector.shape_cast %73 : vector<1x8x1024xf32> to vector<8x1024xf32>
    %c12 = arith.constant 12 : index
    %c0_67 = arith.constant 0 : index
    %c0_68 = arith.constant 0 : index
    %75 = vector.load %arg2[%c12, %c0_67, %c0_68] : memref<25x8x8xf32, #tpu.memory_space<vmem>>, vector<1x8x8xf32>
    %76 = vector.shape_cast %75 : vector<1x8x8xf32> to vector<8x8xf32>
    %cst_69 = arith.constant dense<0.000000e+00> : vector<8x1024xf32>
    %77 = tpu.matmul %76, %74, %cst_69 {dimension_numbers = #tpu.dot_dimension_numbers<[1], [0], [0], [1], [0, 0, 1, 1], [], []>} : vector<8x8xf32>, vector<8x1024xf32>, vector<8x1024xf32> -> vector<8x1024xf32>
    %78 = arith.addf %72, %77 : vector<8x1024xf32>
    %c0_70 = arith.constant 0 : index
    %c0_71 = arith.constant 0 : index
    %c67 = arith.constant 67 : index
    %79 = vector.load %arg1[%c0_70, %c0_71, %c67] : memref<1x8x1280xf32, #tpu.memory_space<vmem>>, vector<1x8x1024xf32>
    %80 = vector.shape_cast %79 : vector<1x8x1024xf32> to vector<8x1024xf32>
    %c13 = arith.constant 13 : index
    %c0_72 = arith.constant 0 : index
    %c0_73 = arith.constant 0 : index
    %81 = vector.load %arg2[%c13, %c0_72, %c0_73] : memref<25x8x8xf32, #tpu.memory_space<vmem>>, vector<1x8x8xf32>
    %82 = vector.shape_cast %81 : vector<1x8x8xf32> to vector<8x8xf32>
    %cst_74 = arith.constant dense<0.000000e+00> : vector<8x1024xf32>
    %83 = tpu.matmul %82, %80, %cst_74 {dimension_numbers = #tpu.dot_dimension_numbers<[1], [0], [0], [1], [0, 0, 1, 1], [], []>} : vector<8x8xf32>, vector<8x1024xf32>, vector<8x1024xf32> -> vector<8x1024xf32>
    %84 = arith.addf %78, %83 : vector<8x1024xf32>
    %c0_75 = arith.constant 0 : index
    %c0_76 = arith.constant 0 : index
    %c68 = arith.constant 68 : index
    %85 = vector.load %arg1[%c0_75, %c0_76, %c68] : memref<1x8x1280xf32, #tpu.memory_space<vmem>>, vector<1x8x1024xf32>
    %86 = vector.shape_cast %85 : vector<1x8x1024xf32> to vector<8x1024xf32>
    %c14 = arith.constant 14 : index
    %c0_77 = arith.constant 0 : index
    %c0_78 = arith.constant 0 : index
    %87 = vector.load %arg2[%c14, %c0_77, %c0_78] : memref<25x8x8xf32, #tpu.memory_space<vmem>>, vector<1x8x8xf32>
    %88 = vector.shape_cast %87 : vector<1x8x8xf32> to vector<8x8xf32>
    %cst_79 = arith.constant dense<0.000000e+00> : vector<8x1024xf32>
    %89 = tpu.matmul %88, %86, %cst_79 {dimension_numbers = #tpu.dot_dimension_numbers<[1], [0], [0], [1], [0, 0, 1, 1], [], []>} : vector<8x8xf32>, vector<8x1024xf32>, vector<8x1024xf32> -> vector<8x1024xf32>
    %90 = arith.addf %84, %89 : vector<8x1024xf32>
    %c0_80 = arith.constant 0 : index
    %c0_81 = arith.constant 0 : index
    %c96 = arith.constant 96 : index
    %91 = vector.load %arg1[%c0_80, %c0_81, %c96] : memref<1x8x1280xf32, #tpu.memory_space<vmem>>, vector<1x8x1024xf32>
    %92 = vector.shape_cast %91 : vector<1x8x1024xf32> to vector<8x1024xf32>
    %c15 = arith.constant 15 : index
    %c0_82 = arith.constant 0 : index
    %c0_83 = arith.constant 0 : index
    %93 = vector.load %arg2[%c15, %c0_82, %c0_83] : memref<25x8x8xf32, #tpu.memory_space<vmem>>, vector<1x8x8xf32>
    %94 = vector.shape_cast %93 : vector<1x8x8xf32> to vector<8x8xf32>
    %cst_84 = arith.constant dense<0.000000e+00> : vector<8x1024xf32>
    %95 = tpu.matmul %94, %92, %cst_84 {dimension_numbers = #tpu.dot_dimension_numbers<[1], [0], [0], [1], [0, 0, 1, 1], [], []>} : vector<8x8xf32>, vector<8x1024xf32>, vector<8x1024xf32> -> vector<8x1024xf32>
    %96 = arith.addf %90, %95 : vector<8x1024xf32>
    %c0_85 = arith.constant 0 : index
    %c0_86 = arith.constant 0 : index
    %c97 = arith.constant 97 : index
    %97 = vector.load %arg1[%c0_85, %c0_86, %c97] : memref<1x8x1280xf32, #tpu.memory_space<vmem>>, vector<1x8x1024xf32>
    %98 = vector.shape_cast %97 : vector<1x8x1024xf32> to vector<8x1024xf32>
    %c16 = arith.constant 16 : index
    %c0_87 = arith.constant 0 : index
    %c0_88 = arith.constant 0 : index
    %99 = vector.load %arg2[%c16, %c0_87, %c0_88] : memref<25x8x8xf32, #tpu.memory_space<vmem>>, vector<1x8x8xf32>
    %100 = vector.shape_cast %99 : vector<1x8x8xf32> to vector<8x8xf32>
    %cst_89 = arith.constant dense<0.000000e+00> : vector<8x1024xf32>
    %101 = tpu.matmul %100, %98, %cst_89 {dimension_numbers = #tpu.dot_dimension_numbers<[1], [0], [0], [1], [0, 0, 1, 1], [], []>} : vector<8x8xf32>, vector<8x1024xf32>, vector<8x1024xf32> -> vector<8x1024xf32>
    %102 = arith.addf %96, %101 : vector<8x1024xf32>
    %c0_90 = arith.constant 0 : index
    %c0_91 = arith.constant 0 : index
    %c98 = arith.constant 98 : index
    %103 = vector.load %arg1[%c0_90, %c0_91, %c98] : memref<1x8x1280xf32, #tpu.memory_space<vmem>>, vector<1x8x1024xf32>
    %104 = vector.shape_cast %103 : vector<1x8x1024xf32> to vector<8x1024xf32>
    %c17 = arith.constant 17 : index
    %c0_92 = arith.constant 0 : index
    %c0_93 = arith.constant 0 : index
    %105 = vector.load %arg2[%c17, %c0_92, %c0_93] : memref<25x8x8xf32, #tpu.memory_space<vmem>>, vector<1x8x8xf32>
    %106 = vector.shape_cast %105 : vector<1x8x8xf32> to vector<8x8xf32>
    %cst_94 = arith.constant dense<0.000000e+00> : vector<8x1024xf32>
    %107 = tpu.matmul %106, %104, %cst_94 {dimension_numbers = #tpu.dot_dimension_numbers<[1], [0], [0], [1], [0, 0, 1, 1], [], []>} : vector<8x8xf32>, vector<8x1024xf32>, vector<8x1024xf32> -> vector<8x1024xf32>
    %108 = arith.addf %102, %107 : vector<8x1024xf32>
    %c0_95 = arith.constant 0 : index
    %c0_96 = arith.constant 0 : index
    %c99 = arith.constant 99 : index
    %109 = vector.load %arg1[%c0_95, %c0_96, %c99] : memref<1x8x1280xf32, #tpu.memory_space<vmem>>, vector<1x8x1024xf32>
    %110 = vector.shape_cast %109 : vector<1x8x1024xf32> to vector<8x1024xf32>
    %c18 = arith.constant 18 : index
    %c0_97 = arith.constant 0 : index
    %c0_98 = arith.constant 0 : index
    %111 = vector.load %arg2[%c18, %c0_97, %c0_98] : memref<25x8x8xf32, #tpu.memory_space<vmem>>, vector<1x8x8xf32>
    %112 = vector.shape_cast %111 : vector<1x8x8xf32> to vector<8x8xf32>
    %cst_99 = arith.constant dense<0.000000e+00> : vector<8x1024xf32>
    %113 = tpu.matmul %112, %110, %cst_99 {dimension_numbers = #tpu.dot_dimension_numbers<[1], [0], [0], [1], [0, 0, 1, 1], [], []>} : vector<8x8xf32>, vector<8x1024xf32>, vector<8x1024xf32> -> vector<8x1024xf32>
    %114 = arith.addf %108, %113 : vector<8x1024xf32>
    %c0_100 = arith.constant 0 : index
    %c0_101 = arith.constant 0 : index
    %c100 = arith.constant 100 : index
    %115 = vector.load %arg1[%c0_100, %c0_101, %c100] : memref<1x8x1280xf32, #tpu.memory_space<vmem>>, vector<1x8x1024xf32>
    %116 = vector.shape_cast %115 : vector<1x8x1024xf32> to vector<8x1024xf32>
    %c19 = arith.constant 19 : index
    %c0_102 = arith.constant 0 : index
    %c0_103 = arith.constant 0 : index
    %117 = vector.load %arg2[%c19, %c0_102, %c0_103] : memref<25x8x8xf32, #tpu.memory_space<vmem>>, vector<1x8x8xf32>
    %118 = vector.shape_cast %117 : vector<1x8x8xf32> to vector<8x8xf32>
    %cst_104 = arith.constant dense<0.000000e+00> : vector<8x1024xf32>
    %119 = tpu.matmul %118, %116, %cst_104 {dimension_numbers = #tpu.dot_dimension_numbers<[1], [0], [0], [1], [0, 0, 1, 1], [], []>} : vector<8x8xf32>, vector<8x1024xf32>, vector<8x1024xf32> -> vector<8x1024xf32>
    %120 = arith.addf %114, %119 : vector<8x1024xf32>
    %c0_105 = arith.constant 0 : index
    %c0_106 = arith.constant 0 : index
    %c128 = arith.constant 128 : index
    %121 = vector.load %arg1[%c0_105, %c0_106, %c128] : memref<1x8x1280xf32, #tpu.memory_space<vmem>>, vector<1x8x1024xf32>
    %122 = vector.shape_cast %121 : vector<1x8x1024xf32> to vector<8x1024xf32>
    %c20 = arith.constant 20 : index
    %c0_107 = arith.constant 0 : index
    %c0_108 = arith.constant 0 : index
    %123 = vector.load %arg2[%c20, %c0_107, %c0_108] : memref<25x8x8xf32, #tpu.memory_space<vmem>>, vector<1x8x8xf32>
    %124 = vector.shape_cast %123 : vector<1x8x8xf32> to vector<8x8xf32>
    %cst_109 = arith.constant dense<0.000000e+00> : vector<8x1024xf32>
    %125 = tpu.matmul %124, %122, %cst_109 {dimension_numbers = #tpu.dot_dimension_numbers<[1], [0], [0], [1], [0, 0, 1, 1], [], []>} : vector<8x8xf32>, vector<8x1024xf32>, vector<8x1024xf32> -> vector<8x1024xf32>
    %126 = arith.addf %120, %125 : vector<8x1024xf32>
    %c0_110 = arith.constant 0 : index
    %c0_111 = arith.constant 0 : index
    %c129 = arith.constant 129 : index
    %127 = vector.load %arg1[%c0_110, %c0_111, %c129] : memref<1x8x1280xf32, #tpu.memory_space<vmem>>, vector<1x8x1024xf32>
    %128 = vector.shape_cast %127 : vector<1x8x1024xf32> to vector<8x1024xf32>
    %c21 = arith.constant 21 : index
    %c0_112 = arith.constant 0 : index
    %c0_113 = arith.constant 0 : index
    %129 = vector.load %arg2[%c21, %c0_112, %c0_113] : memref<25x8x8xf32, #tpu.memory_space<vmem>>, vector<1x8x8xf32>
    %130 = vector.shape_cast %129 : vector<1x8x8xf32> to vector<8x8xf32>
    %cst_114 = arith.constant dense<0.000000e+00> : vector<8x1024xf32>
    %131 = tpu.matmul %130, %128, %cst_114 {dimension_numbers = #tpu.dot_dimension_numbers<[1], [0], [0], [1], [0, 0, 1, 1], [], []>} : vector<8x8xf32>, vector<8x1024xf32>, vector<8x1024xf32> -> vector<8x1024xf32>
    %132 = arith.addf %126, %131 : vector<8x1024xf32>
    %c0_115 = arith.constant 0 : index
    %c0_116 = arith.constant 0 : index
    %c130 = arith.constant 130 : index
    %133 = vector.load %arg1[%c0_115, %c0_116, %c130] : memref<1x8x1280xf32, #tpu.memory_space<vmem>>, vector<1x8x1024xf32>
    %134 = vector.shape_cast %133 : vector<1x8x1024xf32> to vector<8x1024xf32>
    %c22 = arith.constant 22 : index
    %c0_117 = arith.constant 0 : index
    %c0_118 = arith.constant 0 : index
    %135 = vector.load %arg2[%c22, %c0_117, %c0_118] : memref<25x8x8xf32, #tpu.memory_space<vmem>>, vector<1x8x8xf32>
    %136 = vector.shape_cast %135 : vector<1x8x8xf32> to vector<8x8xf32>
    %cst_119 = arith.constant dense<0.000000e+00> : vector<8x1024xf32>
    %137 = tpu.matmul %136, %134, %cst_119 {dimension_numbers = #tpu.dot_dimension_numbers<[1], [0], [0], [1], [0, 0, 1, 1], [], []>} : vector<8x8xf32>, vector<8x1024xf32>, vector<8x1024xf32> -> vector<8x1024xf32>
    %138 = arith.addf %132, %137 : vector<8x1024xf32>
    %c0_120 = arith.constant 0 : index
    %c0_121 = arith.constant 0 : index
    %c131 = arith.constant 131 : index
    %139 = vector.load %arg1[%c0_120, %c0_121, %c131] : memref<1x8x1280xf32, #tpu.memory_space<vmem>>, vector<1x8x1024xf32>
    %140 = vector.shape_cast %139 : vector<1x8x1024xf32> to vector<8x1024xf32>
    %c23 = arith.constant 23 : index
    %c0_122 = arith.constant 0 : index
    %c0_123 = arith.constant 0 : index
    %141 = vector.load %arg2[%c23, %c0_122, %c0_123] : memref<25x8x8xf32, #tpu.memory_space<vmem>>, vector<1x8x8xf32>
    %142 = vector.shape_cast %141 : vector<1x8x8xf32> to vector<8x8xf32>
    %cst_124 = arith.constant dense<0.000000e+00> : vector<8x1024xf32>
    %143 = tpu.matmul %142, %140, %cst_124 {dimension_numbers = #tpu.dot_dimension_numbers<[1], [0], [0], [1], [0, 0, 1, 1], [], []>} : vector<8x8xf32>, vector<8x1024xf32>, vector<8x1024xf32> -> vector<8x1024xf32>
    %144 = arith.addf %138, %143 : vector<8x1024xf32>
    %c0_125 = arith.constant 0 : index
    %c0_126 = arith.constant 0 : index
    %c132 = arith.constant 132 : index
    %145 = vector.load %arg1[%c0_125, %c0_126, %c132] : memref<1x8x1280xf32, #tpu.memory_space<vmem>>, vector<1x8x1024xf32>
    %146 = vector.shape_cast %145 : vector<1x8x1024xf32> to vector<8x1024xf32>
    %c24 = arith.constant 24 : index
    %c0_127 = arith.constant 0 : index
    %c0_128 = arith.constant 0 : index
    %147 = vector.load %arg2[%c24, %c0_127, %c0_128] : memref<25x8x8xf32, #tpu.memory_space<vmem>>, vector<1x8x8xf32>
    %148 = vector.shape_cast %147 : vector<1x8x8xf32> to vector<8x8xf32>
    %cst_129 = arith.constant dense<0.000000e+00> : vector<8x1024xf32>
    %149 = tpu.matmul %148, %146, %cst_129 {dimension_numbers = #tpu.dot_dimension_numbers<[1], [0], [0], [1], [0, 0, 1, 1], [], []>} : vector<8x8xf32>, vector<8x1024xf32>, vector<8x1024xf32> -> vector<8x1024xf32>
    %150 = arith.addf %144, %149 : vector<8x1024xf32>
    %c0_130 = arith.constant 0 : index
    %c0_131 = arith.constant 0 : index
    %151 = vector.load %arg3[%c0_130, %c0_131] : memref<8x1xf32, #tpu.memory_space<vmem>>, vector<8x1xf32>
    %152 = vector.broadcast %151 : vector<8x1xf32> to vector<8x1024xf32>
    %153 = arith.addf %150, %152 : vector<8x1024xf32>
    %cst_132 = arith.constant 0.000000e+00 : f32
    %154 = vector.broadcast %cst_132 : f32 to vector<8x1024xf32>
    %155 = arith.maximumf %153, %154 : vector<8x1024xf32>
    %c1023_i32 = arith.constant 1023 : i32
    %156 = tpu.dynamic_rotate %155 by %c1023_i32 dim 1 : vector<8x1024xf32>, i32 -> vector<8x1024xf32>
    %157 = arith.maximumf %155, %156 : vector<8x1024xf32>
    %c992_i32 = arith.constant 992 : i32
    %158 = tpu.dynamic_rotate %155 by %c992_i32 dim 1 : vector<8x1024xf32>, i32 -> vector<8x1024xf32>
    %c991_i32 = arith.constant 991 : i32
    %159 = tpu.dynamic_rotate %155 by %c991_i32 dim 1 : vector<8x1024xf32>, i32 -> vector<8x1024xf32>
    %160 = arith.maximumf %158, %159 : vector<8x1024xf32>
    %161 = arith.maximumf %157, %160 : vector<8x1024xf32>
    %c0_133 = arith.constant 0 : index
    %c0_134 = arith.constant 0 : index
    %162 = vector.load %arg7[%c0_133, %c0_134] : memref<8x1024xf32, #tpu.memory_space<vmem>>, vector<8x1024xf32>
    tpu.vector_store %arg7[%c0_133, %c0_134], %161 {strides = array<i32>} : memref<8x1024xf32, #tpu.memory_space<vmem>>, vector<8x1024xf32>,
    %cst_135 = arith.constant 0.000000e+00 : f32
    %163 = vector.broadcast %cst_135 : f32 to vector<16x640xf32>
    %c0_136 = arith.constant 0 : index
    %c0_137 = arith.constant 0 : index
    %164 = vector.load %arg7[%c0_136, %c0_137] : memref<8x1024xf32, #tpu.memory_space<vmem>>, vector<8x640xf32>
    %c0_138 = arith.constant 0 : index
    %c0_139 = arith.constant 0 : index
    %c0_140 = arith.constant 0 : index
    %165 = vector.load %arg4[%c0_138, %c0_139, %c0_140] : memref<25x16x8xf32, #tpu.memory_space<vmem>>, vector<1x16x8xf32>
    %166 = vector.shape_cast %165 : vector<1x16x8xf32> to vector<16x8xf32>
    %cst_141 = arith.constant dense<0.000000e+00> : vector<16x640xf32>
    %167 = tpu.matmul %166, %164, %cst_141 {dimension_numbers = #tpu.dot_dimension_numbers<[1], [0], [0], [1], [0, 0, 1, 1], [], []>} : vector<16x8xf32>, vector<8x640xf32>, vector<16x640xf32> -> vector<16x640xf32>
    %168 = arith.addf %163, %167 : vector<16x640xf32>
    %c0_142 = arith.constant 0 : index
    %c2_143 = arith.constant 2 : index
    %169 = vector.load %arg7[%c0_142, %c2_143] : memref<8x1024xf32, #tpu.memory_space<vmem>>, vector<8x640xf32>
    %c1_144 = arith.constant 1 : index
    %c0_145 = arith.constant 0 : index
    %c0_146 = arith.constant 0 : index
    %170 = vector.load %arg4[%c1_144, %c0_145, %c0_146] : memref<25x16x8xf32, #tpu.memory_space<vmem>>, vector<1x16x8xf32>
    %171 = vector.shape_cast %170 : vector<1x16x8xf32> to vector<16x8xf32>
    %cst_147 = arith.constant dense<0.000000e+00> : vector<16x640xf32>
    %172 = tpu.matmul %171, %169, %cst_147 {dimension_numbers = #tpu.dot_dimension_numbers<[1], [0], [0], [1], [0, 0, 1, 1], [], []>} : vector<16x8xf32>, vector<8x640xf32>, vector<16x640xf32> -> vector<16x640xf32>
    %173 = arith.addf %168, %172 : vector<16x640xf32>
    %c0_148 = arith.constant 0 : index
    %c4_149 = arith.constant 4 : index
    %174 = vector.load %arg7[%c0_148, %c4_149] : memref<8x1024xf32, #tpu.memory_space<vmem>>, vector<8x640xf32>
    %c2_150 = arith.constant 2 : index
    %c0_151 = arith.constant 0 : index
    %c0_152 = arith.constant 0 : index
    %175 = vector.load %arg4[%c2_150, %c0_151, %c0_152] : memref<25x16x8xf32, #tpu.memory_space<vmem>>, vector<1x16x8xf32>
    %176 = vector.shape_cast %175 : vector<1x16x8xf32> to vector<16x8xf32>
    %cst_153 = arith.constant dense<0.000000e+00> : vector<16x640xf32>
    %177 = tpu.matmul %176, %174, %cst_153 {dimension_numbers = #tpu.dot_dimension_numbers<[1], [0], [0], [1], [0, 0, 1, 1], [], []>} : vector<16x8xf32>, vector<8x640xf32>, vector<16x640xf32> -> vector<16x640xf32>
    %178 = arith.addf %173, %177 : vector<16x640xf32>
    %c0_154 = arith.constant 0 : index
    %c6_155 = arith.constant 6 : index
    %179 = vector.load %arg7[%c0_154, %c6_155] : memref<8x1024xf32, #tpu.memory_space<vmem>>, vector<8x640xf32>
    %c3_156 = arith.constant 3 : index
    %c0_157 = arith.constant 0 : index
    %c0_158 = arith.constant 0 : index
    %180 = vector.load %arg4[%c3_156, %c0_157, %c0_158] : memref<25x16x8xf32, #tpu.memory_space<vmem>>, vector<1x16x8xf32>
    %181 = vector.shape_cast %180 : vector<1x16x8xf32> to vector<16x8xf32>
    %cst_159 = arith.constant dense<0.000000e+00> : vector<16x640xf32>
    %182 = tpu.matmul %181, %179, %cst_159 {dimension_numbers = #tpu.dot_dimension_numbers<[1], [0], [0], [1], [0, 0, 1, 1], [], []>} : vector<16x8xf32>, vector<8x640xf32>, vector<16x640xf32> -> vector<16x640xf32>
    %183 = arith.addf %178, %182 : vector<16x640xf32>
    %c0_160 = arith.constant 0 : index
    %c8_161 = arith.constant 8 : index
    %184 = vector.load %arg7[%c0_160, %c8_161] : memref<8x1024xf32, #tpu.memory_space<vmem>>, vector<8x640xf32>
    %c4_162 = arith.constant 4 : index
    %c0_163 = arith.constant 0 : index
    %c0_164 = arith.constant 0 : index
    %185 = vector.load %arg4[%c4_162, %c0_163, %c0_164] : memref<25x16x8xf32, #tpu.memory_space<vmem>>, vector<1x16x8xf32>
    %186 = vector.shape_cast %185 : vector<1x16x8xf32> to vector<16x8xf32>
    %cst_165 = arith.constant dense<0.000000e+00> : vector<16x640xf32>
    %187 = tpu.matmul %186, %184, %cst_165 {dimension_numbers = #tpu.dot_dimension_numbers<[1], [0], [0], [1], [0, 0, 1, 1], [], []>} : vector<16x8xf32>, vector<8x640xf32>, vector<16x640xf32> -> vector<16x640xf32>
    %188 = arith.addf %183, %187 : vector<16x640xf32>
    %c0_166 = arith.constant 0 : index
    %c64_167 = arith.constant 64 : index
    %189 = vector.load %arg7[%c0_166, %c64_167] : memref<8x1024xf32, #tpu.memory_space<vmem>>, vector<8x640xf32>
    %c5_168 = arith.constant 5 : index
    %c0_169 = arith.constant 0 : index
    %c0_170 = arith.constant 0 : index
    %190 = vector.load %arg4[%c5_168, %c0_169, %c0_170] : memref<25x16x8xf32, #tpu.memory_space<vmem>>, vector<1x16x8xf32>
    %191 = vector.shape_cast %190 : vector<1x16x8xf32> to vector<16x8xf32>
    %cst_171 = arith.constant dense<0.000000e+00> : vector<16x640xf32>
    %192 = tpu.matmul %191, %189, %cst_171 {dimension_numbers = #tpu.dot_dimension_numbers<[1], [0], [0], [1], [0, 0, 1, 1], [], []>} : vector<16x8xf32>, vector<8x640xf32>, vector<16x640xf32> -> vector<16x640xf32>
    %193 = arith.addf %188, %192 : vector<16x640xf32>
    %c0_172 = arith.constant 0 : index
    %c66_173 = arith.constant 66 : index
    %194 = vector.load %arg7[%c0_172, %c66_173] : memref<8x1024xf32, #tpu.memory_space<vmem>>, vector<8x640xf32>
    %c6_174 = arith.constant 6 : index
    %c0_175 = arith.constant 0 : index
    %c0_176 = arith.constant 0 : index
    %195 = vector.load %arg4[%c6_174, %c0_175, %c0_176] : memref<25x16x8xf32, #tpu.memory_space<vmem>>, vector<1x16x8xf32>
    %196 = vector.shape_cast %195 : vector<1x16x8xf32> to vector<16x8xf32>
    %cst_177 = arith.constant dense<0.000000e+00> : vector<16x640xf32>
    %197 = tpu.matmul %196, %194, %cst_177 {dimension_numbers = #tpu.dot_dimension_numbers<[1], [0], [0], [1], [0, 0, 1, 1], [], []>} : vector<16x8xf32>, vector<8x640xf32>, vector<16x640xf32> -> vector<16x640xf32>
    %198 = arith.addf %193, %197 : vector<16x640xf32>
    %c0_178 = arith.constant 0 : index
    %c68_179 = arith.constant 68 : index
    %199 = vector.load %arg7[%c0_178, %c68_179] : memref<8x1024xf32, #tpu.memory_space<vmem>>, vector<8x640xf32>
    %c7_180 = arith.constant 7 : index
    %c0_181 = arith.constant 0 : index
    %c0_182 = arith.constant 0 : index
    %200 = vector.load %arg4[%c7_180, %c0_181, %c0_182] : memref<25x16x8xf32, #tpu.memory_space<vmem>>, vector<1x16x8xf32>
    %201 = vector.shape_cast %200 : vector<1x16x8xf32> to vector<16x8xf32>
    %cst_183 = arith.constant dense<0.000000e+00> : vector<16x640xf32>
    %202 = tpu.matmul %201, %199, %cst_183 {dimension_numbers = #tpu.dot_dimension_numbers<[1], [0], [0], [1], [0, 0, 1, 1], [], []>} : vector<16x8xf32>, vector<8x640xf32>, vector<16x640xf32> -> vector<16x640xf32>
    %203 = arith.addf %198, %202 : vector<16x640xf32>
    %c0_184 = arith.constant 0 : index
    %c70 = arith.constant 70 : index
    %204 = vector.load %arg7[%c0_184, %c70] : memref<8x1024xf32, #tpu.memory_space<vmem>>, vector<8x640xf32>
    %c8_185 = arith.constant 8 : index
    %c0_186 = arith.constant 0 : index
    %c0_187 = arith.constant 0 : index
    %205 = vector.load %arg4[%c8_185, %c0_186, %c0_187] : memref<25x16x8xf32, #tpu.memory_space<vmem>>, vector<1x16x8xf32>
    %206 = vector.shape_cast %205 : vector<1x16x8xf32> to vector<16x8xf32>
    %cst_188 = arith.constant dense<0.000000e+00> : vector<16x640xf32>
    %207 = tpu.matmul %206, %204, %cst_188 {dimension_numbers = #tpu.dot_dimension_numbers<[1], [0], [0], [1], [0, 0, 1, 1], [], []>} : vector<16x8xf32>, vector<8x640xf32>, vector<16x640xf32> -> vector<16x640xf32>
    %208 = arith.addf %203, %207 : vector<16x640xf32>
    %c0_189 = arith.constant 0 : index
    %c72 = arith.constant 72 : index
    %209 = vector.load %arg7[%c0_189, %c72] : memref<8x1024xf32, #tpu.memory_space<vmem>>, vector<8x640xf32>
    %c9_190 = arith.constant 9 : index
    %c0_191 = arith.constant 0 : index
    %c0_192 = arith.constant 0 : index
    %210 = vector.load %arg4[%c9_190, %c0_191, %c0_192] : memref<25x16x8xf32, #tpu.memory_space<vmem>>, vector<1x16x8xf32>
    %211 = vector.shape_cast %210 : vector<1x16x8xf32> to vector<16x8xf32>
    %cst_193 = arith.constant dense<0.000000e+00> : vector<16x640xf32>
    %212 = tpu.matmul %211, %209, %cst_193 {dimension_numbers = #tpu.dot_dimension_numbers<[1], [0], [0], [1], [0, 0, 1, 1], [], []>} : vector<16x8xf32>, vector<8x640xf32>, vector<16x640xf32> -> vector<16x640xf32>
    %213 = arith.addf %208, %212 : vector<16x640xf32>
    %c0_194 = arith.constant 0 : index
    %c128_195 = arith.constant 128 : index
    %214 = vector.load %arg7[%c0_194, %c128_195] : memref<8x1024xf32, #tpu.memory_space<vmem>>, vector<8x640xf32>
    %c10_196 = arith.constant 10 : index
    %c0_197 = arith.constant 0 : index
    %c0_198 = arith.constant 0 : index
    %215 = vector.load %arg4[%c10_196, %c0_197, %c0_198] : memref<25x16x8xf32, #tpu.memory_space<vmem>>, vector<1x16x8xf32>
    %216 = vector.shape_cast %215 : vector<1x16x8xf32> to vector<16x8xf32>
    %cst_199 = arith.constant dense<0.000000e+00> : vector<16x640xf32>
    %217 = tpu.matmul %216, %214, %cst_199 {dimension_numbers = #tpu.dot_dimension_numbers<[1], [0], [0], [1], [0, 0, 1, 1], [], []>} : vector<16x8xf32>, vector<8x640xf32>, vector<16x640xf32> -> vector<16x640xf32>
    %218 = arith.addf %213, %217 : vector<16x640xf32>
    %c0_200 = arith.constant 0 : index
    %c130_201 = arith.constant 130 : index
    %219 = vector.load %arg7[%c0_200, %c130_201] : memref<8x1024xf32, #tpu.memory_space<vmem>>, vector<8x640xf32>
    %c11_202 = arith.constant 11 : index
    %c0_203 = arith.constant 0 : index
    %c0_204 = arith.constant 0 : index
    %220 = vector.load %arg4[%c11_202, %c0_203, %c0_204] : memref<25x16x8xf32, #tpu.memory_space<vmem>>, vector<1x16x8xf32>
    %221 = vector.shape_cast %220 : vector<1x16x8xf32> to vector<16x8xf32>
    %cst_205 = arith.constant dense<0.000000e+00> : vector<16x640xf32>
    %222 = tpu.matmul %221, %219, %cst_205 {dimension_numbers = #tpu.dot_dimension_numbers<[1], [0], [0], [1], [0, 0, 1, 1], [], []>} : vector<16x8xf32>, vector<8x640xf32>, vector<16x640xf32> -> vector<16x640xf32>
    %223 = arith.addf %218, %222 : vector<16x640xf32>
    %c0_206 = arith.constant 0 : index
    %c132_207 = arith.constant 132 : index
    %224 = vector.load %arg7[%c0_206, %c132_207] : memref<8x1024xf32, #tpu.memory_space<vmem>>, vector<8x640xf32>
    %c12_208 = arith.constant 12 : index
    %c0_209 = arith.constant 0 : index
    %c0_210 = arith.constant 0 : index
    %225 = vector.load %arg4[%c12_208, %c0_209, %c0_210] : memref<25x16x8xf32, #tpu.memory_space<vmem>>, vector<1x16x8xf32>
    %226 = vector.shape_cast %225 : vector<1x16x8xf32> to vector<16x8xf32>
    %cst_211 = arith.constant dense<0.000000e+00> : vector<16x640xf32>
    %227 = tpu.matmul %226, %224, %cst_211 {dimension_numbers = #tpu.dot_dimension_numbers<[1], [0], [0], [1], [0, 0, 1, 1], [], []>} : vector<16x8xf32>, vector<8x640xf32>, vector<16x640xf32> -> vector<16x640xf32>
    %228 = arith.addf %223, %227 : vector<16x640xf32>
    %c0_212 = arith.constant 0 : index
    %c134 = arith.constant 134 : index
    %229 = vector.load %arg7[%c0_212, %c134] : memref<8x1024xf32, #tpu.memory_space<vmem>>, vector<8x640xf32>
    %c13_213 = arith.constant 13 : index
    %c0_214 = arith.constant 0 : index
    %c0_215 = arith.constant 0 : index
    %230 = vector.load %arg4[%c13_213, %c0_214, %c0_215] : memref<25x16x8xf32, #tpu.memory_space<vmem>>, vector<1x16x8xf32>
    %231 = vector.shape_cast %230 : vector<1x16x8xf32> to vector<16x8xf32>
    %cst_216 = arith.constant dense<0.000000e+00> : vector<16x640xf32>
    %232 = tpu.matmul %231, %229, %cst_216 {dimension_numbers = #tpu.dot_dimension_numbers<[1], [0], [0], [1], [0, 0, 1, 1], [], []>} : vector<16x8xf32>, vector<8x640xf32>, vector<16x640xf32> -> vector<16x640xf32>
    %233 = arith.addf %228, %232 : vector<16x640xf32>
    %c0_217 = arith.constant 0 : index
    %c136 = arith.constant 136 : index
    %234 = vector.load %arg7[%c0_217, %c136] : memref<8x1024xf32, #tpu.memory_space<vmem>>, vector<8x640xf32>
    %c14_218 = arith.constant 14 : index
    %c0_219 = arith.constant 0 : index
    %c0_220 = arith.constant 0 : index
    %235 = vector.load %arg4[%c14_218, %c0_219, %c0_220] : memref<25x16x8xf32, #tpu.memory_space<vmem>>, vector<1x16x8xf32>
    %236 = vector.shape_cast %235 : vector<1x16x8xf32> to vector<16x8xf32>
    %cst_221 = arith.constant dense<0.000000e+00> : vector<16x640xf32>
    %237 = tpu.matmul %236, %234, %cst_221 {dimension_numbers = #tpu.dot_dimension_numbers<[1], [0], [0], [1], [0, 0, 1, 1], [], []>} : vector<16x8xf32>, vector<8x640xf32>, vector<16x640xf32> -> vector<16x640xf32>
    %238 = arith.addf %233, %237 : vector<16x640xf32>
    %c0_222 = arith.constant 0 : index
    %c192 = arith.constant 192 : index
    %239 = vector.load %arg7[%c0_222, %c192] : memref<8x1024xf32, #tpu.memory_space<vmem>>, vector<8x640xf32>
    %c15_223 = arith.constant 15 : index
    %c0_224 = arith.constant 0 : index
    %c0_225 = arith.constant 0 : index
    %240 = vector.load %arg4[%c15_223, %c0_224, %c0_225] : memref<25x16x8xf32, #tpu.memory_space<vmem>>, vector<1x16x8xf32>
    %241 = vector.shape_cast %240 : vector<1x16x8xf32> to vector<16x8xf32>
    %cst_226 = arith.constant dense<0.000000e+00> : vector<16x640xf32>
    %242 = tpu.matmul %241, %239, %cst_226 {dimension_numbers = #tpu.dot_dimension_numbers<[1], [0], [0], [1], [0, 0, 1, 1], [], []>} : vector<16x8xf32>, vector<8x640xf32>, vector<16x640xf32> -> vector<16x640xf32>
    %243 = arith.addf %238, %242 : vector<16x640xf32>
    %c0_227 = arith.constant 0 : index
    %c194 = arith.constant 194 : index
    %244 = vector.load %arg7[%c0_227, %c194] : memref<8x1024xf32, #tpu.memory_space<vmem>>, vector<8x640xf32>
    %c16_228 = arith.constant 16 : index
    %c0_229 = arith.constant 0 : index
    %c0_230 = arith.constant 0 : index
    %245 = vector.load %arg4[%c16_228, %c0_229, %c0_230] : memref<25x16x8xf32, #tpu.memory_space<vmem>>, vector<1x16x8xf32>
    %246 = vector.shape_cast %245 : vector<1x16x8xf32> to vector<16x8xf32>
    %cst_231 = arith.constant dense<0.000000e+00> : vector<16x640xf32>
    %247 = tpu.matmul %246, %244, %cst_231 {dimension_numbers = #tpu.dot_dimension_numbers<[1], [0], [0], [1], [0, 0, 1, 1], [], []>} : vector<16x8xf32>, vector<8x640xf32>, vector<16x640xf32> -> vector<16x640xf32>
    %248 = arith.addf %243, %247 : vector<16x640xf32>
    %c0_232 = arith.constant 0 : index
    %c196 = arith.constant 196 : index
    %249 = vector.load %arg7[%c0_232, %c196] : memref<8x1024xf32, #tpu.memory_space<vmem>>, vector<8x640xf32>
    %c17_233 = arith.constant 17 : index
    %c0_234 = arith.constant 0 : index
    %c0_235 = arith.constant 0 : index
    %250 = vector.load %arg4[%c17_233, %c0_234, %c0_235] : memref<25x16x8xf32, #tpu.memory_space<vmem>>, vector<1x16x8xf32>
    %251 = vector.shape_cast %250 : vector<1x16x8xf32> to vector<16x8xf32>
    %cst_236 = arith.constant dense<0.000000e+00> : vector<16x640xf32>
    %252 = tpu.matmul %251, %249, %cst_236 {dimension_numbers = #tpu.dot_dimension_numbers<[1], [0], [0], [1], [0, 0, 1, 1], [], []>} : vector<16x8xf32>, vector<8x640xf32>, vector<16x640xf32> -> vector<16x640xf32>
    %253 = arith.addf %248, %252 : vector<16x640xf32>
    %c0_237 = arith.constant 0 : index
    %c198 = arith.constant 198 : index
    %254 = vector.load %arg7[%c0_237, %c198] : memref<8x1024xf32, #tpu.memory_space<vmem>>, vector<8x640xf32>
    %c18_238 = arith.constant 18 : index
    %c0_239 = arith.constant 0 : index
    %c0_240 = arith.constant 0 : index
    %255 = vector.load %arg4[%c18_238, %c0_239, %c0_240] : memref<25x16x8xf32, #tpu.memory_space<vmem>>, vector<1x16x8xf32>
    %256 = vector.shape_cast %255 : vector<1x16x8xf32> to vector<16x8xf32>
    %cst_241 = arith.constant dense<0.000000e+00> : vector<16x640xf32>
    %257 = tpu.matmul %256, %254, %cst_241 {dimension_numbers = #tpu.dot_dimension_numbers<[1], [0], [0], [1], [0, 0, 1, 1], [], []>} : vector<16x8xf32>, vector<8x640xf32>, vector<16x640xf32> -> vector<16x640xf32>
    %258 = arith.addf %253, %257 : vector<16x640xf32>
    %c0_242 = arith.constant 0 : index
    %c200 = arith.constant 200 : index
    %259 = vector.load %arg7[%c0_242, %c200] : memref<8x1024xf32, #tpu.memory_space<vmem>>, vector<8x640xf32>
    %c19_243 = arith.constant 19 : index
    %c0_244 = arith.constant 0 : index
    %c0_245 = arith.constant 0 : index
    %260 = vector.load %arg4[%c19_243, %c0_244, %c0_245] : memref<25x16x8xf32, #tpu.memory_space<vmem>>, vector<1x16x8xf32>
    %261 = vector.shape_cast %260 : vector<1x16x8xf32> to vector<16x8xf32>
    %cst_246 = arith.constant dense<0.000000e+00> : vector<16x640xf32>
    %262 = tpu.matmul %261, %259, %cst_246 {dimension_numbers = #tpu.dot_dimension_numbers<[1], [0], [0], [1], [0, 0, 1, 1], [], []>} : vector<16x8xf32>, vector<8x640xf32>, vector<16x640xf32> -> vector<16x640xf32>
    %263 = arith.addf %258, %262 : vector<16x640xf32>
    %c0_247 = arith.constant 0 : index
    %c256 = arith.constant 256 : index
    %264 = vector.load %arg7[%c0_247, %c256] : memref<8x1024xf32, #tpu.memory_space<vmem>>, vector<8x640xf32>
    %c20_248 = arith.constant 20 : index
    %c0_249 = arith.constant 0 : index
    %c0_250 = arith.constant 0 : index
    %265 = vector.load %arg4[%c20_248, %c0_249, %c0_250] : memref<25x16x8xf32, #tpu.memory_space<vmem>>, vector<1x16x8xf32>
    %266 = vector.shape_cast %265 : vector<1x16x8xf32> to vector<16x8xf32>
    %cst_251 = arith.constant dense<0.000000e+00> : vector<16x640xf32>
    %267 = tpu.matmul %266, %264, %cst_251 {dimension_numbers = #tpu.dot_dimension_numbers<[1], [0], [0], [1], [0, 0, 1, 1], [], []>} : vector<16x8xf32>, vector<8x640xf32>, vector<16x640xf32> -> vector<16x640xf32>
    %268 = arith.addf %263, %267 : vector<16x640xf32>
    %c0_252 = arith.constant 0 : index
    %c258 = arith.constant 258 : index
    %269 = vector.load %arg7[%c0_252, %c258] : memref<8x1024xf32, #tpu.memory_space<vmem>>, vector<8x640xf32>
    %c21_253 = arith.constant 21 : index
    %c0_254 = arith.constant 0 : index
    %c0_255 = arith.constant 0 : index
    %270 = vector.load %arg4[%c21_253, %c0_254, %c0_255] : memref<25x16x8xf32, #tpu.memory_space<vmem>>, vector<1x16x8xf32>
    %271 = vector.shape_cast %270 : vector<1x16x8xf32> to vector<16x8xf32>
    %cst_256 = arith.constant dense<0.000000e+00> : vector<16x640xf32>
    %272 = tpu.matmul %271, %269, %cst_256 {dimension_numbers = #tpu.dot_dimension_numbers<[1], [0], [0], [1], [0, 0, 1, 1], [], []>} : vector<16x8xf32>, vector<8x640xf32>, vector<16x640xf32> -> vector<16x640xf32>
    %273 = arith.addf %268, %272 : vector<16x640xf32>
    %c0_257 = arith.constant 0 : index
    %c260 = arith.constant 260 : index
    %274 = vector.load %arg7[%c0_257, %c260] : memref<8x1024xf32, #tpu.memory_space<vmem>>, vector<8x640xf32>
    %c22_258 = arith.constant 22 : index
    %c0_259 = arith.constant 0 : index
    %c0_260 = arith.constant 0 : index
    %275 = vector.load %arg4[%c22_258, %c0_259, %c0_260] : memref<25x16x8xf32, #tpu.memory_space<vmem>>, vector<1x16x8xf32>
    %276 = vector.shape_cast %275 : vector<1x16x8xf32> to vector<16x8xf32>
    %cst_261 = arith.constant dense<0.000000e+00> : vector<16x640xf32>
    %277 = tpu.matmul %276, %274, %cst_261 {dimension_numbers = #tpu.dot_dimension_numbers<[1], [0], [0], [1], [0, 0, 1, 1], [], []>} : vector<16x8xf32>, vector<8x640xf32>, vector<16x640xf32> -> vector<16x640xf32>
    %278 = arith.addf %273, %277 : vector<16x640xf32>
    %c0_262 = arith.constant 0 : index
    %c262 = arith.constant 262 : index
    %279 = vector.load %arg7[%c0_262, %c262] : memref<8x1024xf32, #tpu.memory_space<vmem>>, vector<8x640xf32>
    %c23_263 = arith.constant 23 : index
    %c0_264 = arith.constant 0 : index
    %c0_265 = arith.constant 0 : index
    %280 = vector.load %arg4[%c23_263, %c0_264, %c0_265] : memref<25x16x8xf32, #tpu.memory_space<vmem>>, vector<1x16x8xf32>
    %281 = vector.shape_cast %280 : vector<1x16x8xf32> to vector<16x8xf32>
    %cst_266 = arith.constant dense<0.000000e+00> : vector<16x640xf32>
    %282 = tpu.matmul %281, %279, %cst_266 {dimension_numbers = #tpu.dot_dimension_numbers<[1], [0], [0], [1], [0, 0, 1, 1], [], []>} : vector<16x8xf32>, vector<8x640xf32>, vector<16x640xf32> -> vector<16x640xf32>
    %283 = arith.addf %278, %282 : vector<16x640xf32>
    %c0_267 = arith.constant 0 : index
    %c264 = arith.constant 264 : index
    %284 = vector.load %arg7[%c0_267, %c264] : memref<8x1024xf32, #tpu.memory_space<vmem>>, vector<8x640xf32>
    %c24_268 = arith.constant 24 : index
    %c0_269 = arith.constant 0 : index
    %c0_270 = arith.constant 0 : index
    %285 = vector.load %arg4[%c24_268, %c0_269, %c0_270] : memref<25x16x8xf32, #tpu.memory_space<vmem>>, vector<1x16x8xf32>
    %286 = vector.shape_cast %285 : vector<1x16x8xf32> to vector<16x8xf32>
    %cst_271 = arith.constant dense<0.000000e+00> : vector<16x640xf32>
    %287 = tpu.matmul %286, %284, %cst_271 {dimension_numbers = #tpu.dot_dimension_numbers<[1], [0], [0], [1], [0, 0, 1, 1], [], []>} : vector<16x8xf32>, vector<8x640xf32>, vector<16x640xf32> -> vector<16x640xf32>
    %288 = arith.addf %283, %287 : vector<16x640xf32>
    %c0_272 = arith.constant 0 : index
    %c0_273 = arith.constant 0 : index
    %289 = vector.load %arg5[%c0_272, %c0_273] : memref<16x1xf32, #tpu.memory_space<vmem>>, vector<16x1xf32>
    %290 = vector.broadcast %289 : vector<16x1xf32> to vector<16x640xf32>
    %291 = arith.addf %288, %290 : vector<16x640xf32>
    %cst_274 = arith.constant 0.000000e+00 : f32
    %292 = vector.broadcast %cst_274 : f32 to vector<16x640xf32>
    %293 = arith.maximumf %291, %292 : vector<16x640xf32>
    %c638_i32 = arith.constant 638 : i32
    %294 = tpu.dynamic_rotate %293 by %c638_i32 dim 1 : vector<16x640xf32>, i32 -> vector<16x640xf32>
    %295 = arith.maximumf %293, %294 : vector<16x640xf32>
    %c576_i32 = arith.constant 576 : i32
    %296 = tpu.dynamic_rotate %293 by %c576_i32 dim 1 : vector<16x640xf32>, i32 -> vector<16x640xf32>
    %c574_i32 = arith.constant 574 : i32
    %297 = tpu.dynamic_rotate %293 by %c574_i32 dim 1 : vector<16x640xf32>, i32 -> vector<16x640xf32>
    %298 = arith.maximumf %296, %297 : vector<16x640xf32>
    %299 = arith.maximumf %295, %298 : vector<16x640xf32>
    %c0_275 = arith.constant 0 : index
    %c0_276 = arith.constant 0 : index
    %c0_277 = arith.constant 0 : index
    %300 = vector.load %arg6[%c0_275, %c0_276, %c0_277] : memref<1x16x640xf32, #tpu.memory_space<vmem>>, vector<1x16x640xf32>
    %301 = vector.shape_cast %300 : vector<1x16x640xf32> to vector<16x640xf32>
    %302 = vector.shape_cast %299 : vector<16x640xf32> to vector<1x16x640xf32>
    tpu.vector_store %arg6[%c0_275, %c0_276, %c0_277], %302 {strides = array<i32>} : memref<1x16x640xf32, #tpu.memory_space<vmem>>, vector<1x16x640xf32>,
    return
  }
  func.func @transform_0(%arg0: i32) -> (i32, i32, i32) {
    %c0_i32 = arith.constant 0 : i32
    %c0_i32_0 = arith.constant 0 : i32
    %c0_i32_1 = arith.constant 0 : i32
    return %arg0, %c0_i32, %c0_i32_0 : i32, i32, i32
  }
  func.func @transform_1(%arg0: i32) -> (i32, i32, i32) {
    %c0_i32 = arith.constant 0 : i32
    %c0_i32_0 = arith.constant 0 : i32
    %c0_i32_1 = arith.constant 0 : i32
    %c0_i32_2 = arith.constant 0 : i32
    return %c0_i32, %c0_i32_0, %c0_i32_1 : i32, i32, i32
  }
  func.func @transform_2(%arg0: i32) -> (i32, i32) {
    %c0_i32 = arith.constant 0 : i32
    %c0_i32_0 = arith.constant 0 : i32
    %c0_i32_1 = arith.constant 0 : i32
    return %c0_i32, %c0_i32_0 : i32, i32
  }
  func.func @transform_3(%arg0: i32) -> (i32, i32, i32) {
    %c0_i32 = arith.constant 0 : i32
    %c0_i32_0 = arith.constant 0 : i32
    %c0_i32_1 = arith.constant 0 : i32
    %c0_i32_2 = arith.constant 0 : i32
    return %c0_i32, %c0_i32_0, %c0_i32_1 : i32, i32, i32
  }
  func.func @transform_4(%arg0: i32) -> (i32, i32) {
    %c0_i32 = arith.constant 0 : i32
    %c0_i32_0 = arith.constant 0 : i32
    %c0_i32_1 = arith.constant 0 : i32
    return %c0_i32, %c0_i32_0 : i32, i32
  }
  func.func @transform_5(%arg0: i32) -> (i32, i32, i32) {
    %c0_i32 = arith.constant 0 : i32
    %c0_i32_0 = arith.constant 0 : i32
    %c0_i32_1 = arith.constant 0 : i32
    return %arg0, %c0_i32, %c0_i32_0 : i32, i32, i32
  }
}

module attributes {stable_mosaic.version = 11 : i64} {
  func.func @_fc_kernel(%arg0: i32, %arg1: memref<8x400xf32, #tpu.memory_space<vmem>>, %arg2: memref<400x128xf32, #tpu.memory_space<vmem>>, %arg3: memref<1x128xf32, #tpu.memory_space<vmem>>, %arg4: memref<128x128xf32, #tpu.memory_space<vmem>>, %arg5: memref<1x128xf32, #tpu.memory_space<vmem>>, %arg6: memref<128x128xf32, #tpu.memory_space<vmem>>, %arg7: memref<1x128xf32, #tpu.memory_space<vmem>>, %arg8: memref<8x128xf32, #tpu.memory_space<vmem>>) attributes {dimension_semantics = [#tpu.dimension_semantics<parallel>], iteration_bounds = array<i64: 1>, scalar_prefetch = 0 : i64, scratch_operands = 0 : i64, tpu.core_type = #tpu.core_type<tc>, window_params = [{transform_indices = @transform_0, window_bounds = array<i64: 8, 400>}, {pipeline_mode = #tpu.pipeline_mode<synchronous>, transform_indices = @transform_1, window_bounds = array<i64: 400, 128>}, {pipeline_mode = #tpu.pipeline_mode<synchronous>, transform_indices = @transform_2, window_bounds = array<i64: 1, 128>}, {pipeline_mode = #tpu.pipeline_mode<synchronous>, transform_indices = @transform_3, window_bounds = array<i64: 128, 128>}, {pipeline_mode = #tpu.pipeline_mode<synchronous>, transform_indices = @transform_4, window_bounds = array<i64: 1, 128>}, {pipeline_mode = #tpu.pipeline_mode<synchronous>, transform_indices = @transform_5, window_bounds = array<i64: 128, 128>}, {pipeline_mode = #tpu.pipeline_mode<synchronous>, transform_indices = @transform_6, window_bounds = array<i64: 1, 128>}, {transform_indices = @transform_7, window_bounds = array<i64: 8, 128>}]} {
    %c0 = arith.constant 0 : index
    %c0_0 = arith.constant 0 : index
    %0 = vector.load %arg1[%c0, %c0_0] : memref<8x400xf32, #tpu.memory_space<vmem>>, vector<8x400xf32>
    %c0_1 = arith.constant 0 : index
    %c0_2 = arith.constant 0 : index
    %1 = vector.load %arg2[%c0_1, %c0_2] : memref<400x128xf32, #tpu.memory_space<vmem>>, vector<400x128xf32>
    %cst = arith.constant dense<0.000000e+00> : vector<8x128xf32>
    %2 = tpu.matmul %0, %1, %cst {dimension_numbers = #tpu.dot_dimension_numbers<[1], [0], [0], [1], [0, 0, 1, 1], [], []>} : vector<8x400xf32>, vector<400x128xf32>, vector<8x128xf32> -> vector<8x128xf32>
    %c0_3 = arith.constant 0 : index
    %c0_4 = arith.constant 0 : index
    %3 = vector.load %arg3[%c0_3, %c0_4] : memref<1x128xf32, #tpu.memory_space<vmem>>, vector<1x128xf32>
    %4 = vector.broadcast %3 : vector<1x128xf32> to vector<8x128xf32>
    %5 = arith.addf %2, %4 : vector<8x128xf32>
    %cst_5 = arith.constant 0.000000e+00 : f32
    %6 = vector.broadcast %cst_5 : f32 to vector<8x128xf32>
    %7 = arith.maximumf %5, %6 : vector<8x128xf32>
    %c0_6 = arith.constant 0 : index
    %c0_7 = arith.constant 0 : index
    %8 = vector.load %arg4[%c0_6, %c0_7] : memref<128x128xf32, #tpu.memory_space<vmem>>, vector<128x128xf32>
    %cst_8 = arith.constant dense<0.000000e+00> : vector<8x128xf32>
    %9 = tpu.matmul %7, %8, %cst_8 {dimension_numbers = #tpu.dot_dimension_numbers<[1], [0], [0], [1], [0, 0, 1, 1], [], []>} : vector<8x128xf32>, vector<128x128xf32>, vector<8x128xf32> -> vector<8x128xf32>
    %c0_9 = arith.constant 0 : index
    %c0_10 = arith.constant 0 : index
    %10 = vector.load %arg5[%c0_9, %c0_10] : memref<1x128xf32, #tpu.memory_space<vmem>>, vector<1x128xf32>
    %11 = vector.broadcast %10 : vector<1x128xf32> to vector<8x128xf32>
    %12 = arith.addf %9, %11 : vector<8x128xf32>
    %cst_11 = arith.constant 0.000000e+00 : f32
    %13 = vector.broadcast %cst_11 : f32 to vector<8x128xf32>
    %14 = arith.maximumf %12, %13 : vector<8x128xf32>
    %c0_12 = arith.constant 0 : index
    %c0_13 = arith.constant 0 : index
    %15 = vector.load %arg6[%c0_12, %c0_13] : memref<128x128xf32, #tpu.memory_space<vmem>>, vector<128x128xf32>
    %cst_14 = arith.constant dense<0.000000e+00> : vector<8x128xf32>
    %16 = tpu.matmul %14, %15, %cst_14 {dimension_numbers = #tpu.dot_dimension_numbers<[1], [0], [0], [1], [0, 0, 1, 1], [], []>} : vector<8x128xf32>, vector<128x128xf32>, vector<8x128xf32> -> vector<8x128xf32>
    %c0_15 = arith.constant 0 : index
    %c0_16 = arith.constant 0 : index
    %17 = vector.load %arg7[%c0_15, %c0_16] : memref<1x128xf32, #tpu.memory_space<vmem>>, vector<1x128xf32>
    %18 = vector.broadcast %17 : vector<1x128xf32> to vector<8x128xf32>
    %19 = arith.addf %16, %18 : vector<8x128xf32>
    %c0_17 = arith.constant 0 : index
    %c0_18 = arith.constant 0 : index
    %20 = vector.load %arg8[%c0_17, %c0_18] : memref<8x128xf32, #tpu.memory_space<vmem>>, vector<8x128xf32>
    tpu.vector_store %arg8[%c0_17, %c0_18], %19 {strides = array<i32>} : memref<8x128xf32, #tpu.memory_space<vmem>>, vector<8x128xf32>,
    return
  }
  func.func @transform_0(%arg0: i32) -> (i32, i32) {
    %c0_i32 = arith.constant 0 : i32
    %c0_i32_0 = arith.constant 0 : i32
    return %arg0, %c0_i32 : i32, i32
  }
  func.func @transform_1(%arg0: i32) -> (i32, i32) {
    %c0_i32 = arith.constant 0 : i32
    %c0_i32_0 = arith.constant 0 : i32
    %c0_i32_1 = arith.constant 0 : i32
    return %c0_i32, %c0_i32_0 : i32, i32
  }
  func.func @transform_2(%arg0: i32) -> (i32, i32) {
    %c0_i32 = arith.constant 0 : i32
    %c0_i32_0 = arith.constant 0 : i32
    %c0_i32_1 = arith.constant 0 : i32
    return %c0_i32, %c0_i32_0 : i32, i32
  }
  func.func @transform_3(%arg0: i32) -> (i32, i32) {
    %c0_i32 = arith.constant 0 : i32
    %c0_i32_0 = arith.constant 0 : i32
    %c0_i32_1 = arith.constant 0 : i32
    return %c0_i32, %c0_i32_0 : i32, i32
  }
  func.func @transform_4(%arg0: i32) -> (i32, i32) {
    %c0_i32 = arith.constant 0 : i32
    %c0_i32_0 = arith.constant 0 : i32
    %c0_i32_1 = arith.constant 0 : i32
    return %c0_i32, %c0_i32_0 : i32, i32
  }
  func.func @transform_5(%arg0: i32) -> (i32, i32) {
    %c0_i32 = arith.constant 0 : i32
    %c0_i32_0 = arith.constant 0 : i32
    %c0_i32_1 = arith.constant 0 : i32
    return %c0_i32, %c0_i32_0 : i32, i32
  }
  func.func @transform_6(%arg0: i32) -> (i32, i32) {
    %c0_i32 = arith.constant 0 : i32
    %c0_i32_0 = arith.constant 0 : i32
    %c0_i32_1 = arith.constant 0 : i32
    return %c0_i32, %c0_i32_0 : i32, i32
  }
  func.func @transform_7(%arg0: i32) -> (i32, i32) {
    %c0_i32 = arith.constant 0 : i32
    %c0_i32_0 = arith.constant 0 : i32
    return %arg0, %c0_i32 : i32, i32
  }
}

</mosaic_0001>

<bundles_post_ra>
// kernel: net_forward.3
= control target key start
LH: loop header
LB: loop body
LE: loop exit
PB: predicated region body
PF: predicated region fallthrough
CT: control target
= control target key end

     0   :  { %v677_v2 = vmov 0.0|0.0   ;;  %vm87_vm0 = vcmask 130048   ;;  %vm678_vm1 = vmmov 0   ;;  %s1016_s1 = inlined_call_operand.vmem [shape: f32[400,128], index: 1, kind: input, shape index: {}]   ;;  %s1017_s0 = inlined_call_operand.vmem [shape: f32[8,400], index: 0, kind: input, shape index: {}]   ;;  %s1018_s3 = inlined_call_operand.vmem [shape: f32[128,128], index: 3, kind: input, shape index: {}]   ;;  %s1019_s5 = inlined_call_operand.vmem [shape: f32[128,128], index: 5, kind: input, shape index: {}]   ;;  %s1020_s2 = inlined_call_operand.vmem [shape: f32[1,128], index: 2, kind: input, shape index: {}]   ;;  %s1021_s4 = inlined_call_operand.vmem [shape: f32[1,128], index: 4, kind: input, shape index: {}]   ;;  %s1022_s6 = inlined_call_operand.vmem [shape: f32[1,128], index: 6, kind: input, shape index: {}]   ;;  %s1023_s7 = inlined_call_operand.vmem [shape: f32[8,128], index: 7, kind: output, shape index: {}]  }
   0x1   :  { %v46_v0 = vld [vmem:[%s1016_s1 + $0x80] sm:$0xff]  ;;  %v47_v1 = vld [vmem:[%s1016_s1 + $0x88] sm:$0xff]  ;;  %599 = vmatprep.subr.bf16.mxu1 %v677_v2  ;;  %v48_v10 = vld [vmem:[%s1016_s1 + $0x90] sm:$0xff] }
   0x2   :  { %v30_v3 = vld [vmem:[%s1016_s1] sm:$0xff]  ;;  %v567_v4 = vpack.c.bf16 %v47_v1, %v46_v0  ;;  %v31_v5 = vld [vmem:[%s1016_s1 + $0x8] sm:$0xff]  ;;  %v49_v11 = vld [vmem:[%s1016_s1 + $0x98] sm:$0xff] }
   0x3   :  { %v62_v6 = vld [vmem:[%s1016_s1 + $0x100] sm:$0xff]  ;;  %v63_v7 = vld [vmem:[%s1016_s1 + $0x108] sm:$0xff]  ;;  %v569_v8 = vpack.c.bf16 %v31_v5, %v30_v3  ;;  %v32_v12 = vld [vmem:[%s1016_s1 + $0x10] sm:$0xff]  ;;  %v571_v13 = vpack.c.bf16 %v49_v11, %v48_v10 }
   0x4   :  { %v600_v9 = vpack.c.bf16 %v63_v7, %v62_v6  ;;  %568 = vmatprep.subr.bf16.mxu0 %v567_v4  ;;  %v33_v14 = vld [vmem:[%s1016_s1 + $0x18] sm:$0xff]  ;;  %v64_v15 = vld [vmem:[%s1016_s1 + $0x110] sm:$0xff]  ;;  %v50_v19 = vld [vmem:[%s1016_s1 + $0xa0] sm:$0xff] }
   0x5   :  { %v65_v16 = vld [vmem:[%s1016_s1 + $0x118] sm:$0xff]  ;;  %570 = vmatpush3.bf16.msra.mxu0 %v569_v8  ;;  %v573_v17 = vpack.c.bf16 %v33_v14, %v32_v12  ;;  %v51_v20 = vld [vmem:[%s1016_s1 + $0xa8] sm:$0xff]  ;;  %v34_v21 = vld [vmem:[%s1016_s1 + $0x20] sm:$0xff] }
   0x6   :  { %601 = vmatpush1.bf16.msra.mxu1 %v600_v9  ;;  %v603_v18 = vpack.c.bf16 %v65_v16, %v64_v15  ;;  %572 = vmatprep.subr.bf16.mxu0 %v571_v13  ;;  %v575_v22 = vpack.c.bf16 %v51_v20, %v50_v19  ;;  %v35_v23 = vld [vmem:[%s1016_s1 + $0x28] sm:$0xff]  ;;  %v66_v24 = vld [vmem:[%s1016_s1 + $0x120] sm:$0xff]  ;;  %v52_v26 = vld [vmem:[%s1016_s1 + $0xb0] sm:$0xff] }
   0x7   :  { %602 = vmatprep.subr.bf16.mxu1 %v677_v2  ;;  %v67_v25 = vld [vmem:[%s1016_s1 + $0x128] sm:$0xff]  ;;  %v53_v27 = vld [vmem:[%s1016_s1 + $0xb8] sm:$0xff]  ;;  %v577_v28 = vpack.c.bf16 %v35_v23, %v34_v21  ;;  %v36_v30 = vld [vmem:[%s1016_s1 + $0x30] sm:$0xff] }
   0x8   :  { %v606_v29 = vpack.c.bf16 %v67_v25, %v66_v24  ;;  %v579_v31 = vpack.c.bf16 %v53_v27, %v52_v26  ;;  %v37_v32 = vld [vmem:[%s1016_s1 + $0x38] sm:$0xff]  ;;  %v68_v33 = vld [vmem:[%s1016_s1 + $0x130] sm:$0xff]  ;;  %v54_v35 = vld [vmem:[%s1016_s1 + $0xc0] sm:$0xff] }
   0x9   :  { %574 = vmatpush3.bf16.msra.mxu0 %v573_v17  ;;  %v69_v34 = vld [vmem:[%s1016_s1 + $0x138] sm:$0xff]  ;;  %v55_v36 = vld [vmem:[%s1016_s1 + $0xc8] sm:$0xff]  ;;  %v581_v37 = vpack.c.bf16 %v37_v32, %v36_v30  ;;  %v38_v39 = vld [vmem:[%s1016_s1 + $0x40] sm:$0xff] }
   0xa   :  { %604 = vmatpush1.bf16.msra.mxu1 %v603_v18  ;;  %576 = vmatprep.subr.bf16.mxu0 %v575_v22  ;;  %v609_v38 = vpack.c.bf16 %v69_v34, %v68_v33  ;;  %v583_v40 = vpack.c.bf16 %v55_v36, %v54_v35  ;;  %v39_v41 = vld [vmem:[%s1016_s1 + $0x48] sm:$0xff]  ;;  %v70_v42 = vld [vmem:[%s1016_s1 + $0x140] sm:$0xff]  ;;  %v56_v44 = vld [vmem:[%s1016_s1 + $0xd0] sm:$0xff] }
   0xb   :  { %605 = vmatprep.subr.bf16.mxu1 %v677_v2  ;;  %v71_v43 = vld [vmem:[%s1016_s1 + $0x148] sm:$0xff]  ;;  %v57_v45 = vld [vmem:[%s1016_s1 + $0xd8] sm:$0xff]  ;;  %v585_v46 = vpack.c.bf16 %v39_v41, %v38_v39  ;;  %v40_v48 = vld [vmem:[%s1016_s1 + $0x50] sm:$0xff]  ;;  %v679_v41 = vmov 0.0  }
   0xc   :  { %v612_v47 = vpack.c.bf16 %v71_v43, %v70_v42  ;;  %v41_v49 = vld [vmem:[%s1016_s1 + $0x58] sm:$0xff]  ;;  %v27_v50 = vld [vmem:[%s1017_s0 + $0x8] sm:$0xff]  ;;  %v587_v51 = vpack.c.bf16 %v57_v45, %v56_v44  ;;  %v72_v52 = vld [vmem:[%s1016_s1 + $0x150] sm:$0xff] }
   0xd   :  { %578 = vmatpush3.bf16.msra.mxu0 %v577_v28  ;;  %v73_v53 = vld [vmem:[%s1016_s1 + $0x158] sm:$0xff]  ;;  %v58_v55 = vld [vmem:[%s1016_s1 + $0xe0] sm:$0xff]  ;;  %v59_v56 = vld [vmem:[%s1016_s1 + $0xe8] sm:$0xff]  ;;  %155 = vmatprep.mubr.f32.mxu0 %v27_v50  ;;  %v589_v57 = vpack.c.bf16 %v41_v49, %v40_v48 }
   0xe   :  { %607 = vmatpush1.bf16.msra.mxu1 %v606_v29  ;;  %580 = vmatprep.subr.bf16.mxu0 %v579_v31  ;;  %v29_v54 = vld [vmem:[%s1017_s0 + $0x18] sm:$0xff]  ;;  %v615_v58 = vpack.c.bf16 %v73_v53, %v72_v52  ;;  %v42_v59 = vld [vmem:[%s1016_s1 + $0x60] sm:$0xff]  ;;  %v591_v60 = vpack.c.bf16 %v59_v56, %v58_v55  ;;  %v43_v61 = vld [vmem:[%s1016_s1 + $0x68] sm:$0xff] }
   0xf   :  { %608 = vmatprep.subr.bf16.mxu1 %v677_v2  ;;  %425 = vmatprep.mubr.msk.f32.mxu1 %vm87_vm0, %v29_v54  ;;  %v74_v62 = vld [vmem:[%s1016_s1 + $0x160] sm:$0xff]  ;;  %v75_v63 = vld [vmem:[%s1016_s1 + $0x168] sm:$0xff]  ;;  %v60_v0 = vld [vmem:[%s1016_s1 + $0xf0] sm:$0xff]  ;;  %v593_v3 = vpack.c.bf16 %v43_v61, %v42_v59 }
  0x10   :  { %v61_v1 = vld [vmem:[%s1016_s1 + $0xf8] sm:$0xff]  ;;  %v618_v4 = vpack.c.bf16 %v75_v63, %v74_v62  ;;  %v44_v5 = vld [vmem:[%s1016_s1 + $0x70] sm:$0xff]  ;;  %v78_v12 = vld [vmem:[%s1016_s1 + $0x180] sm:$0xff] }
  0x11   :  { %582 = vmatpush3.bf16.msra.mxu0 %v581_v37  ;;  %v595_v6 = vpack.c.bf16 %v61_v1, %v60_v0  ;;  %v45_v7 = vld [vmem:[%s1016_s1 + $0x78] sm:$0xff]  ;;  %v76_v8 = vld [vmem:[%s1016_s1 + $0x170] sm:$0xff]  ;;  %v79_v13 = vld [vmem:[%s1016_s1 + $0x188] sm:$0xff] }
  0x12   :  { %610 = vmatpush1.bf16.msra.mxu1 %v609_v38  ;;  %584 = vmatprep.subr.bf16.mxu0 %v583_v40  ;;  %v77_v9 = vld [vmem:[%s1016_s1 + $0x178] sm:$0xff]  ;;  %v597_v10 = vpack.c.bf16 %v45_v7, %v44_v5  ;;  %v232_v14 = vld [vmem:[%s1018_s3] sm:$0xff]  ;;  %v233_v15 = vld [vmem:[%s1018_s3 + $0x8] sm:$0xff]  ;;  %v624_v17 = vpack.c.bf16 %v79_v13, %v78_v12 }
  0x13   :  { %611 = vmatprep.subr.bf16.mxu1 %v677_v2  ;;  %v621_v11 = vpack.c.bf16 %v77_v9, %v76_v8  ;;  %v26_v16 = vld [vmem:[%s1017_s0] sm:$0xff]  ;;  %v627_v18 = vpack.c.bf16 %v233_v15, %v232_v14  ;;  %v234_v19 = vld [vmem:[%s1018_s3 + $0x10] sm:$0xff]  ;;  %v235_v20 = vld [vmem:[%s1018_s3 + $0x18] sm:$0xff] }
  0x14   :  { %v28_v21 = vld [vmem:[%s1017_s0 + $0x10] sm:$0xff]  ;;  %v630_v22 = vpack.c.bf16 %v235_v20, %v234_v19  ;;  %v236_v23 = vld [vmem:[%s1018_s3 + $0x20] sm:$0xff]  ;;  %v237_v24 = vld [vmem:[%s1018_s3 + $0x28] sm:$0xff] }
  0x15   :  { %586 = vmatpush3.bf16.msra.mxu0 %v585_v46  ;;  %v633_v25 = vpack.c.bf16 %v237_v24, %v236_v23  ;;  %v238_v26 = vld [vmem:[%s1018_s3 + $0x30] sm:$0xff]  ;;  %v239_v27 = vld [vmem:[%s1018_s3 + $0x38] sm:$0xff]  ;;  %v240_v29 = vld [vmem:[%s1018_s3 + $0x40] sm:$0xff] }
  0x16   :  { %613 = vmatpush1.bf16.msra.mxu1 %v612_v47  ;;  %588 = vmatprep.subr.bf16.mxu0 %v587_v51  ;;  %v636_v28 = vpack.c.bf16 %v239_v27, %v238_v26  ;;  %v241_v30 = vld [vmem:[%s1018_s3 + $0x48] sm:$0xff]  ;;  %v242_v32 = vld [vmem:[%s1018_s3 + $0x50] sm:$0xff]  ;;  %v243_v33 = vld [vmem:[%s1018_s3 + $0x58] sm:$0xff] }
  0x17   :  { %614 = vmatprep.subr.bf16.mxu1 %v677_v2  ;;  %v639_v31 = vpack.c.bf16 %v241_v30, %v240_v29  ;;  %v642_v34 = vpack.c.bf16 %v243_v33, %v242_v32  ;;  %v244_v35 = vld [vmem:[%s1018_s3 + $0x60] sm:$0xff]  ;;  %v245_v36 = vld [vmem:[%s1018_s3 + $0x68] sm:$0xff]  ;;  %v246_v38 = vld [vmem:[%s1018_s3 + $0x70] sm:$0xff] }
  0x18   :  { %v645_v37 = vpack.c.bf16 %v245_v36, %v244_v35  ;;  %v247_v39 = vld [vmem:[%s1018_s3 + $0x78] sm:$0xff]  ;;  %v326_v42 = vld [vmem:[%s1019_s5] sm:$0xff]  ;;  %v327_v43 = vld [vmem:[%s1019_s5 + $0x8] sm:$0xff] }
  0x19   :  { %590 = vmatpush3.bf16.msra.mxu0 %v589_v57  ;;  %v648_v40 = vpack.c.bf16 %v247_v39, %v246_v38  ;;  %v328_v44 = vld [vmem:[%s1019_s5 + $0x10] sm:$0xff]  ;;  %v651_v45 = vpack.c.bf16 %v327_v43, %v326_v42  ;;  %v329_v46 = vld [vmem:[%s1019_s5 + $0x18] sm:$0xff]  ;;  %v330_v48 = vld [vmem:[%s1019_s5 + $0x20] sm:$0xff] }
  0x1a   :  { %616 = vmatpush1.bf16.msra.mxu1 %v615_v58  ;;  %592 = vmatprep.subr.bf16.mxu0 %v591_v60  ;;  %v654_v47 = vpack.c.bf16 %v329_v46, %v328_v44  ;;  %v331_v49 = vld [vmem:[%s1019_s5 + $0x28] sm:$0xff]  ;;  %v332_v51 = vld [vmem:[%s1019_s5 + $0x30] sm:$0xff]  ;;  %v333_v52 = vld [vmem:[%s1019_s5 + $0x38] sm:$0xff] }
  0x1b   :  { %617 = vmatprep.subr.bf16.mxu1 %v677_v2  ;;  %v657_v50 = vpack.c.bf16 %v331_v49, %v330_v48  ;;  %v660_v53 = vpack.c.bf16 %v333_v52, %v332_v51  ;;  %v334_v54 = vld [vmem:[%s1019_s5 + $0x40] sm:$0xff]  ;;  %v335_v55 = vld [vmem:[%s1019_s5 + $0x48] sm:$0xff]  ;;  %v336_v57 = vld [vmem:[%s1019_s5 + $0x50] sm:$0xff] }
  0x1c   :  { %v663_v56 = vpack.c.bf16 %v335_v55, %v334_v54  ;;  %v337_v58 = vld [vmem:[%s1019_s5 + $0x58] sm:$0xff]  ;;  %v338_v60 = vld [vmem:[%s1019_s5 + $0x60] sm:$0xff]  ;;  %v339_v61 = vld [vmem:[%s1019_s5 + $0x68] sm:$0xff] }
  0x1d   :  { %594 = vmatpush3.bf16.msra.mxu0 %v593_v3  ;;  %v666_v59 = vpack.c.bf16 %v337_v58, %v336_v57  ;;  %v669_v62 = vpack.c.bf16 %v339_v61, %v338_v60  ;;  %v424_v1 = vld [vmem:[%s1020_s2] ss:$0 sm:$0xff]  ;;  %v340_v9 = vld [vmem:[%s1019_s5 + $0x70] sm:$0xff] }
  0x1e   :  { %619 = vmatpush1.bf16.msra.mxu1 %v618_v4  ;;  %596 = vmatprep.subr.bf16.mxu0 %v595_v6 }
  0x1f   :  { %620 = vmatprep.subr.bf16.mxu1 %v677_v2 }
  0x21   :  { %598 = vmatpush3.bf16.msra.mxu0 %v597_v10 }
  0x22   :  { %622 = vmatpush1.bf16.msra.mxu1 %v621_v11  ;;  %626 = vmatprep.subr.bf16.mxu0 %v677_v2  ;;  %v426_v11 = vld [vmem:[%s1021_s4] ss:$0 sm:$0xff] }
  0x23   :  { %623 = vmatprep.subr.bf16.mxu1 %v677_v2 }
  0x24   :  { %156 = vmatmul.mubr.f32.vlgmr.msra.gmra.mrb[0].mxu0 %v26_v16  ;;  %v427_v16 = vld [vmem:[%s1022_s6] ss:$0 sm:$0xff] }
  0x25   :  { %628 = vmatpush3.bf16.msra.mxu0 %v627_v18  ;;  %529 = vmatprep.mubr.msk.f32.mxu0 %vm678_vm1, %v679_v41 }
  0x26   :  { %625 = vmatpush1.bf16.msra.mxu1 %v624_v17  ;;  %629 = vmatprep.subr.bf16.mxu0 %v677_v2 }
  0x27   :  { %650 = vmatprep.subr.bf16.mxu1 %v677_v2 }
  0x29   :  { %226 = vmatmul.mubr.f32.vlgmr.msra.gmra.mrb[0].mxu1 %v28_v21  ;;  %631 = vmatpush3.bf16.msra.mxu0 %v630_v22 }
  0x2a   :  { %632 = vmatprep.subr.bf16.mxu0 %v677_v2  ;;  %564 = vmatprep.mubr.msk.f32.mxu1 %vm678_vm1, %v679_v41 }
  0x2b   :  { %652 = vmatpush3.bf16.msra.mxu1 %v651_v45 }
  0x2c   :  { %653 = vmatprep.subr.bf16.mxu1 %v677_v2 }
  0x2d   :  { %634 = vmatpush3.bf16.msra.mxu0 %v633_v25 }
  0x2e   :  { %635 = vmatprep.subr.bf16.mxu0 %v677_v2 }
  0x2f   :  { %655 = vmatpush3.bf16.msra.mxu1 %v654_v47 }
  0x30   :  { %656 = vmatprep.subr.bf16.mxu1 %v677_v2 }
  0x31   :  { %637 = vmatpush3.bf16.msra.mxu0 %v636_v28 }
  0x32   :  { %638 = vmatprep.subr.bf16.mxu0 %v677_v2 }
  0x33   :  { %658 = vmatpush3.bf16.msra.mxu1 %v657_v50 }
  0x34   :  { %659 = vmatprep.subr.bf16.mxu1 %v677_v2 }
  0x35   :  { %640 = vmatpush3.bf16.msra.mxu0 %v639_v31 }
  0x36   :  { %641 = vmatprep.subr.bf16.mxu0 %v677_v2 }
  0x37   :  { %661 = vmatpush3.bf16.msra.mxu1 %v660_v53 }
  0x38   :  { %662 = vmatprep.subr.bf16.mxu1 %v677_v2 }
  0x39   :  { %643 = vmatpush3.bf16.msra.mxu0 %v642_v34 }
  0x3a   :  { %644 = vmatprep.subr.bf16.mxu0 %v677_v2 }
  0x3b   :  { %664 = vmatpush3.bf16.msra.mxu1 %v663_v56 }
  0x3c   :  { %665 = vmatprep.subr.bf16.mxu1 %v677_v2 }
  0x3d   :  { %646 = vmatpush3.bf16.msra.mxu0 %v645_v37 }
  0x3e   :  { %647 = vmatprep.subr.bf16.mxu0 %v677_v2 }
  0x3f   :  { %667 = vmatpush3.bf16.msra.mxu1 %v666_v59 }
  0x40   :  { %668 = vmatprep.subr.bf16.mxu1 %v677_v2 }
  0x41   :  { %649 = vmatpush3.bf16.msra.mxu0 %v648_v40 }
  0x43   :  { %670 = vmatpush3.bf16.msra.mxu1 %v669_v62 }
  0x44   :  { %671 = vmatprep.subr.bf16.mxu1 %v677_v2  ;;  %v341_v2 = vld [vmem:[%s1019_s5 + $0x78] sm:$0xff] }
  0x45   :  { %v672_v10 = vpack.c.bf16 %v341_v2, %v340_v9 }
  0x47   :  { %673 = vmatpush3.bf16.msra.mxu1 %v672_v10 }
  0xf7   :  { %v460_v63 = vpop.f32.mrb[0].mxu0 }
  0xf8   :  { %v461_v0 = vpop.f32.mrb[1].mxu0 }
  0xf9   :  { %v462_v3 = vadd.f32 %v461_v0, %v460_v63 }
  0xfb   :  { %v158_v4 = vadd.f32 %v462_v3, %v424_v1 }
  0xfc   :  { %v227_v5 = vpop.f32.mrb[0].mxu1 }
  0xfd   :  { %v229_v6 = vpop.f32.mrb[1].mxu1  ;;  %v228_v7 = vadd.f32 %v227_v5, %v158_v4 }
  0xff   :  { %v231_v8 = vmax.f32 %v228_v7, 0.0 }
 0x101   :  { %530 = vmatmul.mubr.f32.vlgmr.msra.gmra.mrb[2].mxu0 %v231_v8 }
 0x1d4   :  { %v321_v12 = vpop.f32.mrb[2].mxu0 }
 0x1d5   :  { %v322_v13 = vadd.f32 %v426_v11, %v321_v12  ;;  %v531_v14 = vpop.f32.mrb[3].mxu0 }
 0x1d7   :  { %v325_v15 = vmax.f32 %v322_v13, 0.0 }
 0x1d9   :  { %565 = vmatmul.mubr.f32.vlgmr.msra.gmra.mrb[2].mxu1 %v325_v15 }
 0x2ac   :  { %v415_v17 = vpop.f32.mrb[2].mxu1 }
 0x2ad   :  { %v416_v18 = vadd.f32 %v427_v16, %v415_v17  ;;  %v566_v19 = vpop.f32.mrb[3].mxu1 }
 0x2af   :  { %419 = vst [vmem:[%s1023_s7] sm:$0xff] %v416_v18 }

// kernel: net_forward.2
= control target key start
LH: loop header
LB: loop body
LE: loop exit
PB: predicated region body
PF: predicated region fallthrough
CT: control target
= control target key end

     0   :  { %s16596_s18 = smov 0   ;;  %s19088_s0 = inlined_call_operand.vmem [shape: f32[2,8,1280], index: 0, kind: input, shape index: {}]   ;;  %s19089_s1 = inlined_call_operand.vmem [shape: f32[25,8,8], index: 1, kind: input, shape index: {}]   ;;  %s19090_s2 = inlined_call_operand.vmem [shape: f32[8,1], index: 2, kind: input, shape index: {}]   ;;  %s19091_s3 = inlined_call_operand.vmem [shape: f32[25,16,8], index: 3, kind: input, shape index: {}]   ;;  %s19092_s4 = inlined_call_operand.vmem [shape: f32[16,1], index: 4, kind: input, shape index: {}]   ;;  %s19093_s5 = inlined_call_operand.vmem [shape: f32[2,16,640], index: 5, kind: output, shape index: {}]  }
   0x1 LB: > { %s15525_s19 = sadd.s32 4294967295, %s16539_s18   ;;  %p15529_p0 = scmp.ge.s32.totalorder %s16539_s18, 1  ;;  %s16539_s18 = sphi %s16596_s18, %s15_s18  }
   0x2   : > { %p187_p1 = scmp.lt.s32.totalorder %s16539_s18, 3 }
   0x4   : > { %p188_p2 = pnand %p15529_p0, %p187_p1 }
   0x5   : > { %p215_p3 = scmp.lt.s32.totalorder (!%p188_p2), %s15525_s19, 1  ;;  %v16541_v0 = vmov (!%p188_p2), 0.0   ;;  %s16542_s24 = smov (!%p188_p2), 127   ;;  %vm264_vm0 = vcmask (!%p188_p2), 1039360   ;;  %v15532_v15 = vld [vmem:[%s19089_s1 + $0x8] sm:$0xff] (!%p188_p2)  ;;  %vm281_vm1 = vcmask (!%p188_p2), 64512  }
   0x6   : > { %191 = sbr.rel (%p188_p2) target bundleno = 1729 (0x6c1), region = 40  ;;  %349 = vmatprep.mubr.f32.mxu0 (!%p188_p2), %v16541_v0  ;;  %420 = vmatprep.mubr.f32.mxu1 (!%p188_p2), %v16541_v0  ;;  %s16543_s25 = smov (!%p188_p2), 126   ;;  %v233_v28 = vld [vmem:[%s19089_s1] sm:$0xff] (!%p188_p2)  ;;  %vm876_vm2 = vcmask (!%p188_p2), 1031168   ;;  %v15541_v41 = vld [vmem:[%s19089_s1 + $0x10] sm:$0xff] (!%p188_p2)  ;;  %vm1208_vm3 = vcmask (!%p188_p2), 1022976  }
   0x7   : > { %s16544_s26 = smov (!%p188_p2), 125   ;;  %s16545_s27 = smov (!%p188_p2), 124   ;;  %v15546_v52 = vld [vmem:[%s19089_s1 + $0x18] sm:$0xff] (!%p188_p2)  ;;  %vm1540_vm4 = vcmask (!%p188_p2), 1014784   ;;  %vm1872_vm5 = vcmask (!%p188_p2), 785408   ;;  %vm2204_vm6 = vcmask (!%p188_p2), 777216  }
   0x8   : > { %s16546_s28 = smov (!%p188_p2), 96   ;;  %s16547_s29 = smov (!%p188_p2), 95   ;;  %vm2536_vm7 = vcmask (!%p188_p2), 769024   ;;  %vm2868_vm8 = vcmask (!%p188_p2), 760832   ;;  %vm3200_vm9 = vcmask (!%p188_p2), 752640   ;;  %vm3532_vm10 = vcmask (!%p188_p2), 523264  }
   0x9   : > { %s16548_s30 = smov (!%p188_p2), 94   ;;  %s16549_s8 = smov (!%p188_p2), 93   ;;  %vm3864_vm11 = vcmask (!%p188_p2), 515072   ;;  %vm4196_vm12 = vcmask (!%p188_p2), 506880   ;;  %vm4528_vm13 = vcmask (!%p188_p2), 498688   ;;  %vm4860_vm14 = vcmask (!%p188_p2), 490496  }
   0xa   : > { %s16550_s13 = smov (!%p188_p2), 92   ;;  %s16551_s16 = smov (!%p188_p2), 64   ;;  %vm5192_vm15 = vcmask (!%p188_p2), 261120  }
   0xb   : > { %s16552_s22 = smov (!%p188_p2), 63   ;;  %s16553_s7 = smov (!%p188_p2), 62  }
   0xc   : > { %s16554_s10 = smov (!%p188_p2), 61   ;;  %s16556_s17 = smov (!%p188_p2), 32  }
   0xd   : > { %s19095_s19 = smov (!%p215_p3, %s15525_s19), 1  ;;  %s16558_s9 = smov 30  }
   0xe   : > { %s16488_s20 = smul.u32 80, %s19095_s19  ;;  %s16559_s12 = smov 29  }
   0xf   : > { %s16562_s21 = smov 122  }
  0x10   : > { %s16612_s23 = scalar_lea.vmem %s19088_s0, %s16488_s20 }
  0x11   : > { %v16617_v1 = vld [vmem:[%s16612_s23 + $0x8] sm:$0xff]  ;;  %v16620_v2 = vld [vmem:[%s16612_s23] sm:$0xff]  ;;  %v16627_v3 = vld [vmem:[%s16612_s23 + $0x10] sm:$0xff] }
  0x12   : > { %248 = vrot.lane.b32.xlu0 %v16617_v1, %s16542_s24  ;;  %246 = vrot.lane.b32.xlu1 %v16620_v2, %s16542_s24  ;;  %v16630_v4 = vld [vmem:[%s16612_s23 + $0x18] sm:$0xff]  ;;  %v16637_v5 = vld [vmem:[%s16612_s23 + $0x20] sm:$0xff] }
  0x13   : > { %v16640_v6 = vld [vmem:[%s16612_s23 + $0x28] sm:$0xff]  ;;  %v16647_v7 = vld [vmem:[%s16612_s23 + $0x30] sm:$0xff]  ;;  %v16650_v8 = vld [vmem:[%s16612_s23 + $0x38] sm:$0xff] }
  0x14   : > { %v16657_v9 = vld [vmem:[%s16612_s23 + $0x40] sm:$0xff] }
  0x16   : > { %250 = vrot.lane.b32.xlu0 %v16627_v3, %s16542_s24  ;;  %252 = vrot.lane.b32.xlu1 %v16630_v4, %s16542_s24 }
  0x1a   : > { %254 = vrot.lane.b32.xlu0 %v16637_v5, %s16542_s24  ;;  %256 = vrot.lane.b32.xlu1 %v16640_v6, %s16542_s24 }
  0x1e   : > { %258 = vrot.lane.b32.xlu0 %v16647_v7, %s16542_s24  ;;  %260 = vrot.lane.b32.xlu1 %v16650_v8, %s16542_s24 }
  0x22   : > { %262 = vrot.lane.b32.xlu0 %v16657_v9, %s16542_s24  ;;  %860 = vrot.lane.b32.xlu1 %v16617_v1, %s16543_s25 }
  0x26   : > { %862 = vrot.lane.b32.xlu0 %v16627_v3, %s16543_s25  ;;  %858 = vrot.lane.b32.xlu1 %v16620_v2, %s16543_s25 }
  0x2a   : > { %864 = vrot.lane.b32.xlu0 %v16630_v4, %s16543_s25  ;;  %866 = vrot.lane.b32.xlu1 %v16637_v5, %s16543_s25 }
  0x2e   : > { %868 = vrot.lane.b32.xlu0 %v16640_v6, %s16543_s25  ;;  %870 = vrot.lane.b32.xlu1 %v16647_v7, %s16543_s25 }
  0x32   : > { %872 = vrot.lane.b32.xlu0 %v16650_v8, %s16543_s25  ;;  %874 = vrot.lane.b32.xlu1 %v16657_v9, %s16543_s25 }
  0x36   : > { %1192 = vrot.lane.b32.xlu0 %v16617_v1, %s16544_s26  ;;  %1194 = vrot.lane.b32.xlu1 %v16627_v3, %s16544_s26 }
  0x3a   : > { %1190 = vrot.lane.b32.xlu0 %v16620_v2, %s16544_s26  ;;  %1196 = vrot.lane.b32.xlu1 %v16630_v4, %s16544_s26 }
  0x3e   : > { %1198 = vrot.lane.b32.xlu0 %v16637_v5, %s16544_s26  ;;  %1200 = vrot.lane.b32.xlu1 %v16640_v6, %s16544_s26 }
  0x42   : > { %1202 = vrot.lane.b32.xlu0 %v16647_v7, %s16544_s26  ;;  %1204 = vrot.lane.b32.xlu1 %v16650_v8, %s16544_s26 }
  0x46   : > { %1206 = vrot.lane.b32.xlu0 %v16657_v9, %s16544_s26  ;;  %1524 = vrot.lane.b32.xlu1 %v16617_v1, %s16545_s27 }
  0x4a   : > { %1526 = vrot.lane.b32.xlu0 %v16627_v3, %s16545_s27  ;;  %1522 = vrot.lane.b32.xlu1 %v16620_v2, %s16545_s27 }
  0x4e   : > { %1528 = vrot.lane.b32.xlu0 %v16630_v4, %s16545_s27  ;;  %1530 = vrot.lane.b32.xlu1 %v16637_v5, %s16545_s27 }
  0x52   : > { %1532 = vrot.lane.b32.xlu0 %v16640_v6, %s16545_s27  ;;  %1534 = vrot.lane.b32.xlu1 %v16647_v7, %s16545_s27 }
  0x56   : > { %1536 = vrot.lane.b32.xlu0 %v16650_v8, %s16545_s27  ;;  %1538 = vrot.lane.b32.xlu1 %v16657_v9, %s16545_s27 }
  0x5a   : > { %1856 = vrot.lane.b32.xlu0 %v16617_v1, %s16546_s28  ;;  %1858 = vrot.lane.b32.xlu1 %v16627_v3, %s16546_s28 }
  0x5e   : > { %1854 = vrot.lane.b32.xlu0 %v16620_v2, %s16546_s28  ;;  %1860 = vrot.lane.b32.xlu1 %v16630_v4, %s16546_s28 }
  0x62   : > { %1862 = vrot.lane.b32.xlu0 %v16637_v5, %s16546_s28  ;;  %1864 = vrot.lane.b32.xlu1 %v16640_v6, %s16546_s28 }
  0x66   : > { %1866 = vrot.lane.b32.xlu0 %v16647_v7, %s16546_s28  ;;  %1868 = vrot.lane.b32.xlu1 %v16650_v8, %s16546_s28 }
  0x6a   : > { %1870 = vrot.lane.b32.xlu0 %v16657_v9, %s16546_s28  ;;  %2188 = vrot.lane.b32.xlu1 %v16617_v1, %s16547_s29 }
  0x6e   : > { %2190 = vrot.lane.b32.xlu0 %v16627_v3, %s16547_s29  ;;  %2186 = vrot.lane.b32.xlu1 %v16620_v2, %s16547_s29 }
  0x72   : > { %2192 = vrot.lane.b32.xlu0 %v16630_v4, %s16547_s29  ;;  %2194 = vrot.lane.b32.xlu1 %v16637_v5, %s16547_s29 }
  0x76   : > { %2196 = vrot.lane.b32.xlu0 %v16640_v6, %s16547_s29  ;;  %2198 = vrot.lane.b32.xlu1 %v16647_v7, %s16547_s29 }
  0x7a   : > { %2200 = vrot.lane.b32.xlu0 %v16650_v8, %s16547_s29  ;;  %2202 = vrot.lane.b32.xlu1 %v16657_v9, %s16547_s29 }
  0x7e   : > { %2520 = vrot.lane.b32.xlu0 %v16617_v1, %s16548_s30  ;;  %2522 = vrot.lane.b32.xlu1 %v16627_v3, %s16548_s30 }
  0x82   : > { %2518 = vrot.lane.b32.xlu0 %v16620_v2, %s16548_s30  ;;  %2524 = vrot.lane.b32.xlu1 %v16630_v4, %s16548_s30 }
  0x84   : > { %v249_v10 = vpop.permute.xlu0 %248  ;;  %v247_v11 = vpop.permute.xlu1 %246 }
  0x85   : > { %v265_v16 = vsel %vm264_vm0, %v247_v11, %v249_v10 }
  0x86   : > { %2526 = vrot.lane.b32.xlu0 %v16637_v5, %s16548_s30  ;;  %2528 = vrot.lane.b32.xlu1 %v16640_v6, %s16548_s30 }
  0x88   : > { %v251_v12 = vpop.permute.xlu0 %250  ;;  %v253_v13 = vpop.permute.xlu1 %252 }
  0x89   : > { %v266_v14 = vsel %vm264_vm0, %v249_v10, %v251_v12  ;;  %v267_v20 = vsel %vm264_vm0, %v251_v12, %v253_v13 }
  0x8a   : > { %285 = vmatprep.subr.mxu0 %v266_v14  ;;  %2530 = vrot.lane.b32.xlu0 %v16647_v7, %s16548_s30 }
  0x8b   : > { %2532 = vrot.lane.b32.xlu1 %v16650_v8, %s16548_s30  ;;  %286 = vmatpush1.msra.mxu0 %v265_v16  ;;  %v15551_v16 = vld [vmem:[%s19089_s1 + $0x20] sm:$0xff] }
  0x8c   : > { %v255_v17 = vpop.permute.xlu0 %254  ;;  %v257_v18 = vpop.permute.xlu1 %256  ;;  %15533 = vmatmul.mubr.msk.f32.vlgmr.msra.gmra.mrb[0].mxu0 %vm281_vm1, %v15532_v15 }
  0x8d   : > { %v268_v19 = vsel %vm264_vm0, %v253_v13, %v255_v17  ;;  %491 = vmatprep.mubr.f32.mxu0 %v16541_v0  ;;  %v269_v24 = vsel %vm264_vm0, %v255_v17, %v257_v18 }
  0x8e   : > { %2534 = vrot.lane.b32.xlu0 %v16657_v9, %s16548_s30  ;;  %356 = vmatprep.subr.mxu1 %v268_v19  ;;  %s16557_s30 = smov 31  }
  0x8f   : > { %2852 = vrot.lane.b32.xlu1 %v16617_v1, %s16549_s8  ;;  %357 = vmatpush1.msra.mxu1 %v267_v20 }
  0x90   : > { %v259_v21 = vpop.permute.xlu0 %258  ;;  %v261_v22 = vpop.permute.xlu1 %260  ;;  %15534 = vmatmul.mubr.msk.f32.vlgmr.msra.gmra.mrb[0].mxu1 %vm281_vm1, %v15532_v15 }
  0x91   : > { %v270_v23 = vsel %vm264_vm0, %v257_v18, %v259_v21  ;;  %562 = vmatprep.mubr.f32.mxu1 %v16541_v0  ;;  %v271_v29 = vsel %vm264_vm0, %v259_v21, %v261_v22 }
  0x92   : > { %2854 = vrot.lane.b32.xlu0 %v16627_v3, %s16549_s8  ;;  %427 = vmatprep.subr.mxu0 %v270_v23 }
  0x93   : > { %2850 = vrot.lane.b32.xlu1 %v16620_v2, %s16549_s8  ;;  %428 = vmatpush1.msra.mxu0 %v269_v24 }
  0x94   : > { %v263_v25 = vpop.permute.xlu0 %262  ;;  %15535 = vmatmul.mubr.msk.f32.vlgmr.msra.gmra.mrb[2].mxu0 %vm281_vm1, %v15532_v15  ;;  %v861_v26 = vpop.permute.xlu1 %860  ;;  %572 = vmatprep.subr.mxu0 %v16617_v1 }
  0x95   : > { %v272_v27 = vsel %vm264_vm0, %v261_v22, %v263_v25  ;;  %573 = vmatpush1.msra.mxu0 %v16620_v2  ;;  %636 = vmatprep.mubr.f32.mxu0 %v16541_v0 }
  0x96   : > { %2856 = vrot.lane.b32.xlu0 %v16630_v4, %s16549_s8  ;;  %498 = vmatprep.subr.mxu1 %v272_v27 }
  0x97   : > { %2858 = vrot.lane.b32.xlu1 %v16637_v5, %s16549_s8  ;;  %499 = vmatpush1.msra.mxu1 %v271_v29 }
  0x98   : > { %v863_v30 = vpop.permute.xlu0 %862  ;;  %15536 = vmatmul.mubr.msk.f32.vlgmr.msra.gmra.mrb[2].mxu1 %vm281_vm1, %v15532_v15  ;;  %15537 = vmatmul.mubr.msk.f32.vlgmr.msra.gmra.mrb[0].mxu0 %vm281_vm1, %v233_v28  ;;  %v859_v31 = vpop.permute.xlu1 %858 }
  0x99   : > { %714 = vmatprep.subr.mxu0 %v16640_v6  ;;  %643 = vmatprep.subr.mxu1 %v16630_v4  ;;  %v878_v32 = vsel %vm876_vm2, %v861_v26, %v863_v30  ;;  %v877_v35 = vsel %vm876_vm2, %v859_v31, %v861_v26 }
  0x9a   : > { %715 = vmatpush1.msra.mxu0 %v16637_v5  ;;  %2860 = vrot.lane.b32.xlu0 %v16640_v6, %s16549_s8 }
  0x9b   : > { %2862 = vrot.lane.b32.xlu1 %v16647_v7, %s16549_s8  ;;  %896 = vmatprep.subr.mxu0 %v878_v32 }
  0x9c   : > { %644 = vmatpush1.msra.mxu1 %v16627_v3  ;;  %707 = vmatprep.mubr.f32.mxu1 %v16541_v0  ;;  %v865_v33 = vpop.permute.xlu0 %864  ;;  %v867_v34 = vpop.permute.xlu1 %866 }
  0x9d   : > { %778 = vmatprep.mubr.f32.mxu0 %v16541_v0  ;;  %15538 = vmatmul.mubr.msk.f32.vlgmr.msra.gmra.mrb[0].mxu1 %vm281_vm1, %v233_v28  ;;  %v880_v36 = vsel %vm876_vm2, %v865_v33, %v867_v34  ;;  %v879_v40 = vsel %vm876_vm2, %v863_v30, %v865_v33 }
  0x9e   : > { %15539 = vmatmul.mubr.msk.f32.vlgmr.msra.gmra.mrb[2].mxu0 %vm281_vm1, %v233_v28  ;;  %785 = vmatprep.subr.mxu1 %v16650_v8 }
  0x9f   : > { %897 = vmatpush1.msra.mxu0 %v877_v35  ;;  %786 = vmatpush1.msra.mxu1 %v16647_v7 }
  0xa0   : > { %2864 = vrot.lane.b32.xlu0 %v16650_v8, %s16549_s8  ;;  %2866 = vrot.lane.b32.xlu1 %v16657_v9, %s16549_s8  ;;  %v869_v37 = vpop.permute.xlu0 %868  ;;  %v871_v38 = vpop.permute.xlu1 %870 }
  0xa1   : > { %967 = vmatprep.subr.mxu1 %v880_v36  ;;  %849 = vmatprep.mubr.f32.mxu1 %v16541_v0  ;;  %v882_v39 = vsel %vm876_vm2, %v869_v37, %v871_v38  ;;  %v881_v42 = vsel %vm876_vm2, %v867_v34, %v869_v37  ;;  %v15556_v34 = vld [vmem:[%s19089_s1 + $0x28] sm:$0xff] }
  0xa2   : > { %15540 = vmatmul.mubr.msk.f32.vlgmr.msra.gmra.mrb[2].mxu1 %vm281_vm1, %v233_v28  ;;  %960 = vmatprep.mubr.f32.mxu0 %v16541_v0 }
  0xa3   : > { %968 = vmatpush1.msra.mxu1 %v879_v40  ;;  %1038 = vmatprep.subr.mxu0 %v882_v39 }
  0xa4   : > { %3184 = vrot.lane.b32.xlu0 %v16617_v1, %s16550_s13  ;;  %3186 = vrot.lane.b32.xlu1 %v16627_v3, %s16550_s13  ;;  %v873_v43 = vpop.permute.xlu0 %872  ;;  %v875_v44 = vpop.permute.xlu1 %874 }
  0xa5   : > { %15542 = vmatmul.mubr.msk.f32.vlgmr.msra.gmra.mrb[0].mxu0 %vm281_vm1, %v15541_v41  ;;  %1031 = vmatprep.mubr.f32.mxu1 %v16541_v0  ;;  %v884_v45 = vsel %vm876_vm2, %v873_v43, %v875_v44  ;;  %v883_v46 = vsel %vm876_vm2, %v871_v38, %v873_v43 }
  0xa6   : > { %1039 = vmatpush1.msra.mxu0 %v881_v42  ;;  %1109 = vmatprep.subr.mxu1 %v884_v45 }
  0xa7   : > { %15543 = vmatmul.mubr.msk.f32.vlgmr.msra.gmra.mrb[0].mxu1 %vm281_vm1, %v15541_v41  ;;  %1102 = vmatprep.mubr.f32.mxu0 %v16541_v0 }
  0xa8   : > { %3182 = vrot.lane.b32.xlu0 %v16620_v2, %s16550_s13  ;;  %3188 = vrot.lane.b32.xlu1 %v16630_v4, %s16550_s13  ;;  %v1193_v47 = vpop.permute.xlu0 %1192  ;;  %v1195_v48 = vpop.permute.xlu1 %1194 }
  0xa9   : > { %1110 = vmatpush1.msra.mxu1 %v883_v46  ;;  %v1210_v49 = vsel %vm1208_vm3, %v1193_v47, %v1195_v48  ;;  %15544 = vmatmul.mubr.msk.f32.vlgmr.msra.gmra.mrb[2].mxu0 %vm281_vm1, %v15541_v41 }
  0xaa   : > { %1228 = vmatprep.subr.mxu0 %v1210_v49  ;;  %1173 = vmatprep.mubr.f32.mxu1 %v16541_v0 }
  0xab   : > { %15545 = vmatmul.mubr.msk.f32.vlgmr.msra.gmra.mrb[2].mxu1 %vm281_vm1, %v15541_v41  ;;  %1292 = vmatprep.mubr.f32.mxu0 %v16541_v0 }
  0xac   : > { %3190 = vrot.lane.b32.xlu0 %v16637_v5, %s16550_s13  ;;  %3192 = vrot.lane.b32.xlu1 %v16640_v6, %s16550_s13  ;;  %v1191_v50 = vpop.permute.xlu0 %1190  ;;  %v1197_v51 = vpop.permute.xlu1 %1196 }
  0xad   : > { %v1209_v53 = vsel %vm1208_vm3, %v1191_v50, %v1193_v47  ;;  %1363 = vmatprep.mubr.f32.mxu1 %v16541_v0  ;;  %v1211_v57 = vsel %vm1208_vm3, %v1195_v48, %v1197_v51 }
  0xae   : > { %1229 = vmatpush1.msra.mxu0 %v1209_v53 }
  0xaf   : > { %15547 = vmatmul.mubr.msk.f32.vlgmr.msra.gmra.mrb[0].mxu0 %vm281_vm1, %v15546_v52 }
  0xb0   : > { %3194 = vrot.lane.b32.xlu0 %v16647_v7, %s16550_s13  ;;  %3196 = vrot.lane.b32.xlu1 %v16650_v8, %s16550_s13  ;;  %v1199_v54 = vpop.permute.xlu0 %1198  ;;  %v1201_v55 = vpop.permute.xlu1 %1200 }
  0xb1   : > { %v1212_v56 = vsel %vm1208_vm3, %v1197_v51, %v1199_v54  ;;  %1434 = vmatprep.mubr.f32.mxu0 %v16541_v0  ;;  %v1213_v61 = vsel %vm1208_vm3, %v1199_v54, %v1201_v55 }
  0xb2   : > { %1299 = vmatprep.subr.mxu1 %v1212_v56 }
  0xb3   : > { %1300 = vmatpush1.msra.mxu1 %v1211_v57 }
  0xb4   : > { %3198 = vrot.lane.b32.xlu0 %v16657_v9, %s16550_s13  ;;  %3516 = vrot.lane.b32.xlu1 %v16617_v1, %s16551_s16  ;;  %v1203_v58 = vpop.permute.xlu0 %1202  ;;  %v1205_v59 = vpop.permute.xlu1 %1204  ;;  %s16555_s13 = smov 60  }
  0xb5   : > { %v1214_v60 = vsel %vm1208_vm3, %v1201_v55, %v1203_v58  ;;  %15548 = vmatmul.mubr.msk.f32.vlgmr.msra.gmra.mrb[0].mxu1 %vm281_vm1, %v15546_v52  ;;  %v1215_v11 = vsel %vm1208_vm3, %v1203_v58, %v1205_v59 }
  0xb6   : > { %1370 = vmatprep.subr.mxu0 %v1214_v60  ;;  %1505 = vmatprep.mubr.f32.mxu1 %v16541_v0 }
  0xb7   : > { %1371 = vmatpush1.msra.mxu0 %v1213_v61 }
  0xb8   : > { %3518 = vrot.lane.b32.xlu0 %v16627_v3, %s16551_s16  ;;  %3514 = vrot.lane.b32.xlu1 %v16620_v2, %s16551_s16  ;;  %v1207_v62 = vpop.permute.xlu0 %1206  ;;  %v1525_v63 = vpop.permute.xlu1 %1524 }
  0xb9   : > { %v1216_v10 = vsel %vm1208_vm3, %v1205_v59, %v1207_v62  ;;  %15549 = vmatmul.mubr.msk.f32.vlgmr.msra.gmra.mrb[2].mxu0 %vm281_vm1, %v15546_v52 }
  0xba   : > { %1441 = vmatprep.subr.mxu1 %v1216_v10  ;;  %1624 = vmatprep.mubr.f32.mxu0 %v16541_v0 }
  0xbb   : > { %1442 = vmatpush1.msra.mxu1 %v1215_v11 }
  0xbc   : > { %3520 = vrot.lane.b32.xlu0 %v16630_v4, %s16551_s16  ;;  %3522 = vrot.lane.b32.xlu1 %v16637_v5, %s16551_s16  ;;  %v1527_v12 = vpop.permute.xlu0 %1526  ;;  %v1523_v13 = vpop.permute.xlu1 %1522 }
  0xbd   : > { %v1541_v14 = vsel %vm1540_vm4, %v1523_v13, %v1525_v63  ;;  %v1542_v15 = vsel %vm1540_vm4, %v1525_v63, %v1527_v12  ;;  %15550 = vmatmul.mubr.msk.f32.vlgmr.msra.gmra.mrb[2].mxu1 %vm281_vm1, %v15546_v52  ;;  %v15561_v52 = vld [vmem:[%s19089_s1 + $0x30] sm:$0xff] }
  0xbe   : > { %1560 = vmatprep.subr.mxu0 %v1542_v15  ;;  %1695 = vmatprep.mubr.f32.mxu1 %v16541_v0 }
  0xbf   : > { %1561 = vmatpush1.msra.mxu0 %v1541_v14 }
  0xc0   : > { %3524 = vrot.lane.b32.xlu0 %v16640_v6, %s16551_s16  ;;  %3526 = vrot.lane.b32.xlu1 %v16647_v7, %s16551_s16  ;;  %v1529_v17 = vpop.permute.xlu0 %1528  ;;  %v1531_v18 = vpop.permute.xlu1 %1530 }
  0xc1   : > { %v1544_v19 = vsel %vm1540_vm4, %v1529_v17, %v1531_v18  ;;  %v1543_v20 = vsel %vm1540_vm4, %v1527_v12, %v1529_v17  ;;  %15552 = vmatmul.mubr.msk.f32.vlgmr.msra.gmra.mrb[0].mxu0 %vm281_vm1, %v15551_v16 }
  0xc2   : > { %1631 = vmatprep.subr.mxu1 %v1544_v19  ;;  %1766 = vmatprep.mubr.f32.mxu0 %v16541_v0 }
  0xc3   : > { %1632 = vmatpush1.msra.mxu1 %v1543_v20 }
  0xc4   : > { %3528 = vrot.lane.b32.xlu0 %v16650_v8, %s16551_s16  ;;  %3530 = vrot.lane.b32.xlu1 %v16657_v9, %s16551_s16  ;;  %v1533_v21 = vpop.permute.xlu0 %1532  ;;  %v1535_v22 = vpop.permute.xlu1 %1534 }
  0xc5   : > { %v1546_v23 = vsel %vm1540_vm4, %v1533_v21, %v1535_v22  ;;  %v1545_v24 = vsel %vm1540_vm4, %v1531_v18, %v1533_v21  ;;  %15553 = vmatmul.mubr.msk.f32.vlgmr.msra.gmra.mrb[0].mxu1 %vm281_vm1, %v15551_v16 }
  0xc6   : > { %1702 = vmatprep.subr.mxu0 %v1546_v23  ;;  %1837 = vmatprep.mubr.f32.mxu1 %v16541_v0 }
  0xc7   : > { %1703 = vmatpush1.msra.mxu0 %v1545_v24 }
  0xc8   : > { %3848 = vrot.lane.b32.xlu0 %v16617_v1, %s16552_s22  ;;  %3850 = vrot.lane.b32.xlu1 %v16627_v3, %s16552_s22  ;;  %v1537_v25 = vpop.permute.xlu0 %1536  ;;  %v1539_v26 = vpop.permute.xlu1 %1538 }
  0xc9   : > { %v1548_v27 = vsel %vm1540_vm4, %v1537_v25, %v1539_v26  ;;  %v1547_v28 = vsel %vm1540_vm4, %v1535_v22, %v1537_v25  ;;  %15554 = vmatmul.mubr.msk.f32.vlgmr.msra.gmra.mrb[2].mxu0 %vm281_vm1, %v15551_v16 }
  0xca   : > { %1773 = vmatprep.subr.mxu1 %v1548_v27  ;;  %1956 = vmatprep.mubr.f32.mxu0 %v16541_v0 }
  0xcb   : > { %1774 = vmatpush1.msra.mxu1 %v1547_v28 }
  0xcc   : > { %3846 = vrot.lane.b32.xlu0 %v16620_v2, %s16552_s22  ;;  %3852 = vrot.lane.b32.xlu1 %v16630_v4, %s16552_s22  ;;  %v1857_v29 = vpop.permute.xlu0 %1856  ;;  %v1859_v30 = vpop.permute.xlu1 %1858 }
  0xcd   : > { %v1874_v31 = vsel %vm1872_vm5, %v1857_v29, %v1859_v30  ;;  %15555 = vmatmul.mubr.msk.f32.vlgmr.msra.gmra.mrb[2].mxu1 %vm281_vm1, %v15551_v16  ;;  %v15566_v16 = vld [vmem:[%s19089_s1 + $0x38] sm:$0xff] }
  0xce   : > { %1892 = vmatprep.subr.mxu0 %v1874_v31  ;;  %2027 = vmatprep.mubr.f32.mxu1 %v16541_v0 }
  0xd0   : > { %3854 = vrot.lane.b32.xlu0 %v16637_v5, %s16552_s22  ;;  %3856 = vrot.lane.b32.xlu1 %v16640_v6, %s16552_s22  ;;  %v1855_v32 = vpop.permute.xlu0 %1854  ;;  %v1861_v33 = vpop.permute.xlu1 %1860 }
  0xd1   : > { %v1873_v35 = vsel %vm1872_vm5, %v1855_v32, %v1857_v29  ;;  %v1875_v39 = vsel %vm1872_vm5, %v1859_v30, %v1861_v33 }
  0xd2   : > { %1893 = vmatpush1.msra.mxu0 %v1873_v35 }
  0xd3   : > { %15557 = vmatmul.mubr.msk.f32.vlgmr.msra.gmra.mrb[0].mxu0 %vm281_vm1, %v15556_v34 }
  0xd4   : > { %3858 = vrot.lane.b32.xlu0 %v16647_v7, %s16552_s22  ;;  %3860 = vrot.lane.b32.xlu1 %v16650_v8, %s16552_s22  ;;  %v1863_v36 = vpop.permute.xlu0 %1862  ;;  %v1865_v37 = vpop.permute.xlu1 %1864 }
  0xd5   : > { %v1876_v38 = vsel %vm1872_vm5, %v1861_v33, %v1863_v36  ;;  %2098 = vmatprep.mubr.f32.mxu0 %v16541_v0  ;;  %v1877_v43 = vsel %vm1872_vm5, %v1863_v36, %v1865_v37 }
  0xd6   : > { %1963 = vmatprep.subr.mxu1 %v1876_v38 }
  0xd7   : > { %1964 = vmatpush1.msra.mxu1 %v1875_v39 }
  0xd8   : > { %3862 = vrot.lane.b32.xlu0 %v16657_v9, %s16552_s22  ;;  %4180 = vrot.lane.b32.xlu1 %v16617_v1, %s16553_s7  ;;  %v1867_v40 = vpop.permute.xlu0 %1866  ;;  %v1869_v41 = vpop.permute.xlu1 %1868 }
  0xd9   : > { %v1878_v42 = vsel %vm1872_vm5, %v1865_v37, %v1867_v40  ;;  %15558 = vmatmul.mubr.msk.f32.vlgmr.msra.gmra.mrb[0].mxu1 %vm281_vm1, %v15556_v34  ;;  %v1879_v47 = vsel %vm1872_vm5, %v1867_v40, %v1869_v41 }
  0xda   : > { %2034 = vmatprep.subr.mxu0 %v1878_v42  ;;  %2169 = vmatprep.mubr.f32.mxu1 %v16541_v0 }
  0xdb   : > { %2035 = vmatpush1.msra.mxu0 %v1877_v43 }
  0xdc   : > { %4182 = vrot.lane.b32.xlu0 %v16627_v3, %s16553_s7  ;;  %4178 = vrot.lane.b32.xlu1 %v16620_v2, %s16553_s7  ;;  %v1871_v44 = vpop.permute.xlu0 %1870  ;;  %v2189_v45 = vpop.permute.xlu1 %2188 }
  0xdd   : > { %v1880_v46 = vsel %vm1872_vm5, %v1869_v41, %v1871_v44  ;;  %15559 = vmatmul.mubr.msk.f32.vlgmr.msra.gmra.mrb[2].mxu0 %vm281_vm1, %v15556_v34  ;;  %vm5524_vm5 = vcmask 252928  }
  0xde   : > { %2105 = vmatprep.subr.mxu1 %v1880_v46  ;;  %2288 = vmatprep.mubr.f32.mxu0 %v16541_v0 }
  0xdf   : > { %2106 = vmatpush1.msra.mxu1 %v1879_v47 }
  0xe0   : > { %4184 = vrot.lane.b32.xlu0 %v16630_v4, %s16553_s7  ;;  %4186 = vrot.lane.b32.xlu1 %v16637_v5, %s16553_s7  ;;  %v2191_v48 = vpop.permute.xlu0 %2190  ;;  %v2187_v49 = vpop.permute.xlu1 %2186 }
  0xe1   : > { %v2205_v50 = vsel %vm2204_vm6, %v2187_v49, %v2189_v45  ;;  %v2206_v51 = vsel %vm2204_vm6, %v2189_v45, %v2191_v48  ;;  %15560 = vmatmul.mubr.msk.f32.vlgmr.msra.gmra.mrb[2].mxu1 %vm281_vm1, %v15556_v34  ;;  %v15571_v34 = vld [vmem:[%s19089_s1 + $0x40] sm:$0xff] }
  0xe2   : > { %2224 = vmatprep.subr.mxu0 %v2206_v51  ;;  %2359 = vmatprep.mubr.f32.mxu1 %v16541_v0 }
  0xe3   : > { %2225 = vmatpush1.msra.mxu0 %v2205_v50 }
  0xe4   : > { %4188 = vrot.lane.b32.xlu0 %v16640_v6, %s16553_s7  ;;  %4190 = vrot.lane.b32.xlu1 %v16647_v7, %s16553_s7  ;;  %v2193_v53 = vpop.permute.xlu0 %2192  ;;  %v2195_v54 = vpop.permute.xlu1 %2194 }
  0xe5   : > { %v2208_v55 = vsel %vm2204_vm6, %v2193_v53, %v2195_v54  ;;  %v2207_v56 = vsel %vm2204_vm6, %v2191_v48, %v2193_v53  ;;  %15562 = vmatmul.mubr.msk.f32.vlgmr.msra.gmra.mrb[0].mxu0 %vm281_vm1, %v15561_v52  ;;  %v15576_v53 = vld [vmem:[%s19089_s1 + $0x48] sm:$0xff] }
  0xe6   : > { %2295 = vmatprep.subr.mxu1 %v2208_v55  ;;  %2430 = vmatprep.mubr.f32.mxu0 %v16541_v0 }
  0xe7   : > { %2296 = vmatpush1.msra.mxu1 %v2207_v56 }
  0xe8   : > { %4192 = vrot.lane.b32.xlu0 %v16650_v8, %s16553_s7  ;;  %4194 = vrot.lane.b32.xlu1 %v16657_v9, %s16553_s7  ;;  %v2197_v57 = vpop.permute.xlu0 %2196  ;;  %v2199_v58 = vpop.permute.xlu1 %2198 }
  0xe9   : > { %v2210_v59 = vsel %vm2204_vm6, %v2197_v57, %v2199_v58  ;;  %v2209_v60 = vsel %vm2204_vm6, %v2195_v54, %v2197_v57  ;;  %15563 = vmatmul.mubr.msk.f32.vlgmr.msra.gmra.mrb[0].mxu1 %vm281_vm1, %v15561_v52 }
  0xea   : > { %2366 = vmatprep.subr.mxu0 %v2210_v59  ;;  %2501 = vmatprep.mubr.f32.mxu1 %v16541_v0 }
  0xeb   : > { %2367 = vmatpush1.msra.mxu0 %v2209_v60 }
  0xec   : > { %4512 = vrot.lane.b32.xlu0 %v16617_v1, %s16554_s10  ;;  %4514 = vrot.lane.b32.xlu1 %v16627_v3, %s16554_s10  ;;  %v2201_v61 = vpop.permute.xlu0 %2200  ;;  %v2203_v62 = vpop.permute.xlu1 %2202 }
  0xed   : > { %v2212_v63 = vsel %vm2204_vm6, %v2201_v61, %v2203_v62  ;;  %v2211_v10 = vsel %vm2204_vm6, %v2199_v58, %v2201_v61  ;;  %15564 = vmatmul.mubr.msk.f32.vlgmr.msra.gmra.mrb[2].mxu0 %vm281_vm1, %v15561_v52  ;;  %vm5856_vm6 = vcmask 244736  }
  0xee   : > { %2437 = vmatprep.subr.mxu1 %v2212_v63  ;;  %2620 = vmatprep.mubr.f32.mxu0 %v16541_v0 }
  0xef   : > { %2438 = vmatpush1.msra.mxu1 %v2211_v10 }
  0xf0   : > { %4510 = vrot.lane.b32.xlu0 %v16620_v2, %s16554_s10  ;;  %4516 = vrot.lane.b32.xlu1 %v16630_v4, %s16554_s10  ;;  %v2521_v11 = vpop.permute.xlu0 %2520  ;;  %v2523_v12 = vpop.permute.xlu1 %2522 }
  0xf1   : > { %v2538_v13 = vsel %vm2536_vm7, %v2521_v11, %v2523_v12  ;;  %15565 = vmatmul.mubr.msk.f32.vlgmr.msra.gmra.mrb[2].mxu1 %vm281_vm1, %v15561_v52 }
  0xf2   : > { %2556 = vmatprep.subr.mxu0 %v2538_v13  ;;  %2691 = vmatprep.mubr.f32.mxu1 %v16541_v0 }
  0xf4   : > { %4518 = vrot.lane.b32.xlu0 %v16637_v5, %s16554_s10  ;;  %4520 = vrot.lane.b32.xlu1 %v16640_v6, %s16554_s10  ;;  %v2519_v14 = vpop.permute.xlu0 %2518  ;;  %v2525_v15 = vpop.permute.xlu1 %2524 }
  0xf5   : > { %v2537_v17 = vsel %vm2536_vm7, %v2519_v14, %v2521_v11  ;;  %v2539_v21 = vsel %vm2536_vm7, %v2523_v12, %v2525_v15 }
  0xf6   : > { %2557 = vmatpush1.msra.mxu0 %v2537_v17 }
  0xf7   : > { %15567 = vmatmul.mubr.msk.f32.vlgmr.msra.gmra.mrb[0].mxu0 %vm281_vm1, %v15566_v16 }
  0xf8   : > { %4522 = vrot.lane.b32.xlu0 %v16647_v7, %s16554_s10  ;;  %4524 = vrot.lane.b32.xlu1 %v16650_v8, %s16554_s10  ;;  %v2527_v18 = vpop.permute.xlu0 %2526  ;;  %v2529_v19 = vpop.permute.xlu1 %2528 }
  0xf9   : > { %v2540_v20 = vsel %vm2536_vm7, %v2525_v15, %v2527_v18  ;;  %2762 = vmatprep.mubr.f32.mxu0 %v16541_v0  ;;  %v2541_v25 = vsel %vm2536_vm7, %v2527_v18, %v2529_v19  ;;  %v17125_v18 = vld [vmem:[%s16612_s23 + $0x8] sm:$0xff] }
  0xfa   : > { %2627 = vmatprep.subr.mxu1 %v2540_v20 }
  0xfb   : > { %2628 = vmatpush1.msra.mxu1 %v2539_v21 }
  0xfc   : > { %4526 = vrot.lane.b32.xlu0 %v16657_v9, %s16554_s10  ;;  %4844 = vrot.lane.b32.xlu1 %v16617_v1, %s16555_s13  ;;  %v2531_v22 = vpop.permute.xlu0 %2530 }
  0xfd   : > { %v2533_v23 = vpop.permute.xlu1 %2532  ;;  %v2542_v24 = vsel %vm2536_vm7, %v2529_v19, %v2531_v22  ;;  %15568 = vmatmul.mubr.msk.f32.vlgmr.msra.gmra.mrb[0].mxu1 %vm281_vm1, %v15566_v16 }
  0xfe   : > { %2698 = vmatprep.subr.mxu0 %v2542_v24  ;;  %2833 = vmatprep.mubr.f32.mxu1 %v16541_v0  ;;  %v2543_v29 = vsel %vm2536_vm7, %v2531_v22, %v2533_v23  ;;  %v17139_v22 = vld [vmem:[%s16612_s23] sm:$0xff] }
  0xff   : > { %2699 = vmatpush1.msra.mxu0 %v2541_v25 }
 0x100   : > { %4846 = vrot.lane.b32.xlu0 %v16627_v3, %s16555_s13  ;;  %4842 = vrot.lane.b32.xlu1 %v16620_v2, %s16555_s13  ;;  %v2535_v26 = vpop.permute.xlu0 %2534 }
 0x101   : > { %v2853_v27 = vpop.permute.xlu1 %2852  ;;  %v2544_v28 = vsel %vm2536_vm7, %v2533_v23, %v2535_v26  ;;  %15569 = vmatmul.mubr.msk.f32.vlgmr.msra.gmra.mrb[2].mxu0 %vm281_vm1, %v15566_v16  ;;  %v17144_v23 = vld [vmem:[%s16612_s23 + $0x18] sm:$0xff]  ;;  %vm6188_vm7 = vcmask 236544  }
 0x102   : > { %2769 = vmatprep.subr.mxu1 %v2544_v28  ;;  %2952 = vmatprep.mubr.f32.mxu0 %v16541_v0  ;;  %v17157_v28 = vld [vmem:[%s16612_s23 + $0x28] sm:$0xff] }
 0x103   : > { %2770 = vmatpush1.msra.mxu1 %v2543_v29 }
 0x104   : > { %4848 = vrot.lane.b32.xlu0 %v16630_v4, %s16555_s13  ;;  %4850 = vrot.lane.b32.xlu1 %v16637_v5, %s16555_s13  ;;  %v2855_v30 = vpop.permute.xlu0 %2854 }
 0x105   : > { %v2851_v31 = vpop.permute.xlu1 %2850  ;;  %v2870_v32 = vsel %vm2868_vm8, %v2853_v27, %v2855_v30  ;;  %15570 = vmatmul.mubr.msk.f32.vlgmr.msra.gmra.mrb[2].mxu1 %vm281_vm1, %v15566_v16 }
 0x106   : > { %v2869_v33 = vsel %vm2868_vm8, %v2851_v31, %v2853_v27  ;;  %2888 = vmatprep.subr.mxu0 %v2870_v32  ;;  %3023 = vmatprep.mubr.f32.mxu1 %v16541_v0  ;;  %v17152_v27 = vld [vmem:[%s16612_s23 + $0x20] sm:$0xff]  ;;  %v15586_v32 = vld [vmem:[%s19089_s1 + $0x58] sm:$0xff] }
 0x107   : > { %2889 = vmatpush1.msra.mxu0 %v2869_v33  ;;  %v17167_v33 = vld [vmem:[%s16612_s23 + $0x30] sm:$0xff] }
 0x108   : > { %4852 = vrot.lane.b32.xlu0 %v16640_v6, %s16555_s13  ;;  %4854 = vrot.lane.b32.xlu1 %v16647_v7, %s16555_s13  ;;  %v2857_v35 = vpop.permute.xlu0 %2856 }
 0x109   : > { %v2859_v36 = vpop.permute.xlu1 %2858  ;;  %15572 = vmatmul.mubr.msk.f32.vlgmr.msra.gmra.mrb[0].mxu0 %vm281_vm1, %v15571_v34  ;;  %v2871_v38 = vsel %vm2868_vm8, %v2855_v30, %v2857_v35 }
 0x10a   : > { %v2872_v37 = vsel %vm2868_vm8, %v2857_v35, %v2859_v36  ;;  %3094 = vmatprep.mubr.f32.mxu0 %v16541_v0 }
 0x10b   : > { %2959 = vmatprep.subr.mxu1 %v2872_v37 }
 0x10c   : > { %4856 = vrot.lane.b32.xlu0 %v16650_v8, %s16555_s13  ;;  %4858 = vrot.lane.b32.xlu1 %v16657_v9, %s16555_s13  ;;  %v2861_v39 = vpop.permute.xlu0 %2860 }
 0x10d   : > { %2960 = vmatpush1.msra.mxu1 %v2871_v38  ;;  %v2863_v40 = vpop.permute.xlu1 %2862  ;;  %v2873_v42 = vsel %vm2868_vm8, %v2859_v36, %v2861_v39  ;;  %v17180_v38 = vld [vmem:[%s16612_s23 + $0x40] sm:$0xff] }
 0x10e   : > { %v2874_v41 = vsel %vm2868_vm8, %v2861_v39, %v2863_v40  ;;  %15573 = vmatmul.mubr.msk.f32.vlgmr.msra.gmra.mrb[0].mxu1 %vm281_vm1, %v15571_v34 }
 0x10f   : > { %3030 = vmatprep.subr.mxu0 %v2874_v41  ;;  %3165 = vmatprep.mubr.f32.mxu1 %v16541_v0 }
 0x110   : > { %5176 = vrot.lane.b32.xlu0 %v16617_v1, %s16556_s17  ;;  %5178 = vrot.lane.b32.xlu1 %v16627_v3, %s16556_s17 }
 0x111   : > { %3031 = vmatpush1.msra.mxu0 %v2873_v42 }
 0x112   : > { %v2865_v43 = vpop.permute.xlu0 %2864  ;;  %v2867_v44 = vpop.permute.xlu1 %2866  ;;  %15574 = vmatmul.mubr.msk.f32.vlgmr.msra.gmra.mrb[2].mxu0 %vm281_vm1, %v15571_v34 }
 0x113   : > { %v2876_v45 = vsel %vm2868_vm8, %v2865_v43, %v2867_v44  ;;  %v2875_v46 = vsel %vm2868_vm8, %v2863_v40, %v2865_v43  ;;  %3284 = vmatprep.mubr.f32.mxu0 %v16541_v0  ;;  %vm6520_vm8 = vcmask 228352  }
 0x114   : > { %5174 = vrot.lane.b32.xlu0 %v16620_v2, %s16556_s17  ;;  %5180 = vrot.lane.b32.xlu1 %v16630_v4, %s16556_s17 }
 0x115   : > { %3101 = vmatprep.subr.mxu1 %v2876_v45 }
 0x116   : > { %3102 = vmatpush1.msra.mxu1 %v2875_v46  ;;  %v3185_v47 = vpop.permute.xlu0 %3184  ;;  %v3187_v48 = vpop.permute.xlu1 %3186 }
 0x117   : > { %v3202_v49 = vsel %vm3200_vm9, %v3185_v47, %v3187_v48  ;;  %15575 = vmatmul.mubr.msk.f32.vlgmr.msra.gmra.mrb[2].mxu1 %vm281_vm1, %v15571_v34  ;;  %v17172_v34 = vld [vmem:[%s16612_s23 + $0x38] sm:$0xff] }
 0x118   : > { %5182 = vrot.lane.b32.xlu0 %v16637_v5, %s16556_s17  ;;  %5184 = vrot.lane.b32.xlu1 %v16640_v6, %s16556_s17 }
 0x119   : > { %3220 = vmatprep.subr.mxu0 %v3202_v49  ;;  %3355 = vmatprep.mubr.f32.mxu1 %v16541_v0 }
 0x11a   : > { %v3183_v50 = vpop.permute.xlu0 %3182  ;;  %v3189_v51 = vpop.permute.xlu1 %3188 }
 0x11b   : > { %v3201_v52 = vsel %vm3200_vm9, %v3183_v50, %v3185_v47  ;;  %v3203_v57 = vsel %vm3200_vm9, %v3187_v48, %v3189_v51 }
 0x11c   : > { %5186 = vrot.lane.b32.xlu0 %v16647_v7, %s16556_s17  ;;  %5188 = vrot.lane.b32.xlu1 %v16650_v8, %s16556_s17 }
 0x11d   : > { %3221 = vmatpush1.msra.mxu0 %v3201_v52  ;;  %v15591_v52 = vld [vmem:[%s19089_s1 + $0x60] sm:$0xff] }
 0x11e   : > { %v3191_v54 = vpop.permute.xlu0 %3190  ;;  %v3193_v55 = vpop.permute.xlu1 %3192  ;;  %15577 = vmatmul.mubr.msk.f32.vlgmr.msra.gmra.mrb[0].mxu0 %vm281_vm1, %v15576_v53 }
 0x11f   : > { %v3204_v56 = vsel %vm3200_vm9, %v3189_v51, %v3191_v54  ;;  %3426 = vmatprep.mubr.f32.mxu0 %v16541_v0  ;;  %v3205_v61 = vsel %vm3200_vm9, %v3191_v54, %v3193_v55 }
 0x120   : > { %5190 = vrot.lane.b32.xlu0 %v16657_v9, %s16556_s17  ;;  %5508 = vrot.lane.b32.xlu1 %v16617_v1, %s16557_s30  ;;  %s16560_s17 = smov 28  }
 0x121   : > { %3291 = vmatprep.subr.mxu1 %v3204_v56 }
 0x122   : > { %3292 = vmatpush1.msra.mxu1 %v3203_v57  ;;  %v3195_v58 = vpop.permute.xlu0 %3194  ;;  %v3197_v59 = vpop.permute.xlu1 %3196 }
 0x123   : > { %v3206_v60 = vsel %vm3200_vm9, %v3193_v55, %v3195_v58  ;;  %15578 = vmatmul.mubr.msk.f32.vlgmr.msra.gmra.mrb[0].mxu1 %vm281_vm1, %v15576_v53 }
 0x124   : > { %5510 = vrot.lane.b32.xlu0 %v16627_v3, %s16557_s30  ;;  %5506 = vrot.lane.b32.xlu1 %v16620_v2, %s16557_s30  ;;  %v3207_v2 = vsel %vm3200_vm9, %v3195_v58, %v3197_v59 }
 0x125   : > { %3362 = vmatprep.subr.mxu0 %v3206_v60  ;;  %3497 = vmatprep.mubr.f32.mxu1 %v16541_v0 }
 0x126   : > { %3363 = vmatpush1.msra.mxu0 %v3205_v61  ;;  %v3199_v1 = vpop.permute.xlu0 %3198  ;;  %v3517_v62 = vpop.permute.xlu1 %3516 }
 0x127   : > { %v3208_v63 = vsel %vm3200_vm9, %v3197_v59, %v3199_v1  ;;  %15579 = vmatmul.mubr.msk.f32.vlgmr.msra.gmra.mrb[2].mxu0 %vm281_vm1, %v15576_v53 }
 0x128   : > { %5512 = vrot.lane.b32.xlu0 %v16630_v4, %s16557_s30  ;;  %5514 = vrot.lane.b32.xlu1 %v16637_v5, %s16557_s30  ;;  %v15581_v4 = vld [vmem:[%s19089_s1 + $0x50] sm:$0xff] }
 0x129   : > { %3433 = vmatprep.subr.mxu1 %v3208_v63  ;;  %3616 = vmatprep.mubr.f32.mxu0 %v16541_v0 }
 0x12a   : > { %3434 = vmatpush1.msra.mxu1 %v3207_v2  ;;  %v3519_v3 = vpop.permute.xlu0 %3518  ;;  %v3515_v10 = vpop.permute.xlu1 %3514 }
 0x12b   : > { %v3533_v11 = vsel %vm3532_vm10, %v3515_v10, %v3517_v62  ;;  %v3534_v12 = vsel %vm3532_vm10, %v3517_v62, %v3519_v3  ;;  %15580 = vmatmul.mubr.msk.f32.vlgmr.msra.gmra.mrb[2].mxu1 %vm281_vm1, %v15576_v53 }
 0x12c   : > { %5516 = vrot.lane.b32.xlu0 %v16640_v6, %s16557_s30  ;;  %5518 = vrot.lane.b32.xlu1 %v16647_v7, %s16557_s30 }
 0x12d   : > { %3552 = vmatprep.subr.mxu0 %v3534_v12  ;;  %3687 = vmatprep.mubr.f32.mxu1 %v16541_v0 }
 0x12e   : > { %3553 = vmatpush1.msra.mxu0 %v3533_v11  ;;  %v3521_v5 = vpop.permute.xlu0 %3520  ;;  %v3523_v13 = vpop.permute.xlu1 %3522 }
 0x12f   : > { %v3536_v14 = vsel %vm3532_vm10, %v3521_v5, %v3523_v13  ;;  %v3535_v15 = vsel %vm3532_vm10, %v3519_v3, %v3521_v5  ;;  %15582 = vmatmul.mubr.msk.f32.vlgmr.msra.gmra.mrb[0].mxu0 %vm281_vm1, %v15581_v4  ;;  %v15596_v5 = vld [vmem:[%s19089_s1 + $0x68] sm:$0xff] }
 0x130   : > { %5520 = vrot.lane.b32.xlu0 %v16650_v8, %s16557_s30  ;;  %5522 = vrot.lane.b32.xlu1 %v16657_v9, %s16557_s30  ;;  %v17130_v8 = vld [vmem:[%s16612_s23 + $0x10] sm:$0xff] }
 0x131   : > { %3623 = vmatprep.subr.mxu1 %v3536_v14  ;;  %3758 = vmatprep.mubr.f32.mxu0 %v16541_v0 }
 0x132   : > { %3624 = vmatpush1.msra.mxu1 %v3535_v15  ;;  %v3525_v6 = vpop.permute.xlu0 %3524  ;;  %v3527_v7 = vpop.permute.xlu1 %3526 }
 0x133   : > { %v3538_v16 = vsel %vm3532_vm10, %v3525_v6, %v3527_v7  ;;  %v3537_v17 = vsel %vm3532_vm10, %v3523_v13, %v3525_v6  ;;  %15583 = vmatmul.mubr.msk.f32.vlgmr.msra.gmra.mrb[0].mxu1 %vm281_vm1, %v15581_v4  ;;  %v17254_v13 = vld [vmem:[%s16612_s23 + $0x10] sm:$0xff] }
 0x134   : > { %5840 = vrot.lane.b32.xlu0 %v17125_v18, %s16558_s9  ;;  %5842 = vrot.lane.b32.xlu1 %v17130_v8, %s16558_s9 }
 0x135   : > { %3694 = vmatprep.subr.mxu0 %v3538_v16  ;;  %3829 = vmatprep.mubr.f32.mxu1 %v16541_v0  ;;  %v17265_v16 = vld [vmem:[%s16612_s23 + $0x18] sm:$0xff] }
 0x136   : > { %3695 = vmatpush1.msra.mxu0 %v3537_v17  ;;  %v3529_v9 = vpop.permute.xlu0 %3528  ;;  %v3531_v19 = vpop.permute.xlu1 %3530  ;;  %v17268_v17 = vld [vmem:[%s16612_s23 + $0x8] sm:$0xff] }
 0x137   : > { %v3540_v20 = vsel %vm3532_vm10, %v3529_v9, %v3531_v19  ;;  %v3539_v21 = vsel %vm3532_vm10, %v3527_v7, %v3529_v9  ;;  %15584 = vmatmul.mubr.msk.f32.vlgmr.msra.gmra.mrb[2].mxu0 %vm281_vm1, %v15581_v4 }
 0x138   : > { %5838 = vrot.lane.b32.xlu0 %v17139_v22, %s16558_s9  ;;  %5844 = vrot.lane.b32.xlu1 %v17144_v23, %s16558_s9 }
 0x139   : > { %3765 = vmatprep.subr.mxu1 %v3540_v20  ;;  %3948 = vmatprep.mubr.f32.mxu0 %v16541_v0 }
 0x13a   : > { %3766 = vmatpush1.msra.mxu1 %v3539_v21  ;;  %v3849_v24 = vpop.permute.xlu0 %3848  ;;  %v3851_v25 = vpop.permute.xlu1 %3850 }
 0x13b   : > { %v3866_v26 = vsel %vm3864_vm11, %v3849_v24, %v3851_v25  ;;  %15585 = vmatmul.mubr.msk.f32.vlgmr.msra.gmra.mrb[2].mxu1 %vm281_vm1, %v15581_v4 }
 0x13c   : > { %5846 = vrot.lane.b32.xlu0 %v17152_v27, %s16558_s9  ;;  %5848 = vrot.lane.b32.xlu1 %v17157_v28, %s16558_s9 }
 0x13d   : > { %3884 = vmatprep.subr.mxu0 %v3866_v26  ;;  %4019 = vmatprep.mubr.f32.mxu1 %v16541_v0 }
 0x13e   : > { %v3847_v29 = vpop.permute.xlu0 %3846  ;;  %v3853_v30 = vpop.permute.xlu1 %3852 }
 0x13f   : > { %v3865_v31 = vsel %vm3864_vm11, %v3847_v29, %v3849_v24  ;;  %v3867_v39 = vsel %vm3864_vm11, %v3851_v25, %v3853_v30  ;;  %v17281_v24 = vld [vmem:[%s16612_s23 + $0x28] sm:$0xff] }
 0x140   : > { %5850 = vrot.lane.b32.xlu0 %v17167_v33, %s16558_s9  ;;  %5852 = vrot.lane.b32.xlu1 %v17172_v34, %s16558_s9 }
 0x141   : > { %3885 = vmatpush1.msra.mxu0 %v3865_v31  ;;  %v17292_v31 = vld [vmem:[%s16612_s23 + $0x30] sm:$0xff] }
 0x142   : > { %v3855_v35 = vpop.permute.xlu0 %3854  ;;  %v3857_v36 = vpop.permute.xlu1 %3856  ;;  %15587 = vmatmul.mubr.msk.f32.vlgmr.msra.gmra.mrb[0].mxu0 %vm281_vm1, %v15586_v32 }
 0x143   : > { %v3868_v37 = vsel %vm3864_vm11, %v3853_v30, %v3855_v35  ;;  %4090 = vmatprep.mubr.f32.mxu0 %v16541_v0  ;;  %v3869_v43 = vsel %vm3864_vm11, %v3855_v35, %v3857_v36 }
 0x144   : > { %5854 = vrot.lane.b32.xlu0 %v17180_v38, %s16558_s9  ;;  %6172 = vrot.lane.b32.xlu1 %v17125_v18, %s16559_s12 }
 0x145   : > { %3955 = vmatprep.subr.mxu1 %v3868_v37 }
 0x146   : > { %3956 = vmatpush1.msra.mxu1 %v3867_v39  ;;  %v3859_v40 = vpop.permute.xlu0 %3858  ;;  %v3861_v41 = vpop.permute.xlu1 %3860 }
 0x147   : > { %v3870_v42 = vsel %vm3864_vm11, %v3857_v36, %v3859_v40  ;;  %15588 = vmatmul.mubr.msk.f32.vlgmr.msra.gmra.mrb[0].mxu1 %vm281_vm1, %v15586_v32  ;;  %v3871_v47 = vsel %vm3864_vm11, %v3859_v40, %v3861_v41  ;;  %v15601_v40 = vld [vmem:[%s19089_s1 + $0x70] sm:$0xff] }
 0x148   : > { %6174 = vrot.lane.b32.xlu0 %v17130_v8, %s16559_s12  ;;  %6170 = vrot.lane.b32.xlu1 %v17139_v22, %s16559_s12 }
 0x149   : > { %4026 = vmatprep.subr.mxu0 %v3870_v42  ;;  %4161 = vmatprep.mubr.f32.mxu1 %v16541_v0  ;;  %v17312_v42 = vld [vmem:[%s16612_s23 + $0x48] sm:$0xff] }
 0x14a   : > { %4027 = vmatpush1.msra.mxu0 %v3869_v43  ;;  %v3863_v44 = vpop.permute.xlu0 %3862  ;;  %v4181_v45 = vpop.permute.xlu1 %4180 }
 0x14b   : > { %v3872_v46 = vsel %vm3864_vm11, %v3861_v41, %v3863_v44  ;;  %15589 = vmatmul.mubr.msk.f32.vlgmr.msra.gmra.mrb[2].mxu0 %vm281_vm1, %v15586_v32  ;;  %v17309_v41 = vld [vmem:[%s16612_s23 + $0x40] sm:$0xff]  ;;  %vm9396_vm11 = vcmask 998400  }
 0x14c   : > { %6176 = vrot.lane.b32.xlu0 %v17144_v23, %s16559_s12  ;;  %6178 = vrot.lane.b32.xlu1 %v17152_v27, %s16559_s12 }
 0x14d   : > { %4097 = vmatprep.subr.mxu1 %v3872_v46  ;;  %4280 = vmatprep.mubr.f32.mxu0 %v16541_v0 }
 0x14e   : > { %4098 = vmatpush1.msra.mxu1 %v3871_v47  ;;  %v4183_v48 = vpop.permute.xlu0 %4182  ;;  %v4179_v49 = vpop.permute.xlu1 %4178 }
 0x14f   : > { %v4197_v50 = vsel %vm4196_vm12, %v4179_v49, %v4181_v45  ;;  %v4198_v51 = vsel %vm4196_vm12, %v4181_v45, %v4183_v48  ;;  %15590 = vmatmul.mubr.msk.f32.vlgmr.msra.gmra.mrb[2].mxu1 %vm281_vm1, %v15586_v32  ;;  %v17295_v32 = vld [vmem:[%s16612_s23 + $0x38] sm:$0xff] }
 0x150   : > { %6180 = vrot.lane.b32.xlu0 %v17157_v28, %s16559_s12  ;;  %6182 = vrot.lane.b32.xlu1 %v17167_v33, %s16559_s12 }
 0x151   : > { %4216 = vmatprep.subr.mxu0 %v4198_v51  ;;  %4351 = vmatprep.mubr.f32.mxu1 %v16541_v0 }
 0x152   : > { %4217 = vmatpush1.msra.mxu0 %v4197_v50  ;;  %v4185_v53 = vpop.permute.xlu0 %4184  ;;  %v4187_v54 = vpop.permute.xlu1 %4186 }
 0x153   : > { %v4200_v55 = vsel %vm4196_vm12, %v4185_v53, %v4187_v54  ;;  %v4199_v56 = vsel %vm4196_vm12, %v4183_v48, %v4185_v53  ;;  %15592 = vmatmul.mubr.msk.f32.vlgmr.msra.gmra.mrb[0].mxu0 %vm281_vm1, %v15591_v52 }
 0x154   : > { %6184 = vrot.lane.b32.xlu0 %v17172_v34, %s16559_s12  ;;  %6186 = vrot.lane.b32.xlu1 %v17180_v38, %s16559_s12 }
 0x155   : > { %4287 = vmatprep.subr.mxu1 %v4200_v55  ;;  %4422 = vmatprep.mubr.f32.mxu0 %v16541_v0 }
 0x156   : > { %4288 = vmatpush1.msra.mxu1 %v4199_v56  ;;  %v4189_v57 = vpop.permute.xlu0 %4188  ;;  %v4191_v58 = vpop.permute.xlu1 %4190 }
 0x157   : > { %v4202_v59 = vsel %vm4196_vm12, %v4189_v57, %v4191_v58  ;;  %v4201_v60 = vsel %vm4196_vm12, %v4187_v54, %v4189_v57  ;;  %15593 = vmatmul.mubr.msk.f32.vlgmr.msra.gmra.mrb[0].mxu1 %vm281_vm1, %v15591_v52 }
 0x158   : > { %6504 = vrot.lane.b32.xlu0 %v17125_v18, %s16560_s17  ;;  %6506 = vrot.lane.b32.xlu1 %v17130_v8, %s16560_s17 }
 0x159   : > { %4358 = vmatprep.subr.mxu0 %v4202_v59  ;;  %4493 = vmatprep.mubr.f32.mxu1 %v16541_v0 }
 0x15a   : > { %4359 = vmatpush1.msra.mxu0 %v4201_v60  ;;  %v4193_v61 = vpop.permute.xlu0 %4192  ;;  %v4195_v1 = vpop.permute.xlu1 %4194 }
 0x15b   : > { %v4204_v62 = vsel %vm4196_vm12, %v4193_v61, %v4195_v1  ;;  %v4203_v63 = vsel %vm4196_vm12, %v4191_v58, %v4193_v61  ;;  %15594 = vmatmul.mubr.msk.f32.vlgmr.msra.gmra.mrb[2].mxu0 %vm281_vm1, %v15591_v52  ;;  %v15606_v61 = vld [vmem:[%s19089_s1 + $0x78] sm:$0xff] }
 0x15c   : > { %6502 = vrot.lane.b32.xlu0 %v17139_v22, %s16560_s17  ;;  %6508 = vrot.lane.b32.xlu1 %v17144_v23, %s16560_s17  ;;  %v17278_v22 = vld [vmem:[%s16612_s23 + $0x20] sm:$0xff] }
 0x15d   : > { %4429 = vmatprep.subr.mxu1 %v4204_v62  ;;  %4612 = vmatprep.mubr.f32.mxu0 %v16541_v0 }
 0x15e   : > { %4430 = vmatpush1.msra.mxu1 %v4203_v63  ;;  %v4513_v2 = vpop.permute.xlu0 %4512  ;;  %v4515_v3 = vpop.permute.xlu1 %4514 }
 0x15f   : > { %v4530_v10 = vsel %vm4528_vm13, %v4513_v2, %v4515_v3  ;;  %15595 = vmatmul.mubr.msk.f32.vlgmr.msra.gmra.mrb[2].mxu1 %vm281_vm1, %v15591_v52 }
 0x160   : > { %6510 = vrot.lane.b32.xlu0 %v17152_v27, %s16560_s17  ;;  %6512 = vrot.lane.b32.xlu1 %v17157_v28, %s16560_s17 }
 0x161   : > { %4548 = vmatprep.subr.mxu0 %v4530_v10  ;;  %4683 = vmatprep.mubr.f32.mxu1 %v16541_v0 }
 0x162   : > { %v4511_v11 = vpop.permute.xlu0 %4510  ;;  %v4517_v12 = vpop.permute.xlu1 %4516 }
 0x163   : > { %v4529_v4 = vsel %vm4528_vm13, %v4511_v11, %v4513_v2  ;;  %v4531_v7 = vsel %vm4528_vm13, %v4515_v3, %v4517_v12 }
 0x164   : > { %6514 = vrot.lane.b32.xlu0 %v17167_v33, %s16560_s17  ;;  %6516 = vrot.lane.b32.xlu1 %v17172_v34, %s16560_s17 }
 0x165   : > { %4549 = vmatpush1.msra.mxu0 %v4529_v4 }
 0x166   : > { %v4519_v14 = vpop.permute.xlu0 %4518  ;;  %v4521_v15 = vpop.permute.xlu1 %4520  ;;  %15597 = vmatmul.mubr.msk.f32.vlgmr.msra.gmra.mrb[0].mxu0 %vm281_vm1, %v15596_v5 }
 0x167   : > { %v4532_v6 = vsel %vm4528_vm13, %v4517_v12, %v4519_v14  ;;  %4754 = vmatprep.mubr.f32.mxu0 %v16541_v0  ;;  %v4533_v21 = vsel %vm4528_vm13, %v4519_v14, %v4521_v15 }
 0x168   : > { %6518 = vrot.lane.b32.xlu0 %v17180_v38, %s16560_s17  ;;  %7151 = vrot.lane.b32.xlu1 %v17254_v13, %s16542_s24 }
 0x169   : > { %4619 = vmatprep.subr.mxu1 %v4532_v6 }
 0x16a   : > { %4620 = vmatpush1.msra.mxu1 %v4531_v7  ;;  %v4523_v9 = vpop.permute.xlu0 %4522  ;;  %v4525_v19 = vpop.permute.xlu1 %4524 }
 0x16b   : > { %v4534_v20 = vsel %vm4528_vm13, %v4521_v15, %v4523_v9  ;;  %15598 = vmatmul.mubr.msk.f32.vlgmr.msra.gmra.mrb[0].mxu1 %vm281_vm1, %v15596_v5  ;;  %v4535_v30 = vsel %vm4528_vm13, %v4523_v9, %v4525_v19 }
 0x16c   : > { %7153 = vrot.lane.b32.xlu0 %v17265_v16, %s16542_s24  ;;  %7149 = vrot.lane.b32.xlu1 %v17268_v17, %s16542_s24 }
 0x16d   : > { %4690 = vmatprep.subr.mxu0 %v4534_v20  ;;  %4825 = vmatprep.mubr.f32.mxu1 %v16541_v0  ;;  %v15611_v20 = vld [vmem:[%s19089_s1 + $0x80] sm:$0xff] }
 0x16e   : > { %4691 = vmatpush1.msra.mxu0 %v4533_v21  ;;  %v4527_v25 = vpop.permute.xlu0 %4526  ;;  %v4845_v26 = vpop.permute.xlu1 %4844 }
 0x16f   : > { %v4536_v29 = vsel %vm4528_vm13, %v4525_v19, %v4527_v25  ;;  %15599 = vmatmul.mubr.msk.f32.vlgmr.msra.gmra.mrb[2].mxu0 %vm281_vm1, %v15596_v5  ;;  %vm9667_vm13 = vcmask 982016  }
 0x170   : > { %7155 = vrot.lane.b32.xlu0 %v17278_v22, %s16542_s24  ;;  %7157 = vrot.lane.b32.xlu1 %v17281_v24, %s16542_s24 }
 0x171   : > { %4761 = vmatprep.subr.mxu1 %v4536_v29  ;;  %4944 = vmatprep.mubr.f32.mxu0 %v16541_v0 }
 0x172   : > { %4762 = vmatpush1.msra.mxu1 %v4535_v30  ;;  %v4847_v35 = vpop.permute.xlu0 %4846  ;;  %v4843_v36 = vpop.permute.xlu1 %4842 }
 0x173   : > { %v4861_v37 = vsel %vm4860_vm14, %v4843_v36, %v4845_v26  ;;  %v4862_v39 = vsel %vm4860_vm14, %v4845_v26, %v4847_v35  ;;  %15600 = vmatmul.mubr.msk.f32.vlgmr.msra.gmra.mrb[2].mxu1 %vm281_vm1, %v15596_v5 }
 0x174   : > { %7159 = vrot.lane.b32.xlu0 %v17292_v31, %s16542_s24  ;;  %7161 = vrot.lane.b32.xlu1 %v17295_v32, %s16542_s24 }
 0x175   : > { %4880 = vmatprep.subr.mxu0 %v4862_v39  ;;  %5015 = vmatprep.mubr.f32.mxu1 %v16541_v0 }
 0x176   : > { %4881 = vmatpush1.msra.mxu0 %v4861_v37  ;;  %v4849_v43 = vpop.permute.xlu0 %4848  ;;  %v4851_v44 = vpop.permute.xlu1 %4850 }
 0x177   : > { %v4864_v45 = vsel %vm4860_vm14, %v4849_v43, %v4851_v44  ;;  %v4863_v46 = vsel %vm4860_vm14, %v4847_v35, %v4849_v43  ;;  %15602 = vmatmul.mubr.msk.f32.vlgmr.msra.gmra.mrb[0].mxu0 %vm281_vm1, %v15601_v40 }
 0x178   : > { %7163 = vrot.lane.b32.xlu0 %v17309_v41, %s16542_s24  ;;  %7165 = vrot.lane.b32.xlu1 %v17312_v42, %s16542_s24 }
 0x179   : > { %4951 = vmatprep.subr.mxu1 %v4864_v45  ;;  %5086 = vmatprep.mubr.f32.mxu0 %v16541_v0 }
 0x17a   : > { %4952 = vmatpush1.msra.mxu1 %v4863_v46  ;;  %v4853_v47 = vpop.permute.xlu0 %4852  ;;  %v4855_v48 = vpop.permute.xlu1 %4854  ;;  %v16561_v46 = vmov 0  }
 0x17b   : > { %v4866_v49 = vsel %vm4860_vm14, %v4853_v47, %v4855_v48  ;;  %v4865_v50 = vsel %vm4860_vm14, %v4851_v44, %v4853_v47  ;;  %15603 = vmatmul.mubr.msk.f32.vlgmr.msra.gmra.mrb[0].mxu1 %vm281_vm1, %v15601_v40  ;;  %16522 = vset.pattern.permute.xlu1 %v16561_v46 }
 0x17c   : > { %7482 = vrot.lane.b32.xlu0 %v17254_v13, %s16543_s25  ;;  %7484 = vrot.lane.b32.xlu1 %v17265_v16, %s16543_s25 }
 0x17d   : > { %5022 = vmatprep.subr.mxu0 %v4866_v49  ;;  %5157 = vmatprep.mubr.f32.mxu1 %v16541_v0  ;;  %v8471_v49 = vld [vmem:[%s19090_s2] sm:$0xff] }
 0x17e   : > { %5023 = vmatpush1.msra.mxu0 %v4865_v50  ;;  %v4857_v51 = vpop.permute.xlu0 %4856  ;;  %v4859_v52 = vpop.permute.xlu1 %4858  ;;  %16523 = vset.pattern.permute.xlu0 %v16561_v46 }
 0x17f   : > { %v4868_v53 = vsel %vm4860_vm14, %v4857_v51, %v4859_v52  ;;  %v4867_v54 = vsel %vm4860_vm14, %v4855_v48, %v4857_v51  ;;  %15604 = vmatmul.mubr.msk.f32.vlgmr.msra.gmra.mrb[2].mxu0 %vm281_vm1, %v15601_v40  ;;  %v15616_v48 = vld [vmem:[%s19089_s1 + $0x88] sm:$0xff] }
 0x180   : > { %7480 = vrot.lane.b32.xlu0 %v17268_v17, %s16543_s25  ;;  %7486 = vrot.lane.b32.xlu1 %v17278_v22, %s16543_s25 }
 0x181   : > { %5093 = vmatprep.subr.mxu1 %v4868_v53  ;;  %5276 = vmatprep.mubr.f32.mxu0 %v16541_v0 }
 0x182   : > { %5094 = vmatpush1.msra.mxu1 %v4867_v54  ;;  %v5177_v55 = vpop.permute.xlu0 %5176  ;;  %v5179_v56 = vpop.permute.xlu1 %5178 }
 0x183   : > { %v5194_v57 = vsel %vm5192_vm15, %v5177_v55, %v5179_v56  ;;  %15605 = vmatmul.mubr.msk.f32.vlgmr.msra.gmra.mrb[2].mxu1 %vm281_vm1, %v15601_v40 }
 0x184   : > { %7488 = vrot.lane.b32.xlu0 %v17281_v24, %s16543_s25  ;;  %7490 = vrot.lane.b32.xlu1 %v17292_v31, %s16543_s25 }
 0x185   : > { %5212 = vmatprep.subr.mxu0 %v5194_v57  ;;  %5347 = vmatprep.mubr.f32.mxu1 %v16541_v0 }
 0x186   : > { %v5175_v58 = vpop.permute.xlu0 %5174  ;;  %v5181_v59 = vpop.permute.xlu1 %5180 }
 0x187   : > { %v5193_v60 = vsel %vm5192_vm15, %v5175_v58, %v5177_v55  ;;  %v5195_v2 = vsel %vm5192_vm15, %v5179_v56, %v5181_v59 }
 0x188   : > { %7492 = vrot.lane.b32.xlu0 %v17295_v32, %s16543_s25  ;;  %7494 = vrot.lane.b32.xlu1 %v17309_v41, %s16543_s25 }
 0x189   : > { %5213 = vmatpush1.msra.mxu0 %v5193_v60 }
 0x18a   : > { %v5183_v1 = vpop.permute.xlu0 %5182  ;;  %v5185_v62 = vpop.permute.xlu1 %5184  ;;  %15607 = vmatmul.mubr.msk.f32.vlgmr.msra.gmra.mrb[0].mxu0 %vm281_vm1, %v15606_v61 }
 0x18b   : > { %v5196_v63 = vsel %vm5192_vm15, %v5181_v59, %v5183_v1  ;;  %5418 = vmatprep.mubr.f32.mxu0 %v16541_v0  ;;  %v5197_v12 = vsel %vm5192_vm15, %v5183_v1, %v5185_v62 }
 0x18c   : > { %7496 = vrot.lane.b32.xlu0 %v17312_v42, %s16543_s25  ;;  %7813 = vrot.lane.b32.xlu1 %v17254_v13, %s16544_s26 }
 0x18d   : > { %5283 = vmatprep.subr.mxu1 %v5196_v63 }
 0x18e   : > { %5284 = vmatpush1.msra.mxu1 %v5195_v2  ;;  %v5187_v3 = vpop.permute.xlu0 %5186  ;;  %v5189_v10 = vpop.permute.xlu1 %5188 }
 0x18f   : > { %v5198_v11 = vsel %vm5192_vm15, %v5185_v62, %v5187_v3  ;;  %15608 = vmatmul.mubr.msk.f32.vlgmr.msra.gmra.mrb[0].mxu1 %vm281_vm1, %v15606_v61  ;;  %v5199_v15 = vsel %vm5192_vm15, %v5187_v3, %v5189_v10 }
 0x190   : > { %7815 = vrot.lane.b32.xlu0 %v17265_v16, %s16544_s26  ;;  %7811 = vrot.lane.b32.xlu1 %v17268_v17, %s16544_s26 }
 0x191   : > { %5354 = vmatprep.subr.mxu0 %v5198_v11  ;;  %5489 = vmatprep.mubr.f32.mxu1 %v16541_v0 }
 0x192   : > { %5355 = vmatpush1.msra.mxu0 %v5197_v12  ;;  %v5191_v4 = vpop.permute.xlu0 %5190  ;;  %v5509_v5 = vpop.permute.xlu1 %5508 }
 0x193   : > { %v5200_v14 = vsel %vm5192_vm15, %v5189_v10, %v5191_v4  ;;  %15609 = vmatmul.mubr.msk.f32.vlgmr.msra.gmra.mrb[2].mxu0 %vm281_vm1, %v15606_v61  ;;  %vm10748_vm15 = vcmask 474112  }
 0x194   : > { %7817 = vrot.lane.b32.xlu0 %v17278_v22, %s16544_s26  ;;  %7819 = vrot.lane.b32.xlu1 %v17281_v24, %s16544_s26 }
 0x195   : > { %5425 = vmatprep.subr.mxu1 %v5200_v14  ;;  %5608 = vmatprep.mubr.f32.mxu0 %v16541_v0 }
 0x196   : > { %5426 = vmatpush1.msra.mxu1 %v5199_v15  ;;  %v5511_v6 = vpop.permute.xlu0 %5510  ;;  %v5507_v7 = vpop.permute.xlu1 %5506 }
 0x197   : > { %v5525_v9 = vsel %vm5524_vm5, %v5507_v7, %v5509_v5  ;;  %v5526_v19 = vsel %vm5524_vm5, %v5509_v5, %v5511_v6  ;;  %15610 = vmatmul.mubr.msk.f32.vlgmr.msra.gmra.mrb[2].mxu1 %vm281_vm1, %v15606_v61  ;;  %v15621_v61 = vld [vmem:[%s19089_s1 + $0x90] sm:$0xff] }
 0x198   : > { %7821 = vrot.lane.b32.xlu0 %v17292_v31, %s16544_s26  ;;  %7823 = vrot.lane.b32.xlu1 %v17295_v32, %s16544_s26 }
 0x199   : > { %5544 = vmatprep.subr.mxu0 %v5526_v19  ;;  %5679 = vmatprep.mubr.f32.mxu1 %v16541_v0 }
 0x19a   : > { %5545 = vmatpush1.msra.mxu0 %v5525_v9  ;;  %v5513_v21 = vpop.permute.xlu0 %5512  ;;  %v5515_v25 = vpop.permute.xlu1 %5514 }
 0x19b   : > { %v5528_v26 = vsel %vm5524_vm5, %v5513_v21, %v5515_v25  ;;  %v5527_v29 = vsel %vm5524_vm5, %v5511_v6, %v5513_v21  ;;  %15612 = vmatmul.mubr.msk.f32.vlgmr.msra.gmra.mrb[0].mxu0 %vm281_vm1, %v15611_v20  ;;  %v15626_v21 = vld [vmem:[%s19089_s1 + $0x98] sm:$0xff] }
 0x19c   : > { %7825 = vrot.lane.b32.xlu0 %v17309_v41, %s16544_s26  ;;  %7827 = vrot.lane.b32.xlu1 %v17312_v42, %s16544_s26 }
 0x19d   : > { %5615 = vmatprep.subr.mxu1 %v5528_v26  ;;  %5750 = vmatprep.mubr.f32.mxu0 %v16541_v0 }
 0x19e   : > { %5616 = vmatpush1.msra.mxu1 %v5527_v29  ;;  %v5517_v30 = vpop.permute.xlu0 %5516  ;;  %v5519_v35 = vpop.permute.xlu1 %5518 }
 0x19f   : > { %v5530_v36 = vsel %vm5524_vm5, %v5517_v30, %v5519_v35  ;;  %v5529_v37 = vsel %vm5524_vm5, %v5515_v25, %v5517_v30  ;;  %15613 = vmatmul.mubr.msk.f32.vlgmr.msra.gmra.mrb[0].mxu1 %vm281_vm1, %v15611_v20 }
 0x1a0   : > { %8144 = vrot.lane.b32.xlu0 %v17254_v13, %s16545_s27  ;;  %8146 = vrot.lane.b32.xlu1 %v17265_v16, %s16545_s27 }
 0x1a1   : > { %5686 = vmatprep.subr.mxu0 %v5530_v36  ;;  %5821 = vmatprep.mubr.f32.mxu1 %v16541_v0 }
 0x1a2   : > { %5687 = vmatpush1.msra.mxu0 %v5529_v37  ;;  %v5521_v39 = vpop.permute.xlu0 %5520  ;;  %v5523_v40 = vpop.permute.xlu1 %5522 }
 0x1a3   : > { %v5532_v43 = vsel %vm5524_vm5, %v5521_v39, %v5523_v40  ;;  %v5531_v44 = vsel %vm5524_vm5, %v5519_v35, %v5521_v39  ;;  %15614 = vmatmul.mubr.msk.f32.vlgmr.msra.gmra.mrb[2].mxu0 %vm281_vm1, %v15611_v20  ;;  %vm11019_vm5 = vcmask 457728  }
 0x1a4   : > { %8142 = vrot.lane.b32.xlu0 %v17268_v17, %s16545_s27  ;;  %8148 = vrot.lane.b32.xlu1 %v17278_v22, %s16545_s27 }
 0x1a5   : > { %5757 = vmatprep.subr.mxu1 %v5532_v43  ;;  %5940 = vmatprep.mubr.f32.mxu0 %v16541_v0 }
 0x1a6   : > { %5758 = vmatpush1.msra.mxu1 %v5531_v44  ;;  %v5841_v13 = vpop.permute.xlu0 %5840  ;;  %v5843_v16 = vpop.permute.xlu1 %5842 }
 0x1a7   : > { %v5858_v45 = vsel %vm5856_vm6, %v5841_v13, %v5843_v16  ;;  %15615 = vmatmul.mubr.msk.f32.vlgmr.msra.gmra.mrb[2].mxu1 %vm281_vm1, %v15611_v20 }
 0x1a8   : > { %8150 = vrot.lane.b32.xlu0 %v17281_v24, %s16545_s27  ;;  %8152 = vrot.lane.b32.xlu1 %v17292_v31, %s16545_s27 }
 0x1a9   : > { %5876 = vmatprep.subr.mxu0 %v5858_v45  ;;  %6011 = vmatprep.mubr.f32.mxu1 %v16541_v0 }
 0x1aa   : > { %v5839_v17 = vpop.permute.xlu0 %5838  ;;  %v5845_v22 = vpop.permute.xlu1 %5844 }
 0x1ab   : > { %v5857_v47 = vsel %vm5856_vm6, %v5839_v17, %v5841_v13 }
 0x1ac   : > { %8154 = vrot.lane.b32.xlu0 %v17295_v32, %s16545_s27  ;;  %8156 = vrot.lane.b32.xlu1 %v17309_v41, %s16545_s27  ;;  %v5859_v32 = vsel %vm5856_vm6, %v5843_v16, %v5845_v22  ;;  %v15631_v16 = vld [vmem:[%s19089_s1 + $0xa0] sm:$0xff] }
 0x1ad   : > { %5877 = vmatpush1.msra.mxu0 %v5857_v47 }
 0x1ae   : > { %v5847_v24 = vpop.permute.xlu0 %5846  ;;  %v5849_v31 = vpop.permute.xlu1 %5848  ;;  %15617 = vmatmul.mubr.msk.f32.vlgmr.msra.gmra.mrb[0].mxu0 %vm281_vm1, %v15616_v48 }
 0x1af   : > { %v5860_v50 = vsel %vm5856_vm6, %v5845_v22, %v5847_v24  ;;  %6082 = vmatprep.mubr.f32.mxu0 %v16541_v0  ;;  %v5861_v53 = vsel %vm5856_vm6, %v5847_v24, %v5849_v31 }
 0x1b0   : > { %8158 = vrot.lane.b32.xlu0 %v17312_v42, %s16545_s27  ;;  %5947 = vmatprep.subr.mxu1 %v5860_v50 }
 0x1b1   : > { %5948 = vmatpush1.msra.mxu1 %v5859_v32  ;;  %8474 = vperm.xlu1 %16522, %v8471_v49  }
 0x1b2   : > { %v5851_v41 = vpop.permute.xlu0 %5850  ;;  %v5853_v51 = vpop.permute.xlu1 %5852  ;;  %15618 = vmatmul.mubr.msk.f32.vlgmr.msra.gmra.mrb[0].mxu1 %vm281_vm1, %v15616_v48 }
 0x1b3   : > { %v5862_v52 = vsel %vm5856_vm6, %v5849_v31, %v5851_v41  ;;  %6153 = vmatprep.mubr.f32.mxu1 %v16541_v0  ;;  %v5863_v56 = vsel %vm5856_vm6, %v5851_v41, %v5853_v51 }
 0x1b4   : > { %6018 = vmatprep.subr.mxu0 %v5862_v52 }
 0x1b5   : > { %6019 = vmatpush1.msra.mxu0 %v5861_v53 }
 0x1b6   : > { %v5855_v54 = vpop.permute.xlu0 %5854  ;;  %v6173_v55 = vpop.permute.xlu1 %6172  ;;  %15619 = vmatmul.mubr.msk.f32.vlgmr.msra.gmra.mrb[2].mxu0 %vm281_vm1, %v15616_v48 }
 0x1b7   : > { %v5864_v42 = vsel %vm5856_vm6, %v5853_v51, %v5855_v54  ;;  %6272 = vmatprep.mubr.f32.mxu0 %v16541_v0  ;;  %v15641_v54 = vld [vmem:[%s19089_s1 + $0xb0] sm:$0xff] }
 0x1b8   : > { %6089 = vmatprep.subr.mxu1 %v5864_v42 }
 0x1b9   : > { %6090 = vmatpush1.msra.mxu1 %v5863_v56 }
 0x1ba   : > { %v6175_v57 = vpop.permute.xlu0 %6174  ;;  %v6171_v58 = vpop.permute.xlu1 %6170  ;;  %15620 = vmatmul.mubr.msk.f32.vlgmr.msra.gmra.mrb[2].mxu1 %vm281_vm1, %v15616_v48 }
 0x1bb   : > { %v6189_v59 = vsel %vm6188_vm7, %v6171_v58, %v6173_v55  ;;  %v6190_v60 = vsel %vm6188_vm7, %v6173_v55, %v6175_v57  ;;  %6343 = vmatprep.mubr.f32.mxu1 %v16541_v0 }
 0x1bc   : > { %6208 = vmatprep.subr.mxu0 %v6190_v60 }
 0x1bd   : > { %6209 = vmatpush1.msra.mxu0 %v6189_v59 }
 0x1be   : > { %v6177_v1 = vpop.permute.xlu0 %6176  ;;  %v6179_v62 = vpop.permute.xlu1 %6178  ;;  %15622 = vmatmul.mubr.msk.f32.vlgmr.msra.gmra.mrb[0].mxu0 %vm281_vm1, %v15621_v61 }
 0x1bf   : > { %v6192_v63 = vsel %vm6188_vm7, %v6177_v1, %v6179_v62  ;;  %v6191_v2 = vsel %vm6188_vm7, %v6175_v57, %v6177_v1  ;;  %6414 = vmatprep.mubr.f32.mxu0 %v16541_v0 }
 0x1c0   : > { %6279 = vmatprep.subr.mxu1 %v6192_v63 }
 0x1c1   : > { %6280 = vmatpush1.msra.mxu1 %v6191_v2 }
 0x1c2   : > { %v6181_v3 = vpop.permute.xlu0 %6180  ;;  %v6183_v10 = vpop.permute.xlu1 %6182  ;;  %15623 = vmatmul.mubr.msk.f32.vlgmr.msra.gmra.mrb[0].mxu1 %vm281_vm1, %v15621_v61 }
 0x1c3   : > { %v6194_v11 = vsel %vm6188_vm7, %v6181_v3, %v6183_v10  ;;  %v6193_v12 = vsel %vm6188_vm7, %v6179_v62, %v6181_v3  ;;  %6485 = vmatprep.mubr.f32.mxu1 %v16541_v0 }
 0x1c4   : > { %6350 = vmatprep.subr.mxu0 %v6194_v11 }
 0x1c5   : > { %6351 = vmatpush1.msra.mxu0 %v6193_v12 }
 0x1c6   : > { %v6185_v4 = vpop.permute.xlu0 %6184  ;;  %v6187_v5 = vpop.permute.xlu1 %6186  ;;  %15624 = vmatmul.mubr.msk.f32.vlgmr.msra.gmra.mrb[2].mxu0 %vm281_vm1, %v15621_v61 }
 0x1c7   : > { %v6196_v14 = vsel %vm6188_vm7, %v6185_v4, %v6187_v5  ;;  %v6195_v15 = vsel %vm6188_vm7, %v6183_v10, %v6185_v4  ;;  %6604 = vmatprep.mubr.f32.mxu0 %v16541_v0  ;;  %v15646_v5 = vld [vmem:[%s19089_s1 + $0xb8] sm:$0xff] }
 0x1c8   : > { %6421 = vmatprep.subr.mxu1 %v6196_v14 }
 0x1c9   : > { %6422 = vmatpush1.msra.mxu1 %v6195_v15 }
 0x1ca   : > { %v6505_v6 = vpop.permute.xlu0 %6504  ;;  %v6507_v7 = vpop.permute.xlu1 %6506  ;;  %15625 = vmatmul.mubr.msk.f32.vlgmr.msra.gmra.mrb[2].mxu1 %vm281_vm1, %v15621_v61 }
 0x1cb   : > { %v6522_v9 = vsel %vm6520_vm8, %v6505_v6, %v6507_v7  ;;  %6675 = vmatprep.mubr.f32.mxu1 %v16541_v0 }
 0x1cc   : > { %6540 = vmatprep.subr.mxu0 %v6522_v9 }
 0x1ce   : > { %v6503_v19 = vpop.permute.xlu0 %6502  ;;  %v6509_v20 = vpop.permute.xlu1 %6508 }
 0x1cf   : > { %v6521_v25 = vsel %vm6520_vm8, %v6503_v19, %v6505_v6  ;;  %v6523_v35 = vsel %vm6520_vm8, %v6507_v7, %v6509_v20 }
 0x1d0   : > { %6541 = vmatpush1.msra.mxu0 %v6521_v25 }
 0x1d1   : > { %15627 = vmatmul.mubr.msk.f32.vlgmr.msra.gmra.mrb[0].mxu0 %vm281_vm1, %v15626_v21 }
 0x1d2   : > { %v6511_v26 = vpop.permute.xlu0 %6510  ;;  %v6513_v29 = vpop.permute.xlu1 %6512  ;;  %6746 = vmatprep.mubr.f32.mxu0 %v16541_v0 }
 0x1d3   : > { %v6524_v30 = vsel %vm6520_vm8, %v6509_v20, %v6511_v26  ;;  %v6525_v40 = vsel %vm6520_vm8, %v6511_v26, %v6513_v29 }
 0x1d4   : > { %6611 = vmatprep.subr.mxu1 %v6524_v30 }
 0x1d5   : > { %6612 = vmatpush1.msra.mxu1 %v6523_v35 }
 0x1d6   : > { %v6515_v36 = vpop.permute.xlu0 %6514  ;;  %v6517_v37 = vpop.permute.xlu1 %6516  ;;  %15628 = vmatmul.mubr.msk.f32.vlgmr.msra.gmra.mrb[0].mxu1 %vm281_vm1, %v15626_v21 }
 0x1d7   : > { %v6526_v39 = vsel %vm6520_vm8, %v6513_v29, %v6515_v36  ;;  %6817 = vmatprep.mubr.f32.mxu1 %v16541_v0  ;;  %v6527_v45 = vsel %vm6520_vm8, %v6515_v36, %v6517_v37 }
 0x1d8   : > { %6682 = vmatprep.subr.mxu0 %v6526_v39 }
 0x1d9   : > { %6683 = vmatpush1.msra.mxu0 %v6525_v40 }
 0x1da   : > { %v6519_v43 = vpop.permute.xlu0 %6518  ;;  %15629 = vmatmul.mubr.msk.f32.vlgmr.msra.gmra.mrb[2].mxu0 %vm281_vm1, %v15626_v21  ;;  %v7152_v44 = vpop.permute.xlu1 %7151  ;;  %6837 = vmatprep.subr.mxu0 %v17130_v8 }
 0x1db   : > { %v6528_v13 = vsel %vm6520_vm8, %v6517_v37, %v6519_v43  ;;  %6838 = vmatpush1.msra.mxu0 %v17125_v18  ;;  %6901 = vmatprep.mubr.f32.mxu0 %v16541_v0  ;;  %v15651_v43 = vld [vmem:[%s19089_s1 + $0xc0] sm:$0xff] }
 0x1dc   : > { %6753 = vmatprep.subr.mxu1 %v6528_v13  ;;  %6979 = vmatprep.subr.mxu0 %v17167_v33 }
 0x1dd   : > { %6754 = vmatpush1.msra.mxu1 %v6527_v45 }
 0x1de   : > { %v7154_v46 = vpop.permute.xlu0 %7153  ;;  %15630 = vmatmul.mubr.msk.f32.vlgmr.msra.gmra.mrb[2].mxu1 %vm281_vm1, %v15626_v21  ;;  %15632 = vmatmul.mubr.msk.f32.vlgmr.msra.gmra.mrb[0].mxu0 %vm281_vm1, %v15631_v16  ;;  %v7150_v8 = vpop.permute.xlu1 %7149 }
 0x1df   : > { %6980 = vmatpush1.msra.mxu0 %v17157_v28  ;;  %6908 = vmatprep.subr.mxu1 %v17152_v27  ;;  %v7168_v18 = vsel %vm264_vm0, %v7152_v44, %v7154_v46  ;;  %v7167_v33 = vsel %vm264_vm0, %v7150_v8, %v7152_v44 }
 0x1e0   : > { %7186 = vmatprep.subr.mxu0 %v7168_v18  ;;  %6909 = vmatpush1.msra.mxu1 %v17144_v23  ;;  %v15636_v23 = vld [vmem:[%s19089_s1 + $0xa8] sm:$0xff] }
 0x1e1   : > { %6972 = vmatprep.mubr.f32.mxu1 %v16541_v0  ;;  %7043 = vmatprep.mubr.f32.mxu0 %v16541_v0 }
 0x1e2   : > { %v7156_v17 = vpop.permute.xlu0 %7155  ;;  %15633 = vmatmul.mubr.msk.f32.vlgmr.msra.gmra.mrb[0].mxu1 %vm281_vm1, %v15631_v16  ;;  %15634 = vmatmul.mubr.msk.f32.vlgmr.msra.gmra.mrb[2].mxu0 %vm281_vm1, %v15631_v16  ;;  %v7158_v22 = vpop.permute.xlu1 %7157 }
 0x1e3   : > { %7050 = vmatprep.subr.mxu1 %v17180_v38  ;;  %7187 = vmatpush1.msra.mxu0 %v7167_v33  ;;  %v7170_v27 = vsel %vm264_vm0, %v7156_v17, %v7158_v22  ;;  %v7169_v47 = vsel %vm264_vm0, %v7154_v46, %v7156_v17 }
 0x1e4   : > { %7051 = vmatpush1.msra.mxu1 %v17172_v34  ;;  %7114 = vmatprep.mubr.f32.mxu1 %v16541_v0 }
 0x1e5   : > { %7257 = vmatprep.subr.mxu1 %v7170_v27  ;;  %7250 = vmatprep.mubr.f32.mxu0 %v16541_v0 }
 0x1e6   : > { %v7160_v28 = vpop.permute.xlu0 %7159  ;;  %15635 = vmatmul.mubr.msk.f32.vlgmr.msra.gmra.mrb[2].mxu1 %vm281_vm1, %v15631_v16  ;;  %v7162_v38 = vpop.permute.xlu1 %7161  ;;  %15637 = vmatmul.mubr.msk.f32.vlgmr.msra.gmra.mrb[0].mxu0 %vm281_vm1, %v15636_v23 }
 0x1e7   : > { %7258 = vmatpush1.msra.mxu1 %v7169_v47  ;;  %v7172_v48 = vsel %vm264_vm0, %v7160_v28, %v7162_v38  ;;  %v7171_v24 = vsel %vm264_vm0, %v7158_v22, %v7160_v28  ;;  %7321 = vmatprep.mubr.f32.mxu1 %v16541_v0 }
 0x1e8   : > { %7328 = vmatprep.subr.mxu0 %v7172_v48  ;;  %7392 = vmatprep.mubr.f32.mxu0 %v16541_v0 }
 0x1e9   : > { %7329 = vmatpush1.msra.mxu0 %v7171_v24 }
 0x1ea   : > { %v7164_v34 = vpop.permute.xlu0 %7163  ;;  %v7166_v31 = vpop.permute.xlu1 %7165  ;;  %15638 = vmatmul.mubr.msk.f32.vlgmr.msra.gmra.mrb[0].mxu1 %vm281_vm1, %v15636_v23  ;;  %15639 = vmatmul.mubr.msk.f32.vlgmr.msra.gmra.mrb[2].mxu0 %vm281_vm1, %v15636_v23 }
 0x1eb   : > { %v7174_v49 = vsel %vm264_vm0, %v7164_v34, %v7166_v31  ;;  %v7173_v50 = vsel %vm264_vm0, %v7162_v38, %v7164_v34  ;;  %7463 = vmatprep.mubr.f32.mxu1 %v16541_v0  ;;  %7581 = vmatprep.mubr.f32.mxu0 %v16541_v0 }
 0x1ec   : > { %7399 = vmatprep.subr.mxu1 %v7174_v49 }
 0x1ed   : > { %7400 = vmatpush1.msra.mxu1 %v7173_v50 }
 0x1ee   : > { %v7483_v32 = vpop.permute.xlu0 %7482  ;;  %v7485_v41 = vpop.permute.xlu1 %7484  ;;  %15640 = vmatmul.mubr.msk.f32.vlgmr.msra.gmra.mrb[2].mxu1 %vm281_vm1, %v15636_v23 }
 0x1ef   : > { %v7499_v51 = vsel %vm876_vm2, %v7483_v32, %v7485_v41  ;;  %7652 = vmatprep.mubr.f32.mxu1 %v16541_v0 }
 0x1f0   : > { %7517 = vmatprep.subr.mxu0 %v7499_v51 }
 0x1f2   : > { %v7481_v52 = vpop.permute.xlu0 %7480  ;;  %v7487_v53 = vpop.permute.xlu1 %7486 }
 0x1f3   : > { %v7498_v55 = vsel %vm876_vm2, %v7481_v52, %v7483_v32  ;;  %v7500_v58 = vsel %vm876_vm2, %v7485_v41, %v7487_v53 }
 0x1f4   : > { %7518 = vmatpush1.msra.mxu0 %v7498_v55 }
 0x1f5   : > { %15642 = vmatmul.mubr.msk.f32.vlgmr.msra.gmra.mrb[0].mxu0 %vm281_vm1, %v15641_v54 }
 0x1f6   : > { %v7489_v42 = vpop.permute.xlu0 %7488  ;;  %v7491_v56 = vpop.permute.xlu1 %7490  ;;  %7723 = vmatprep.mubr.f32.mxu0 %v16541_v0 }
 0x1f7   : > { %v7501_v57 = vsel %vm876_vm2, %v7487_v53, %v7489_v42  ;;  %v7502_v1 = vsel %vm876_vm2, %v7489_v42, %v7491_v56 }
 0x1f8   : > { %7588 = vmatprep.subr.mxu1 %v7501_v57 }
 0x1f9   : > { %7589 = vmatpush1.msra.mxu1 %v7500_v58 }
 0x1fa   : > { %v7493_v59 = vpop.permute.xlu0 %7492  ;;  %v7495_v60 = vpop.permute.xlu1 %7494  ;;  %15643 = vmatmul.mubr.msk.f32.vlgmr.msra.gmra.mrb[0].mxu1 %vm281_vm1, %v15641_v54 }
 0x1fb   : > { %v7503_v61 = vsel %vm876_vm2, %v7491_v56, %v7493_v59  ;;  %7794 = vmatprep.mubr.f32.mxu1 %v16541_v0  ;;  %v7504_v3 = vsel %vm876_vm2, %v7493_v59, %v7495_v60 }
 0x1fc   : > { %7659 = vmatprep.subr.mxu0 %v7503_v61 }
 0x1fd   : > { %7660 = vmatpush1.msra.mxu0 %v7502_v1 }
 0x1fe   : > { %v7497_v62 = vpop.permute.xlu0 %7496  ;;  %v7814_v63 = vpop.permute.xlu1 %7813  ;;  %15644 = vmatmul.mubr.msk.f32.vlgmr.msra.gmra.mrb[2].mxu0 %vm281_vm1, %v15641_v54 }
 0x1ff   : > { %v7505_v2 = vsel %vm876_vm2, %v7495_v60, %v7497_v62  ;;  %7912 = vmatprep.mubr.f32.mxu0 %v16541_v0 }
 0x200   : > { %7730 = vmatprep.subr.mxu1 %v7505_v2 }
 0x201   : > { %7731 = vmatpush1.msra.mxu1 %v7504_v3 }
 0x202   : > { %v7816_v10 = vpop.permute.xlu0 %7815  ;;  %v7812_v11 = vpop.permute.xlu1 %7811  ;;  %15645 = vmatmul.mubr.msk.f32.vlgmr.msra.gmra.mrb[2].mxu1 %vm281_vm1, %v15641_v54 }
 0x203   : > { %v7829_v12 = vsel %vm1208_vm3, %v7812_v11, %v7814_v63  ;;  %v7830_v4 = vsel %vm1208_vm3, %v7814_v63, %v7816_v10  ;;  %7983 = vmatprep.mubr.f32.mxu1 %v16541_v0 }
 0x204   : > { %7848 = vmatprep.subr.mxu0 %v7830_v4 }
 0x205   : > { %7849 = vmatpush1.msra.mxu0 %v7829_v12 }
 0x206   : > { %v7818_v14 = vpop.permute.xlu0 %7817  ;;  %v7820_v15 = vpop.permute.xlu1 %7819  ;;  %15647 = vmatmul.mubr.msk.f32.vlgmr.msra.gmra.mrb[0].mxu0 %vm281_vm1, %v15646_v5 }
 0x207   : > { %v7832_v6 = vsel %vm1208_vm3, %v7818_v14, %v7820_v15  ;;  %v7831_v7 = vsel %vm1208_vm3, %v7816_v10, %v7818_v14  ;;  %8054 = vmatprep.mubr.f32.mxu0 %v16541_v0 }
 0x208   : > { %7919 = vmatprep.subr.mxu1 %v7832_v6  ;;  %v8509_v6 = vlaneseq }
 0x209   : > { %7920 = vmatpush1.msra.mxu1 %v7831_v7 }
 0x20a   : > { %v7822_v9 = vpop.permute.xlu0 %7821  ;;  %v7824_v19 = vpop.permute.xlu1 %7823  ;;  %15648 = vmatmul.mubr.msk.f32.vlgmr.msra.gmra.mrb[0].mxu1 %vm281_vm1, %v15646_v5 }
 0x20b   : > { %v7834_v20 = vsel %vm1208_vm3, %v7822_v9, %v7824_v19  ;;  %v7833_v21 = vsel %vm1208_vm3, %v7820_v15, %v7822_v9  ;;  %8125 = vmatprep.mubr.f32.mxu1 %v16541_v0 }
 0x20c   : > { %7990 = vmatprep.subr.mxu0 %v7834_v20 }
 0x20d   : > { %7991 = vmatpush1.msra.mxu0 %v7833_v21 }
 0x20e   : > { %v7826_v25 = vpop.permute.xlu0 %7825  ;;  %v7828_v26 = vpop.permute.xlu1 %7827  ;;  %15649 = vmatmul.mubr.msk.f32.vlgmr.msra.gmra.mrb[2].mxu0 %vm281_vm1, %v15646_v5 }
 0x20f   : > { %v7836_v29 = vsel %vm1208_vm3, %v7826_v25, %v7828_v26  ;;  %v7835_v30 = vsel %vm1208_vm3, %v7824_v19, %v7826_v25  ;;  %8243 = vmatprep.mubr.f32.mxu0 %v16541_v0  ;;  %v17642_v19 = vand.u32 127, %v8509_v6  ;;  %v15657_v6 = vld [vmem:[%s19091_s3 + $0x18] sm:$0xff] }
 0x210   : > { %8061 = vmatprep.subr.mxu1 %v7836_v29 }
 0x211   : > { %8062 = vmatpush1.msra.mxu1 %v7835_v30  ;;  %vm8511_vm0 = vcmp.lt.s32.totalorder %v17642_v19, 127  ;;  %vm8569_vm3 = vcmp.lt.s32.totalorder %v17642_v19, 95  ;;  %vm8544_vm9 = vcmp.lt.s32.totalorder %v17642_v19, 96 }
 0x212   : > { %v8145_v35 = vpop.permute.xlu0 %8144  ;;  %v8147_v36 = vpop.permute.xlu1 %8146  ;;  %15650 = vmatmul.mubr.msk.f32.vlgmr.msra.gmra.mrb[2].mxu1 %vm281_vm1, %v15646_v5 }
 0x213   : > { %v8161_v37 = vsel %vm1540_vm4, %v8145_v35, %v8147_v36  ;;  %8314 = vmatprep.mubr.f32.mxu1 %v16541_v0 }
 0x214   : > { %8179 = vmatprep.subr.mxu0 %v8161_v37 }
 0x216   : > { %v8143_v39 = vpop.permute.xlu0 %8142  ;;  %v8149_v40 = vpop.permute.xlu1 %8148 }
 0x217   : > { %v8160_v44 = vsel %vm1540_vm4, %v8143_v39, %v8145_v35  ;;  %v8162_v46 = vsel %vm1540_vm4, %v8147_v36, %v8149_v40 }
 0x218   : > { %8180 = vmatpush1.msra.mxu0 %v8160_v44 }
 0x219   : > { %15652 = vmatmul.mubr.msk.f32.vlgmr.msra.gmra.mrb[0].mxu0 %vm281_vm1, %v15651_v43 }
 0x21a   : > { %v8151_v13 = vpop.permute.xlu0 %8150  ;;  %8385 = vmatprep.mubr.f32.mxu0 %v16541_v0  ;;  %v8153_v16 = vpop.permute.xlu1 %8152 }
 0x21b   : > { %v8163_v45 = vsel %vm1540_vm4, %v8149_v40, %v8151_v13  ;;  %v8164_v33 = vsel %vm1540_vm4, %v8151_v13, %v8153_v16 }
 0x21c   : > { %8250 = vmatprep.subr.mxu1 %v8163_v45  ;;  %v17665_v45 = vld [vmem:[%s19091_s3 + $0x10] sm:$0xff] }
 0x21d   : > { %8251 = vmatpush1.msra.mxu1 %v8162_v46 }
 0x21e   : > { %v8155_v8 = vpop.permute.xlu0 %8154  ;;  %15653 = vmatmul.mubr.msk.f32.vlgmr.msra.gmra.mrb[0].mxu1 %vm281_vm1, %v15651_v43  ;;  %v8157_v17 = vpop.permute.xlu1 %8156 }
 0x21f   : > { %v8165_v18 = vsel %vm1540_vm4, %v8153_v16, %v8155_v8  ;;  %8456 = vmatprep.mubr.f32.mxu1 %v16541_v0  ;;  %v8166_v23 = vsel %vm1540_vm4, %v8155_v8, %v8157_v17 }
 0x220   : > { %8321 = vmatprep.subr.mxu0 %v8165_v18 }
 0x221   : > { %8322 = vmatpush1.msra.mxu0 %v8164_v33 }
 0x222   : > { %v8159_v22 = vpop.permute.xlu0 %8158  ;;  %15654 = vmatmul.mubr.msk.f32.vlgmr.msra.gmra.mrb[2].mxu0 %vm281_vm1, %v15651_v43 }
 0x223   : > { %v8167_v27 = vsel %vm1540_vm4, %v8157_v17, %v8159_v22  ;;  %15933 = vmatprep.mubr.msk.f32.mxu0 %vm281_vm1, %v17665_v45 }
 0x224   : > { %8392 = vmatprep.subr.mxu1 %v8167_v27 }
 0x225   : > { %8393 = vmatpush1.msra.mxu1 %v8166_v23 }
 0x226   : > { %15655 = vmatmul.mubr.msk.f32.vlgmr.msra.gmra.mrb[2].mxu1 %vm281_vm1, %v15651_v43 }
 0x227   : > { %8711 = vmatprep.mubr.f32.mxu1 %v16541_v0 }
 0x230   : > { %v17579_v24 = vpop.permute.xlu1 %8474 }
 0x2ec   : > { %v8245_v28 = vpop.f32.mrb[0].mxu0 }
 0x2ed   : > { %v8247_v47 = vpop.f32.mrb[1].mxu0  ;;  %v8477_v60 = vadd.f32 %v17579_v24, %v8245_v28 }
 0x2ee   : > { %v8478_v55 = vadd.f32 %v17579_v24, %v8247_v47 }
 0x2ef   : > { %v17628_v61 = vmax.f32 %v8477_v60, 0.0 }
 0x2f0   : > { %v8486_v42 = vmax.f32 %v8478_v55, 0.0 }
 0x2f1   : > { %v8316_v38 = vpop.f32.mrb[0].mxu1 }
 0x2f2   : > { %v8318_v48 = vpop.f32.mrb[1].mxu1  ;;  %v8479_v56 = vadd.f32 %v17579_v24, %v8316_v38 }
 0x2f3   : > { %v8480_v57 = vadd.f32 %v17579_v24, %v8318_v48 }
 0x2f4   : > { %v8487_v58 = vmax.f32 %v8479_v56, 0.0 }
 0x2f5   : > { %v8387_v34 = vpop.f32.mrb[2].mxu0  ;;  %v17614_v59 = vmax.f32 %v8480_v57, 0.0 }
 0x2f6   : > { %v8481_v31 = vadd.f32 %v17579_v24, %v8387_v34  ;;  %v8389_v49 = vpop.f32.mrb[3].mxu0 }
 0x2f7   : > { %v8482_v52 = vadd.f32 %v17579_v24, %v8389_v49 }
 0x2f8   : > { %v17582_v50 = vmax.f32 %v8481_v31, 0.0 }
 0x2f9   : > { %v8458_v32 = vpop.f32.mrb[2].mxu1  ;;  %v17598_v54 = vmax.f32 %v8482_v52, 0.0 }
 0x2fa   : > { %v8483_v41 = vadd.f32 %v17579_v24, %v8458_v32  ;;  %v17585_v51 = vpop.f32.mrb[3].mxu1  ;;  %8536 = vrot.lane.b32.xlu1 %v17582_v50, %s16546_s28  ;;  %8501 = vrot.lane.b32.xlu0 %v17582_v50, %s16542_s24 }
 0x2fc   : > { %v17592_v53 = vmax.f32 %v8483_v41, 0.0 }
 0x2fe   : > { %8540 = vrot.lane.b32.xlu1 %v17592_v53, %s16546_s28  ;;  %8505 = vrot.lane.b32.xlu0 %v17592_v53, %s16542_s24 }
 0x302   : > { %8503 = vrot.lane.b32.xlu1 %v17598_v54, %s16542_s24  ;;  %8561 = vrot.lane.b32.xlu0 %v17582_v50, %s16547_s29 }
 0x306   : > { %8563 = vrot.lane.b32.xlu1 %v17598_v54, %s16547_s29  ;;  %8538 = vrot.lane.b32.xlu0 %v17598_v54, %s16546_s28 }
 0x30a   : > { %8565 = vrot.lane.b32.xlu0 %v17592_v53, %s16547_s29  ;;  %8495 = vrot.lane.b32.xlu1 %v8486_v42, %s16542_s24 }
 0x30e   : > { %8497 = vrot.lane.b32.xlu0 %v8487_v58, %s16542_s24  ;;  %8499 = vrot.lane.b32.xlu1 %v17614_v59, %s16542_s24 }
 0x312   : > { %8530 = vrot.lane.b32.xlu0 %v8486_v42, %s16546_s28  ;;  %8532 = vrot.lane.b32.xlu1 %v8487_v58, %s16546_s28 }
 0x316   : > { %8534 = vrot.lane.b32.xlu0 %v17614_v59, %s16546_s28  ;;  %8555 = vrot.lane.b32.xlu1 %v8486_v42, %s16547_s29 }
 0x31a   : > { %8557 = vrot.lane.b32.xlu0 %v8487_v58, %s16547_s29  ;;  %8559 = vrot.lane.b32.xlu1 %v17614_v59, %s16547_s29 }
 0x31e   : > { %8528 = vrot.lane.b32.xlu1 %v17628_v61, %s16546_s28  ;;  %8493 = vrot.lane.b32.xlu0 %v17628_v61, %s16542_s24 }
 0x322   : > { %8553 = vrot.lane.b32.xlu0 %v17628_v61, %s16547_s29 }
 0x36c   : > { %v8537_v1 = vpop.permute.xlu1 %8536  ;;  %v8502_v62 = vpop.permute.xlu0 %8501 }
 0x370   : > { %v17636_v63 = vpop.permute.xlu1 %8540  ;;  %v17638_v2 = vpop.permute.xlu0 %8505 }
 0x374   : > { %v8504_v3 = vpop.permute.xlu1 %8503  ;;  %v8562_v10 = vpop.permute.xlu0 %8561 }
 0x375   : > { %v8513_v46 = vsel %vm8511_vm0, %v8504_v3, %v17638_v2  ;;  %v8514_v57 = vsel %vm8511_vm0, %v8502_v62, %v8504_v3 }
 0x376   : > { %v8525_v23 = vmax.f32 %v17598_v54, %v8513_v46 }
 0x378   : > { %v8564_v11 = vpop.permute.xlu1 %8563  ;;  %v8539_v12 = vpop.permute.xlu0 %8538 }
 0x379   : > { %v8546_v8 = vsel %vm8544_vm9, %v8539_v12, %v17636_v63  ;;  %v8572_v32 = vsel %vm8569_vm3, %v8562_v10, %v8564_v11  ;;  %v8547_v41 = vsel %vm8544_vm9, %v8537_v1, %v8539_v12 }
 0x37c   : > { %v17640_v4 = vpop.permute.xlu0 %8565  ;;  %v8496_v5 = vpop.permute.xlu1 %8495 }
 0x37d   : > { %v8571_v29 = vsel %vm8569_vm3, %v8564_v11, %v17640_v4 }
 0x37e   : > { %v8583_v18 = vmax.f32 %v8546_v8, %v8571_v29 }
 0x380   : > { %v8498_v14 = vpop.permute.xlu0 %8497  ;;  %v8500_v15 = vpop.permute.xlu1 %8499  ;;  %v17697_v34 = vmax.f32 %v8525_v23, %v8583_v18  ;;  %v17937_v18 = vld [vmem:[%s19091_s3 + $0x30] sm:$0xff] }
 0x381   : > { %v8517_v25 = vsel %vm8511_vm0, %v8496_v5, %v8498_v14  ;;  %v8516_v26 = vsel %vm8511_vm0, %v8498_v14, %v8500_v15  ;;  %v8515_v47 = vsel %vm8511_vm0, %v8500_v15, %v8502_v62 }
 0x382   : > { %v8521_v43 = vmax.f32 %v8486_v42, %v8517_v25  ;;  %v8522_v44 = vmax.f32 %v8487_v58, %v8516_v26  ;;  %v8523_v55 = vmax.f32 %v17614_v59, %v8515_v47  ;;  %v8582_v58 = vmax.f32 %v8547_v41, %v8572_v32  ;;  %v8607_v26 = vld [vmem:[%s19091_s3] sm:$0xff] }
 0x383   : > { %v8484_v59 = vadd.f32 %v17579_v24, %v17585_v51 }
 0x384   : > { %v8531_v7 = vpop.permute.xlu0 %8530  ;;  %v8533_v9 = vpop.permute.xlu1 %8532 }
 0x385   : > { %v8550_v36 = vsel %vm8544_vm9, %v8531_v7, %v8533_v9  ;;  %v17734_v62 = vmax.f32 %v8484_v59, 0.0 }
 0x388   : > { %v8535_v20 = vpop.permute.xlu0 %8534  ;;  %v8556_v21 = vpop.permute.xlu1 %8555 }
 0x389   : > { %v8549_v37 = vsel %vm8544_vm9, %v8533_v9, %v8535_v20  ;;  %v8548_v38 = vsel %vm8544_vm9, %v8535_v20, %v8537_v1 }
 0x38c   : > { %v8558_v30 = vpop.permute.xlu0 %8557  ;;  %v8560_v35 = vpop.permute.xlu1 %8559 }
 0x38d   : > { %v8575_v39 = vsel %vm8569_vm3, %v8556_v21, %v8558_v30  ;;  %v8574_v40 = vsel %vm8569_vm3, %v8558_v30, %v8560_v35  ;;  %v8573_v27 = vsel %vm8569_vm3, %v8560_v35, %v8562_v10  ;;  %v8524_v10 = vmax.f32 %v17582_v50, %v8514_v57  ;;  %v8608_v35 = vld [vmem:[%s19091_s3 + $0x8] sm:$0xff] }
 0x38e   : > { %v8579_v13 = vmax.f32 %v8550_v36, %v8575_v39  ;;  %v8580_v16 = vmax.f32 %v8549_v37, %v8574_v40  ;;  %v8581_v31 = vmax.f32 %v8548_v38, %v8573_v27  ;;  %v17897_v40 = vld [vmem:[%s19091_s3 + $0x20] sm:$0xff] }
 0x390   : > { %v17675_v33 = vmax.f32 %v8521_v43, %v8579_v13  ;;  %v17677_v17 = vmax.f32 %v8522_v44, %v8580_v16  ;;  %v17679_v22 = vpop.permute.xlu0 %8493  ;;  %v17684_v28 = vpop.permute.xlu1 %8528  ;;  %v17717_v60 = vmax.f32 %v8523_v55, %v8581_v31  ;;  %v17969_v31 = vld [vmem:[%s19091_s3 + $0x40] sm:$0xff] }
 0x391   : > { %v8518_v48 = vsel %vm8511_vm0, %v17679_v22, %v8496_v5  ;;  %v8551_v52 = vsel %vm8544_vm9, %v17684_v28, %v8531_v7 }
 0x392   : > { %8621 = vrot.lane.b32.xlu1 %v17675_v33, %s16543_s25  ;;  %8623 = vrot.lane.b32.xlu0 %v17677_v17, %s16543_s25  ;;  %v8520_v42 = vmax.f32 %v17628_v61, %v8518_v48  ;;  %v17728_v61 = vmax.f32 %v8524_v10, %v8582_v58  ;;  %v17962_v48 = vld [vmem:[%s19091_s3 + $0x38] sm:$0xff]  ;;  %v18001_v58 = vld [vmem:[%s19091_s3 + $0x50] sm:$0xff] }
 0x394   : > { %v17699_v49 = vpop.permute.xlu0 %8553 }
 0x395   : > { %v8576_v54 = vsel %vm8569_vm3, %v17699_v49, %v8556_v21 }
 0x396   : > { %v8578_v56 = vmax.f32 %v8551_v52, %v8576_v54  ;;  %8629 = vrot.lane.b32.xlu0 %v17697_v34, %s16543_s25 }
 0x398   : > { %v17719_v1 = vmax.f32 %v8520_v42, %v8578_v56  ;;  %v17994_v42 = vld [vmem:[%s19091_s3 + $0x48] sm:$0xff] }
 0x39a   : > { %8625 = vrot.lane.b32.xlu0 %v17717_v60, %s16543_s25  ;;  %8619 = vrot.lane.b32.xlu1 %v17719_v1, %s16543_s25 }
 0x39e   : > { %10200 = vrot.lane.b32.xlu0 %v17677_v17, %s16553_s7  ;;  %8627 = vrot.lane.b32.xlu1 %v17728_v61, %s16543_s25 }
 0x3a2   : > { %8507 = vrot.lane.b32.xlu0 %v17734_v62, %s16542_s24  ;;  %10198 = vrot.lane.b32.xlu1 %v17675_v33, %s16553_s7  ;;  %s16563_s24 = smov 120  }
 0x3a6   : > { %9124 = vrot.lane.b32.xlu0 %v17697_v34, %s16545_s27  ;;  %10196 = vrot.lane.b32.xlu1 %v17719_v1, %s16553_s7 }
 0x3aa   : > { %8567 = vrot.lane.b32.xlu0 %v17734_v62, %s16547_s29  ;;  %8542 = vrot.lane.b32.xlu1 %v17734_v62, %s16546_s28  ;;  %s16564_s28 = smov 58   ;;  %s16565_s29 = smov 56  }
 0x3ae   : > { %9394 = vrot.lane.b32.xlu0 %v17697_v34, %s16562_s21  ;;  %9122 = vrot.lane.b32.xlu1 %v17728_v61, %s16545_s27 }
 0x3b2   : > { %9118 = vrot.lane.b32.xlu0 %v17677_v17, %s16545_s27  ;;  %9116 = vrot.lane.b32.xlu1 %v17675_v33, %s16545_s27 }
 0x3b6   : > { %9665 = vrot.lane.b32.xlu0 %v17697_v34, %s16563_s24  ;;  %9392 = vrot.lane.b32.xlu1 %v17728_v61, %s16562_s21 }
 0x3ba   : > { %10470 = vrot.lane.b32.xlu0 %v17677_v17, %s16555_s13  ;;  %10468 = vrot.lane.b32.xlu1 %v17675_v33, %s16555_s13 }
 0x3be   : > { %9936 = vrot.lane.b32.xlu0 %v17697_v34, %s16551_s16  ;;  %9663 = vrot.lane.b32.xlu1 %v17728_v61, %s16563_s24 }
 0x3c2   : > { %10466 = vrot.lane.b32.xlu0 %v17719_v1, %s16555_s13  ;;  %9114 = vrot.lane.b32.xlu1 %v17719_v1, %s16545_s27 }
 0x3c6   : > { %10738 = vrot.lane.b32.xlu0 %v17675_v33, %s16564_s28  ;;  %9934 = vrot.lane.b32.xlu1 %v17728_v61, %s16551_s16 }
 0x3ca   : > { %10206 = vrot.lane.b32.xlu0 %v17697_v34, %s16553_s7  ;;  %9120 = vrot.lane.b32.xlu1 %v17717_v60, %s16545_s27 }
 0x3ce   : > { %10736 = vrot.lane.b32.xlu0 %v17719_v1, %s16564_s28  ;;  %10740 = vrot.lane.b32.xlu1 %v17677_v17, %s16564_s28 }
 0x3d2   : > { %9388 = vrot.lane.b32.xlu0 %v17677_v17, %s16562_s21  ;;  %10204 = vrot.lane.b32.xlu1 %v17728_v61, %s16553_s7 }
 0x3d6   : > { %10474 = vrot.lane.b32.xlu0 %v17728_v61, %s16555_s13  ;;  %9386 = vrot.lane.b32.xlu1 %v17675_v33, %s16562_s21 }
 0x3da   : > { %9390 = vrot.lane.b32.xlu0 %v17717_v60, %s16562_s21  ;;  %9384 = vrot.lane.b32.xlu1 %v17719_v1, %s16562_s21 }
 0x3de   : > { %11011 = vrot.lane.b32.xlu0 %v17677_v17, %s16565_s29  ;;  %10476 = vrot.lane.b32.xlu1 %v17697_v34, %s16555_s13 }
 0x3e2   : > { %10744 = vrot.lane.b32.xlu0 %v17728_v61, %s16564_s28  ;;  %11009 = vrot.lane.b32.xlu1 %v17675_v33, %s16565_s29 }
 0x3e6   : > { %9657 = vrot.lane.b32.xlu0 %v17675_v33, %s16563_s24  ;;  %11007 = vrot.lane.b32.xlu1 %v17719_v1, %s16565_s29 }
 0x3ea   : > { %9655 = vrot.lane.b32.xlu0 %v17719_v1, %s16563_s24  ;;  %10746 = vrot.lane.b32.xlu1 %v17697_v34, %s16564_s28 }
 0x3ee   : > { %11015 = vrot.lane.b32.xlu0 %v17728_v61, %s16565_s29  ;;  %9659 = vrot.lane.b32.xlu1 %v17677_v17, %s16563_s24 }
 0x3f2   : > { %9928 = vrot.lane.b32.xlu0 %v17675_v33, %s16551_s16  ;;  %9661 = vrot.lane.b32.xlu1 %v17717_v60, %s16563_s24 }
 0x3f6   : > { %11540 = vrot.lane.b32.xlu0 %v17677_v17, %s16543_s25  ;;  %11017 = vrot.lane.b32.xlu1 %v17697_v34, %s16565_s29 }
 0x3fa   : > { %9926 = vrot.lane.b32.xlu0 %v17719_v1, %s16551_s16  ;;  %9930 = vrot.lane.b32.xlu1 %v17677_v17, %s16551_s16 }
 0x3fe   : > { %9932 = vrot.lane.b32.xlu0 %v17717_v60, %s16551_s16  ;;  %11542 = vrot.lane.b32.xlu1 %v17717_v60, %s16543_s25 }
 0x402   : > { %11812 = vrot.lane.b32.xlu0 %v17717_v60, %s16545_s27  ;;  %11538 = vrot.lane.b32.xlu1 %v17675_v33, %s16543_s25 }
 0x404   : > { %v8622_v24 = vpop.permute.xlu1 %8621  ;;  %v8624_v50 = vpop.permute.xlu0 %8623 }
 0x405   : > { %v8632_v51 = vsel %vm876_vm2, %v8622_v24, %v8624_v50 }
 0x406   : > { %11810 = vrot.lane.b32.xlu1 %v17677_v17, %s16545_s27  ;;  %8647 = vmatprep.subr.mxu1 %v8632_v51 }
 0x408   : > { %v8630_v3 = vpop.permute.xlu0 %8629 }
 0x40a   : > { %11808 = vrot.lane.b32.xlu1 %v17675_v33, %s16545_s27 }
 0x40c   : > { %v8620_v11 = vpop.permute.xlu1 %8619  ;;  %v8626_v12 = vpop.permute.xlu0 %8625 }
 0x40d   : > { %v8631_v5 = vsel %vm876_vm2, %v8620_v11, %v8622_v24  ;;  %v8633_v20 = vsel %vm876_vm2, %v8624_v50, %v8626_v12  ;;  %v18026_v50 = vld [vmem:[%s19091_s3 + $0x58] sm:$0xff] }
 0x40e   : > { %11546 = vrot.lane.b32.xlu1 %v17697_v34, %s16543_s25  ;;  %8648 = vmatpush1.msra.mxu1 %v8631_v5 }
 0x40f   : > { %15658 = vmatmul.mubr.msk.f32.vlgmr.msra.gmra.mrb[4].mxu1 %vm281_vm1, %v17665_v45 }
 0x410   : > { %v8628_v14 = vpop.permute.xlu1 %8627  ;;  %v17846_v15 = vpop.permute.xlu0 %10200  ;;  %8717 = vmatprep.mubr.f32.mxu1 %v16541_v0 }
 0x411   : > { %v8634_v7 = vsel %vm876_vm2, %v8626_v12, %v8628_v14  ;;  %v8635_v9 = vsel %vm876_vm2, %v8628_v14, %v8630_v3 }
 0x412   : > { %10472 = vrot.lane.b32.xlu1 %v17717_v60, %s16555_s13  ;;  %8724 = vmatprep.subr.mxu1 %v8634_v7 }
 0x413   : > { %15931 = vmatprep.subr.mxu0 %v8635_v9  ;;  %15659 = vmatmul.mubr.msk.f32.gmra.mrb[6].mxu1 %vm281_vm1, %v15657_v6 }
 0x414   : > { %8725 = vmatpush1.msra.mxu1 %v8633_v20  ;;  %15932 = vmatpush3.msra.mxu0 %v8635_v9  ;;  %v17858_v21 = vpop.permute.xlu1 %10198  ;;  %v17860_v25 = vpop.permute.xlu0 %8507  ;;  %v18067_v20 = vld [vmem:[%s19091_s3 + $0x68] sm:$0xff] }
 0x415   : > { %15934 = vmatmul.mubr.msk.f32.vlgmr.msra.gmra.mrb[4].mxu0 %vm281_vm1, %v15657_v6  ;;  %8882 = vmatprep.subr.mxu1 %v17675_v33  ;;  %v8512_v36 = vsel %vm8511_vm0, %v17638_v2, %v17860_v25  ;;  %v10209_v51 = vsel %vm4196_vm12, %v17858_v21, %v17846_v15 }
 0x416   : > { %15936 = vmatprep.subr.mxu0 %v17728_v61  ;;  %12082 = vrot.lane.b32.xlu1 %v17717_v60, %s16562_s21  ;;  %v8526_v44 = vmax.f32 %v17592_v53, %v8512_v36 }
 0x417   : > { %15937 = vmatpush3.msra.mxu0 %v17728_v61  ;;  %8788 = vmatprep.mubr.f32.mxu1 %v16541_v0 }
 0x418   : > { %15660 = vmatmul.mubr.msk.f32.vlgmr.msra.gmra.mrb[8].mxu1 %vm281_vm1, %v17665_v45  ;;  %v17874_v29 = vpop.permute.xlu1 %10196  ;;  %v9125_v30 = vpop.permute.xlu0 %9124  ;;  %15938 = vmatprep.mubr.msk.f32.mxu0 %vm281_vm1, %v8607_v26 }
 0x419   : > { %8883 = vmatpush1.msra.mxu1 %v17719_v1  ;;  %8794 = vmatprep.mubr.f32.mxu1 %v16541_v0  ;;  %v10208_v12 = vsel %vm4196_vm12, %v17874_v29, %v17858_v21 }
 0x41a   : > { %8959 = vmatprep.subr.mxu1 %v17717_v60  ;;  %11816 = vrot.lane.b32.xlu1 %v17697_v34, %s16545_s27 }
 0x41c   : > { %15661 = vmatmul.mubr.msk.f32.gmra.mrb[10].mxu1 %vm281_vm1, %v15657_v6  ;;  %v17890_v37 = vpop.permute.xlu1 %8542  ;;  %v17892_v39 = vpop.permute.xlu0 %8567  ;;  %v18050_v6 = vld [vmem:[%s19091_s3 + $0x60] sm:$0xff] }
 0x41d   : > { %v8545_v43 = vsel %vm8544_vm9, %v17636_v63, %v17890_v37  ;;  %15939 = vmatmul.mubr.msk.f32.vlgmr.msra.gmra.mrb[4].mxu0 %vm281_vm1, %v8608_v35  ;;  %v8570_v2 = vsel %vm8569_vm3, %v17640_v4, %v17892_v39  ;;  %8946 = vmatprep.mubr.f32.mxu1 %v16541_v0  ;;  %v17928_v4 = vld [vmem:[%s19091_s3 + $0x28] sm:$0xff] }
 0x41e   : > { %v8584_v13 = vmax.f32 %v8545_v43, %v8570_v2  ;;  %10742 = vrot.lane.b32.xlu1 %v17717_v60, %s16564_s28  ;;  %15943 = vmatprep.mubr.msk.f32.mxu0 %vm281_vm1, %v17897_v40  ;;  %v18102_v2 = vld [vmem:[%s19091_s3 + $0x70] sm:$0xff] }
 0x420   : > { %v17914_v16 = vmax.f32 %v8526_v44, %v8584_v13  ;;  %15664 = vmatmul.mubr.msk.f32.vlgmr.msra.gmra.mrb[4].mxu1 %vm281_vm1, %v8607_v26  ;;  %v17917_v63 = vpop.permute.xlu1 %9122  ;;  %v9395_v45 = vpop.permute.xlu0 %9394 }
 0x421   : > { %8960 = vmatpush1.msra.mxu1 %v17677_v17  ;;  %v9130_v53 = vsel %vm1540_vm4, %v17917_v63, %v9125_v30  ;;  %8952 = vmatprep.mubr.f32.mxu1 %v16541_v0 }
 0x422   : > { %12352 = vrot.lane.b32.xlu1 %v17717_v60, %s16563_s24  ;;  %15941 = vmatprep.subr.mxu0 %v9130_v53 }
 0x423   : > { %11548 = vrot.lane.b32.xlu0 %v17914_v16, %s16543_s25  ;;  %15942 = vmatpush3.msra.mxu0 %v9130_v53  ;;  %v18117_v53 = vld [vmem:[%s19091_s3 + $0x78] sm:$0xff] }
 0x424   : > { %v9117_v46 = vpop.permute.xlu1 %9116  ;;  %v17932_v8 = vpop.permute.xlu0 %9118  ;;  %15665 = vmatmul.mubr.msk.f32.gmra.mrb[6].mxu1 %vm281_vm1, %v8608_v35 }
 0x425   : > { %15944 = vmatmul.mubr.msk.f32.vlgmr.msra.gmra.mrb[4].mxu0 %vm281_vm1, %v17928_v4  ;;  %v9127_v27 = vsel %vm1540_vm4, %v9117_v46, %v17932_v8  ;;  %9023 = vmatprep.mubr.f32.mxu1 %v16541_v0 }
 0x426   : > { %12088 = vrot.lane.b32.xlu1 %v17914_v16, %s16562_s21  ;;  %9142 = vmatprep.subr.mxu1 %v9127_v27 }
 0x427   : > { %10202 = vrot.lane.b32.xlu0 %v17717_v60, %s16553_s7  ;;  %15948 = vmatprep.mubr.msk.f32.mxu0 %vm281_vm1, %v17937_v18 }
 0x428   : > { %v17951_v23 = vpop.permute.xlu1 %9392  ;;  %v9666_v47 = vpop.permute.xlu0 %9665  ;;  %15666 = vmatmul.mubr.msk.f32.vlgmr.msra.gmra.mrb[8].mxu1 %vm281_vm1, %v8607_v26 }
 0x429   : > { %v9401_v38 = vsel %vm9396_vm11, %v17951_v23, %v9395_v45  ;;  %9029 = vmatprep.mubr.f32.mxu1 %v16541_v0 }
 0x42a   : > { %11013 = vrot.lane.b32.xlu1 %v17717_v60, %s16565_s29  ;;  %15946 = vmatprep.subr.mxu0 %v9401_v38 }
 0x42b   : > { %12080 = vrot.lane.b32.xlu0 %v17677_v17, %s16562_s21  ;;  %15947 = vmatpush3.msra.mxu0 %v9401_v38 }
 0x42c   : > { %v17971_v32 = vpop.permute.xlu1 %10468  ;;  %v17973_v41 = vpop.permute.xlu0 %10470  ;;  %15667 = vmatmul.mubr.msk.f32.gmra.mrb[10].mxu1 %vm281_vm1, %v8608_v35 }
 0x42d   : > { %15949 = vmatmul.mubr.msk.f32.vlgmr.msra.gmra.mrb[4].mxu0 %vm281_vm1, %v17962_v48  ;;  %9206 = vmatprep.mubr.f32.mxu1 %v16541_v0  ;;  %v10479_v30 = vsel %vm4860_vm14, %v17971_v32, %v17973_v41 }
 0x42e   : > { %12622 = vrot.lane.b32.xlu1 %v17717_v60, %s16551_s16  ;;  %15953 = vmatprep.mubr.msk.f32.mxu0 %vm281_vm1, %v17969_v31 }
 0x42f   : > { %11818 = vrot.lane.b32.xlu0 %v17914_v16, %s16545_s27 }
 0x430   : > { %v17985_v52 = vpop.permute.xlu1 %9663  ;;  %v9937_v54 = vpop.permute.xlu0 %9936 }
 0x431   : > { %v9672_v55 = vsel %vm9667_vm13, %v17985_v52, %v9666_v47 }
 0x432   : > { %12358 = vrot.lane.b32.xlu1 %v17914_v16, %s16563_s24  ;;  %15951 = vmatprep.subr.mxu0 %v9672_v55 }
 0x433   : > { %12078 = vrot.lane.b32.xlu0 %v17675_v33, %s16562_s21  ;;  %15952 = vmatpush3.msra.mxu0 %v9672_v55 }
 0x434   : > { %v9115_v56 = vpop.permute.xlu1 %9114  ;;  %v10467_v57 = vpop.permute.xlu0 %10466 }
 0x435   : > { %v9126_v1 = vsel %vm1540_vm4, %v9115_v56, %v9117_v46  ;;  %15954 = vmatmul.mubr.msk.f32.vlgmr.msra.gmra.mrb[4].mxu0 %vm281_vm1, %v17994_v42 }
 0x436   : > { %12892 = vrot.lane.b32.xlu1 %v17717_v60, %s16553_s7  ;;  %9143 = vmatpush1.msra.mxu1 %v9126_v1 }
 0x437   : > { %12350 = vrot.lane.b32.xlu0 %v17677_v17, %s16563_s24  ;;  %15958 = vmatprep.mubr.msk.f32.mxu0 %vm281_vm1, %v18001_v58 }
 0x438   : > { %v18012_v10 = vpop.permute.xlu1 %9934  ;;  %v18014_v59 = vpop.permute.xlu0 %10738  ;;  %15672 = vmatmul.mubr.msk.f32.vlgmr.msra.gmra.mrb[4].mxu1 %vm281_vm1, %v17897_v40 }
 0x439   : > { %v9942_v24 = vsel %vm3532_vm10, %v18012_v10, %v9937_v54  ;;  %9212 = vmatprep.mubr.f32.mxu1 %v16541_v0  ;;  %v18152_v54 = vld [vmem:[%s19091_s3 + $0x80] sm:$0xff] }
 0x43a   : > { %11544 = vrot.lane.b32.xlu1 %v17728_v61, %s16543_s25  ;;  %15956 = vmatprep.subr.mxu0 %v9942_v24 }
 0x43b   : > { %12086 = vrot.lane.b32.xlu0 %v17697_v34, %s16562_s21  ;;  %15957 = vmatpush3.msra.mxu0 %v9942_v24 }
 0x43c   : > { %v9121_v3 = vpop.permute.xlu1 %9120  ;;  %10224 = vmatprep.subr.mxu0 %v10209_v51  ;;  %v10207_v11 = vpop.permute.xlu0 %10206  ;;  %15673 = vmatmul.mubr.msk.f32.gmra.mrb[6].mxu1 %vm281_vm1, %v17928_v4 }
 0x43d   : > { %15959 = vmatmul.mubr.msk.f32.vlgmr.msra.gmra.mrb[4].mxu0 %vm281_vm1, %v18026_v50  ;;  %v9129_v5 = vsel %vm1540_vm4, %v9121_v3, %v17917_v63  ;;  %v9128_v14 = vsel %vm1540_vm4, %v17932_v8, %v9121_v3  ;;  %9283 = vmatprep.mubr.f32.mxu1 %v16541_v0 }
 0x43e   : > { %10225 = vmatpush1.msra.mxu0 %v10208_v12  ;;  %12628 = vrot.lane.b32.xlu1 %v17914_v16, %s16551_s16 }
 0x43f   : > { %12348 = vrot.lane.b32.xlu0 %v17675_v33, %s16563_s24  ;;  %9219 = vmatprep.subr.mxu1 %v9129_v5 }
 0x440   : > { %9220 = vmatpush1.msra.mxu1 %v9128_v14  ;;  %10288 = vmatprep.mubr.f32.mxu0 %v16541_v0  ;;  %v18055_v7 = vpop.permute.xlu1 %10740  ;;  %v10737_v9 = vpop.permute.xlu0 %10736 }
 0x441   : > { %15704 = vmatmul.mubr.msk.f32.vlgmr.msra.gmra.mrb[6].mxu0 %vm281_vm1, %v18050_v6  ;;  %15674 = vmatmul.mubr.msk.f32.vlgmr.msra.gmra.mrb[8].mxu1 %vm281_vm1, %v17897_v40  ;;  %v10478_v40 = vsel %vm4860_vm14, %v10467_v57, %v17971_v32  ;;  %v10749_v32 = vsel %vm10748_vm15, %v10737_v9, %v18014_v59  ;;  %v18168_v57 = vld [vmem:[%s19091_s3 + $0x88] sm:$0xff] }
 0x442   : > { %13160 = vrot.lane.b32.xlu1 %v17677_v17, %s16555_s13  ;;  %10294 = vmatprep.mubr.f32.mxu0 %v16541_v0 }
 0x443   : > { %12620 = vrot.lane.b32.xlu0 %v17677_v17, %s16551_s16  ;;  %9289 = vmatprep.mubr.f32.mxu1 %v16541_v0 }
 0x444   : > { %v18072_v21 = vpop.permute.xlu1 %10204  ;;  %v9389_v26 = vpop.permute.xlu0 %9388 }
 0x445   : > { %15705 = vmatmul.mubr.msk.f32.gmra.mrb[8].mxu0 %vm281_vm1, %v18067_v20  ;;  %v10212_v29 = vsel %vm4196_vm12, %v18072_v21, %v10207_v11  ;;  %15675 = vmatmul.mubr.msk.f32.gmra.mrb[10].mxu1 %vm281_vm1, %v17928_v4 }
 0x446   : > { %11814 = vrot.lane.b32.xlu1 %v17728_v61, %s16545_s27  ;;  %15961 = vmatprep.subr.mxu0 %v10212_v29 }
 0x447   : > { %12356 = vrot.lane.b32.xlu0 %v17697_v34, %s16563_s24  ;;  %15962 = vmatpush3.msra.mxu0 %v10212_v29 }
 0x448   : > { %15963 = vmatprep.mubr.msk.f32.mxu0 %vm281_vm1, %v18050_v6  ;;  %v9387_v35 = vpop.permute.xlu1 %9386  ;;  %10494 = vmatprep.subr.mxu0 %v10479_v30  ;;  %v18089_v36 = vpop.permute.xlu0 %10474  ;;  %v18221_v30 = vld [vmem:[%s19091_s3 + $0x98] sm:$0xff] }
 0x449   : > { %15964 = vmatmul.mubr.msk.f32.vlgmr.msra.gmra.mrb[4].mxu0 %vm281_vm1, %v18067_v20  ;;  %v9398_v43 = vsel %vm9396_vm11, %v9387_v35, %v9389_v26  ;;  %9477 = vmatprep.mubr.f32.mxu1 %v16541_v0 }
 0x44a   : > { %10495 = vmatpush1.msra.mxu0 %v10478_v40  ;;  %12898 = vrot.lane.b32.xlu1 %v17914_v16, %s16553_s7 }
 0x44b   : > { %12618 = vrot.lane.b32.xlu0 %v17675_v33, %s16551_s16  ;;  %9413 = vmatprep.subr.mxu1 %v9398_v43 }
 0x44c   : > { %10558 = vmatprep.mubr.f32.mxu0 %v16541_v0  ;;  %v9385_v44 = vpop.permute.xlu1 %9384  ;;  %v9391_v13 = vpop.permute.xlu0 %9390 }
 0x44d   : > { %v9397_v63 = vsel %vm9396_vm11, %v9385_v44, %v9387_v35  ;;  %15712 = vmatmul.mubr.msk.f32.vlgmr.msra.gmra.mrb[6].mxu0 %vm281_vm1, %v18102_v2  ;;  %v9400_v45 = vsel %vm9396_vm11, %v9391_v13, %v17951_v23  ;;  %v9399_v46 = vsel %vm9396_vm11, %v9389_v26, %v9391_v13  ;;  %v10750_v23 = vsel %vm10748_vm15, %v18014_v59, %v18055_v7 }
 0x44e   : > { %13158 = vrot.lane.b32.xlu1 %v17675_v33, %s16555_s13  ;;  %9414 = vmatpush1.msra.mxu1 %v9397_v63 }
 0x44f   : > { %12890 = vrot.lane.b32.xlu0 %v17677_v17, %s16553_s7  ;;  %9490 = vmatprep.subr.mxu1 %v9400_v45 }
 0x450   : > { %10564 = vmatprep.mubr.f32.mxu0 %v16541_v0  ;;  %v10477_v4 = vpop.permute.xlu1 %10476  ;;  %15680 = vmatmul.mubr.msk.f32.vlgmr.msra.gmra.mrb[4].mxu1 %vm281_vm1, %v17937_v18  ;;  %v18125_v8 = vpop.permute.xlu0 %11011 }
 0x451   : > { %9491 = vmatpush1.msra.mxu1 %v9399_v46  ;;  %15713 = vmatmul.mubr.msk.f32.gmra.mrb[8].mxu0 %vm281_vm1, %v18117_v53  ;;  %v10482_v27 = vsel %vm4860_vm14, %v18089_v36, %v10477_v4 }
 0x452   : > { %13430 = vrot.lane.b32.xlu1 %v17677_v17, %s16564_s28  ;;  %15966 = vmatprep.subr.mxu0 %v10482_v27 }
 0x453   : > { %12626 = vrot.lane.b32.xlu0 %v17697_v34, %s16551_s16  ;;  %15967 = vmatpush3.msra.mxu0 %v10482_v27 }
 0x454   : > { %15968 = vmatprep.mubr.msk.f32.mxu0 %vm281_vm1, %v18102_v2  ;;  %v11010_v47 = vpop.permute.xlu1 %11009  ;;  %10765 = vmatprep.subr.mxu0 %v10750_v23  ;;  %v18140_v38 = vpop.permute.xlu0 %10744 }
 0x455   : > { %15969 = vmatmul.mubr.msk.f32.vlgmr.msra.gmra.mrb[4].mxu0 %vm281_vm1, %v18117_v53  ;;  %9483 = vmatprep.mubr.f32.mxu1 %v16541_v0  ;;  %v11021_v51 = vsel %vm11019_vm5, %v11010_v47, %v18125_v8 }
 0x456   : > { %10766 = vmatpush1.msra.mxu0 %v10749_v32  ;;  %13166 = vrot.lane.b32.xlu1 %v17697_v34, %s16555_s13 }
 0x457   : > { %12888 = vrot.lane.b32.xlu0 %v17675_v33, %s16553_s7  ;;  %10829 = vmatprep.mubr.f32.mxu0 %v16541_v0 }
 0x458   : > { %v11008_v55 = vpop.permute.xlu1 %11007  ;;  %15681 = vmatmul.mubr.msk.f32.gmra.mrb[6].mxu1 %vm281_vm1, %v17962_v48  ;;  %v9658_v56 = vpop.permute.xlu0 %9657 }
 0x459   : > { %15720 = vmatmul.mubr.msk.f32.vlgmr.msra.gmra.mrb[6].mxu0 %vm281_vm1, %v18152_v54  ;;  %9554 = vmatprep.mubr.f32.mxu1 %v16541_v0  ;;  %v11020_v11 = vsel %vm11019_vm5, %v11008_v55, %v11010_v47 }
 0x45a   : > { %13428 = vrot.lane.b32.xlu1 %v17675_v33, %s16564_s28  ;;  %10835 = vmatprep.mubr.f32.mxu0 %v16541_v0 }
 0x45b   : > { %13162 = vrot.lane.b32.xlu0 %v17717_v60, %s16555_s13 }
 0x45c   : > { %v10747_v1 = vpop.permute.xlu1 %10746  ;;  %15682 = vmatmul.mubr.msk.f32.vlgmr.msra.gmra.mrb[8].mxu1 %vm281_vm1, %v17937_v18  ;;  %v9656_v59 = vpop.permute.xlu0 %9655 }
 0x45d   : > { %15721 = vmatmul.mubr.msk.f32.gmra.mrb[8].mxu0 %vm281_vm1, %v18168_v57  ;;  %v10753_v24 = vsel %vm10748_vm15, %v18140_v38, %v10747_v1  ;;  %9560 = vmatprep.mubr.f32.mxu1 %v16541_v0  ;;  %v9668_v5 = vsel %vm9667_vm13, %v9656_v59, %v9658_v56  ;;  %v18321_v59 = vld [vmem:[%s19091_s3 + $0xb8] sm:$0xff] }
 0x45e   : > { %13436 = vrot.lane.b32.xlu1 %v17697_v34, %s16564_s28  ;;  %15971 = vmatprep.subr.mxu0 %v10753_v24 }
 0x45f   : > { %12896 = vrot.lane.b32.xlu0 %v17697_v34, %s16553_s7  ;;  %15972 = vmatpush3.msra.mxu0 %v10753_v24 }
 0x460   : > { %15973 = vmatprep.mubr.msk.f32.mxu0 %vm281_vm1, %v18152_v54  ;;  %v9660_v18 = vpop.permute.xlu1 %9659  ;;  %15683 = vmatmul.mubr.msk.f32.gmra.mrb[10].mxu1 %vm281_vm1, %v17962_v48  ;;  %v18189_v3 = vpop.permute.xlu0 %11015  ;;  %v18203_v48 = vld [vmem:[%s19091_s3 + $0x90] sm:$0xff] }
 0x461   : > { %15974 = vmatmul.mubr.msk.f32.vlgmr.msra.gmra.mrb[4].mxu0 %vm281_vm1, %v18168_v57  ;;  %11036 = vmatprep.subr.mxu0 %v11021_v51  ;;  %v9669_v12 = vsel %vm9667_vm13, %v9658_v56, %v9660_v18  ;;  %v18303_v56 = vld [vmem:[%s19091_s3 + $0xb0] sm:$0xff]  ;;  %v8519_v51 = vsel %vm8511_vm0, %v17860_v25, %v17679_v22 }
 0x462   : > { %11037 = vmatpush1.msra.mxu0 %v11020_v11  ;;  %12894 = vrot.lane.b32.xlu1 %v17728_v61, %s16553_s7 }
 0x463   : > { %12084 = vrot.lane.b32.xlu0 %v17728_v61, %s16562_s21  ;;  %9684 = vmatprep.subr.mxu1 %v9669_v12 }
 0x464   : > { %9685 = vmatpush1.msra.mxu1 %v9668_v5  ;;  %9748 = vmatprep.mubr.f32.mxu1 %v16541_v0  ;;  %v9662_v14 = vpop.permute.xlu1 %9661  ;;  %v9929_v9 = vpop.permute.xlu0 %9928 }
 0x465   : > { %11100 = vmatprep.mubr.f32.mxu0 %v16541_v0  ;;  %15688 = vmatmul.mubr.msk.f32.vlgmr.msra.gmra.mrb[4].mxu1 %vm281_vm1, %v17969_v31  ;;  %v9671_v26 = vsel %vm9667_vm13, %v9662_v14, %v17985_v52  ;;  %v9670_v29 = vsel %vm9667_vm13, %v9660_v18, %v9662_v14  ;;  %v8577_v18 = vsel %vm8569_vm3, %v17892_v39, %v17699_v49 }
 0x466   : > { %15728 = vmatmul.mubr.msk.f32.vlgmr.msra.gmra.mrb[6].mxu0 %vm281_vm1, %v18203_v48  ;;  %13702 = vrot.lane.b32.xlu1 %v17717_v60, %s16565_s29 }
 0x467   : > { %12354 = vrot.lane.b32.xlu0 %v17728_v61, %s16563_s24  ;;  %9761 = vmatprep.subr.mxu1 %v9671_v26 }
 0x468   : > { %9754 = vmatprep.mubr.f32.mxu1 %v16541_v0  ;;  %9762 = vmatpush1.msra.mxu1 %v9670_v29  ;;  %v11018_v52 = vpop.permute.xlu1 %11017  ;;  %v11541_v35 = vpop.permute.xlu0 %11540 }
 0x469   : > { %11106 = vmatprep.mubr.f32.mxu0 %v16541_v0  ;;  %15689 = vmatmul.mubr.msk.f32.gmra.mrb[6].mxu1 %vm281_vm1, %v17994_v42  ;;  %v11024_v40 = vsel %vm11019_vm5, %v18189_v3, %v11018_v52 }
 0x46a   : > { %15729 = vmatmul.mubr.msk.f32.gmra.mrb[8].mxu0 %vm281_vm1, %v18221_v30  ;;  %13164 = vrot.lane.b32.xlu1 %v17728_v61, %s16555_s13 }
 0x46b   : > { %13168 = vrot.lane.b32.xlu0 %v17914_v16, %s16555_s13  ;;  %15976 = vmatprep.subr.mxu0 %v11024_v40 }
 0x46c   : > { %9825 = vmatprep.mubr.f32.mxu1 %v16541_v0  ;;  %15977 = vmatpush3.msra.mxu0 %v11024_v40  ;;  %v9931_v43 = vpop.permute.xlu1 %9930  ;;  %v9927_v44 = vpop.permute.xlu0 %9926 }
 0x46d   : > { %15978 = vmatprep.mubr.msk.f32.mxu0 %vm281_vm1, %v18203_v48  ;;  %15690 = vmatmul.mubr.msk.f32.vlgmr.msra.gmra.mrb[8].mxu1 %vm281_vm1, %v17969_v31  ;;  %v9939_v13 = vsel %vm3532_vm10, %v9929_v9, %v9931_v43  ;;  %v9938_v63 = vsel %vm3532_vm10, %v9927_v44, %v9929_v9  ;;  %v18255_v31 = vld [vmem:[%s19091_s3 + $0xa0] sm:$0xff] }
 0x46e   : > { %15979 = vmatmul.mubr.msk.f32.vlgmr.msra.gmra.mrb[4].mxu0 %vm281_vm1, %v18221_v30  ;;  %11284 = vmatprep.subr.mxu0 %v17677_v17 }
 0x46f   : > { %11285 = vmatpush1.msra.mxu0 %v17675_v33  ;;  %13708 = vrot.lane.b32.xlu1 %v17914_v16, %s16565_s29 }
 0x470   : > { %13432 = vrot.lane.b32.xlu0 %v17717_v60, %s16564_s28  ;;  %9954 = vmatprep.subr.mxu1 %v9939_v13  ;;  %v18250_v45 = vpop.permute.xlu1 %11542  ;;  %v9933_v4 = vpop.permute.xlu0 %9932 }
 0x471   : > { %15981 = vmatprep.subr.mxu0 %v17697_v34  ;;  %9831 = vmatprep.mubr.f32.mxu1 %v16541_v0  ;;  %v9941_v46 = vsel %vm3532_vm10, %v9933_v4, %v18012_v10  ;;  %v11551_v27 = vsel %vm876_vm2, %v11541_v35, %v18250_v45  ;;  %v9940_v10 = vsel %vm3532_vm10, %v9931_v43, %v9933_v4 }
 0x472   : > { %9955 = vmatpush1.msra.mxu1 %v9938_v63  ;;  %11348 = vmatprep.mubr.f32.mxu0 %v16541_v0 }
 0x473   : > { %15691 = vmatmul.mubr.msk.f32.gmra.mrb[10].mxu1 %vm281_vm1, %v17994_v42  ;;  %15736 = vmatmul.mubr.msk.f32.vlgmr.msra.gmra.mrb[6].mxu0 %vm281_vm1, %v18255_v31  ;;  %v18276_v42 = vld [vmem:[%s19091_s3 + $0xa8] sm:$0xff] }
 0x474   : > { %15982 = vmatpush3.msra.mxu0 %v17697_v34  ;;  %13704 = vrot.lane.b32.xlu1 %v17728_v61, %s16565_s29  ;;  %v11539_v23 = vpop.permute.xlu1 %11538  ;;  %v18360_v5 = vpop.permute.xlu0 %11812 }
 0x475   : > { %12624 = vrot.lane.b32.xlu0 %v17728_v61, %s16551_s16  ;;  %10031 = vmatprep.subr.mxu1 %v9941_v46  ;;  %v11550_v32 = vsel %vm876_vm2, %v11539_v23, %v11541_v35  ;;  %v18392_v35 = vld [vmem:[%s19091_s3 + $0xc0] sm:$0xff]  ;;  %v15306_v46 = vld [vmem:[%s19092_s4 + $0x8] sm:$0xff]  ;;  %v18453_v23 = vld [vmem:[%s19091_s3 + $0xd0] sm:$0xff] }
 0x476   : > { %11566 = vmatprep.subr.mxu0 %v11551_v27  ;;  %10018 = vmatprep.mubr.f32.mxu1 %v16541_v0 }
 0x477   : > { %11354 = vmatprep.mubr.f32.mxu0 %v16541_v0  ;;  %15696 = vmatmul.mubr.msk.f32.vlgmr.msra.gmra.mrb[4].mxu1 %vm281_vm1, %v18001_v58 }
 0x478   : > { %10032 = vmatpush1.msra.mxu1 %v9940_v10  ;;  %15737 = vmatmul.mubr.msk.f32.gmra.mrb[8].mxu0 %vm281_vm1, %v18276_v42  ;;  %v11811_v47 = vpop.permute.xlu1 %11810 }
 0x479   : > { %14232 = vrot.lane.b32.xlu1 %v17728_v61, %s16543_s25  ;;  %13438 = vrot.lane.b32.xlu0 %v17914_v16, %s16564_s28 }
 0x47a   : > { %10024 = vmatprep.mubr.f32.mxu1 %v16541_v0  ;;  %15983 = vmatprep.mubr.msk.f32.mxu0 %vm281_vm1, %v18255_v31 }
 0x47b   : > { %15697 = vmatmul.mubr.msk.f32.gmra.mrb[6].mxu1 %vm281_vm1, %v18026_v50 }
 0x47c   : > { %15984 = vmatmul.mubr.msk.f32.vlgmr.msra.gmra.mrb[4].mxu0 %vm281_vm1, %v18276_v42  ;;  %v11809_v55 = vpop.permute.xlu1 %11808  ;;  %10095 = vmatprep.mubr.f32.mxu1 %v16541_v0 }
 0x47d   : > { %11567 = vmatpush1.msra.mxu0 %v11550_v32  ;;  %14236 = vrot.lane.b32.xlu1 %v17914_v16, %s16543_s25  ;;  %v11820_v9 = vsel %vm1540_vm4, %v11809_v55, %v11811_v47 }
 0x47e   : > { %13700 = vrot.lane.b32.xlu0 %v17677_v17, %s16565_s29  ;;  %11630 = vmatprep.mubr.f32.mxu0 %v16541_v0 }
 0x47f   : > { %15698 = vmatmul.mubr.msk.f32.vlgmr.msra.gmra.mrb[8].mxu1 %vm281_vm1, %v18001_v58 }
 0x480   : > { %v18310_v1 = vpop.permute.xlu1 %11546  ;;  %15744 = vmatmul.mubr.msk.f32.vlgmr.msra.gmra.mrb[6].mxu0 %vm281_vm1, %v18303_v56  ;;  %10101 = vmatprep.mubr.f32.mxu1 %v16541_v0 }
 0x481   : > { %14500 = vrot.lane.b32.xlu1 %v17717_v60, %s16545_s27  ;;  %11636 = vmatprep.mubr.f32.mxu0 %v16541_v0 }
 0x482   : > { %13698 = vrot.lane.b32.xlu0 %v17675_v33, %s16565_s29 }
 0x483   : > { %15699 = vmatmul.mubr.msk.f32.gmra.mrb[10].mxu1 %vm281_vm1, %v18026_v50  ;;  %v8552_v50 = vsel %vm8544_vm9, %v17890_v37, %v17684_v28  ;;  %v8527_v28 = vmax.f32 %v17734_v62, %v8519_v51  ;;  %v11821_v62 = vsel %vm1540_vm4, %v11811_v47, %v18360_v5  ;;  %v18470_v47 = vld [vmem:[%s19091_s3 + $0xd8] sm:$0xff] }
 0x484   : > { %v10473_v58 = vpop.permute.xlu1 %10472  ;;  %15745 = vmatmul.mubr.msk.f32.gmra.mrb[8].mxu0 %vm281_vm1, %v18321_v59  ;;  %10365 = vmatprep.mubr.f32.mxu1 %v16541_v0  ;;  %v8585_v11 = vmax.f32 %v8552_v50, %v8577_v18 }
 0x485   : > { %14498 = vrot.lane.b32.xlu1 %v17677_v17, %s16545_s27  ;;  %15988 = vmatprep.mubr.msk.f32.mxu0 %vm281_vm1, %v18303_v56  ;;  %v10480_v40 = vsel %vm4860_vm14, %v17973_v41, %v10473_v58 }
 0x486   : > { %13706 = vrot.lane.b32.xlu0 %v17697_v34, %s16565_s29  ;;  %v8593_v49 = vmax.f32 %v8527_v28, %v8585_v11  ;;  %v18520_v28 = vld [vmem:[%s19091_s3 + $0xe8] sm:$0xff] }
 0x488   : > { %v18336_v24 = vpop.permute.xlu1 %12082 }
 0x489   : > { %14506 = vrot.lane.b32.xlu1 %v17914_v16, %s16545_s27 }
 0x48a   : > { %13434 = vrot.lane.b32.xlu0 %v17728_v61, %s16564_s28 }
 0x48c   : > { %v18342_v33 = vpop.permute.xlu1 %11816 }
 0x48d   : > { %14504 = vrot.lane.b32.xlu1 %v17697_v34, %s16545_s27 }
 0x48e   : > { %14230 = vrot.lane.b32.xlu0 %v17717_v60, %s16543_s25 }
 0x490   : > { %v10743_v12 = vpop.permute.xlu1 %10742 }
 0x491   : > { %14772 = vrot.lane.b32.xlu1 %v17728_v61, %s16562_s21  ;;  %v10752_v43 = vsel %vm10748_vm15, %v10743_v12, %v18140_v38 }
 0x492   : > { %14228 = vrot.lane.b32.xlu0 %v17677_v17, %s16543_s25 }
 0x494   : > { %v18367_v37 = vpop.permute.xlu1 %12352 }
 0x495   : > { %14774 = vrot.lane.b32.xlu1 %v17697_v34, %s16562_s21  ;;  %v11549_v39 = vpop.permute.xlu0 %11548 }
 0x496   : > { %14238 = vrot.lane.b32.xlu0 %v8593_v49, %s16543_s25  ;;  %v11554_v22 = vsel %vm876_vm2, %v18310_v1, %v11549_v39 }
 0x497   : > { %15986 = vmatprep.subr.mxu0 %v11554_v22 }
 0x498   : > { %15987 = vmatpush3.msra.mxu0 %v11554_v22  ;;  %v18374_v25 = vpop.permute.xlu1 %12088 }
 0x499   : > { %14778 = vrot.lane.b32.xlu1 %v8593_v49, %s16562_s21  ;;  %11836 = vmatprep.subr.mxu0 %v11821_v62  ;;  %v10203_v14 = vpop.permute.xlu0 %10202 }
 0x49a   : > { %14502 = vrot.lane.b32.xlu0 %v17728_v61, %s16545_s27  ;;  %15989 = vmatmul.mubr.msk.f32.vlgmr.msra.gmra.mrb[4].mxu0 %vm281_vm1, %v18321_v59  ;;  %v10211_v26 = vsel %vm4196_vm12, %v10203_v14, %v18072_v21  ;;  %v10210_v29 = vsel %vm4196_vm12, %v17846_v15, %v10203_v14  ;;  %v10481_v15 = vsel %vm4860_vm14, %v10473_v58, %v18089_v36  ;;  %v18414_v36 = vld [vmem:[%s19091_s3 + $0xc8] sm:$0xff] }
 0x49b   : > { %11837 = vmatpush1.msra.mxu0 %v11820_v9  ;;  %10301 = vmatprep.subr.mxu1 %v10211_v26  ;;  %v18549_v9 = vld [vmem:[%s19091_s3 + $0xf0] sm:$0xff] }
 0x49c   : > { %10302 = vmatpush1.msra.mxu1 %v10210_v29  ;;  %v11014_v52 = vpop.permute.xlu1 %11013  ;;  %11900 = vmatprep.mubr.f32.mxu0 %v16541_v0 }
 0x49d   : > { %15042 = vrot.lane.b32.xlu1 %v17728_v61, %s16563_s24  ;;  %15706 = vmatmul.mubr.msk.f32.vlgmr.msra.gmra.mrb[8].mxu1 %vm281_vm1, %v18050_v6  ;;  %v12081_v21 = vpop.permute.xlu0 %12080  ;;  %v11022_v32 = vsel %vm11019_vm5, %v18125_v8, %v11014_v52 }
 0x49e   : > { %14234 = vrot.lane.b32.xlu0 %v17697_v34, %s16543_s25  ;;  %10571 = vmatprep.subr.mxu1 %v10481_v15  ;;  %v12091_v63 = vsel %vm9396_vm11, %v12081_v21, %v18336_v24 }
 0x49f   : > { %10572 = vmatpush1.msra.mxu1 %v10480_v40  ;;  %15752 = vmatmul.mubr.msk.f32.vlgmr.msra.gmra.mrb[6].mxu0 %vm281_vm1, %v18392_v35  ;;  %v18595_v40 = vld [vmem:[%s19091_s3 + $0x100] sm:$0xff] }
 0x4a0   : > { %10842 = vmatprep.subr.mxu1 %v10752_v43  ;;  %10371 = vmatprep.mubr.f32.mxu1 %v16541_v0  ;;  %v18409_v6 = vpop.permute.xlu1 %12622 }
 0x4a1   : > { %15044 = vrot.lane.b32.xlu1 %v17697_v34, %s16563_s24  ;;  %15707 = vmatmul.mubr.msk.f32.gmra.mrb[10].mxu1 %vm281_vm1, %v18067_v20  ;;  %v11819_v41 = vpop.permute.xlu0 %11818  ;;  %v10751_v20 = vsel %vm10748_vm15, %v18055_v7, %v10743_v12  ;;  %v11023_v7 = vsel %vm11019_vm5, %v11014_v52, %v18189_v3 }
 0x4a2   : > { %14508 = vrot.lane.b32.xlu0 %v8593_v49, %s16545_s27  ;;  %11906 = vmatprep.mubr.f32.mxu0 %v16541_v0  ;;  %v11824_v38 = vsel %vm1540_vm4, %v18342_v33, %v11819_v41 }
 0x4a3   : > { %15753 = vmatmul.mubr.msk.f32.gmra.mrb[8].mxu0 %vm281_vm1, %v18414_v36  ;;  %15991 = vmatprep.subr.mxu0 %v11824_v38 }
 0x4a4   : > { %10635 = vmatprep.mubr.f32.mxu1 %v16541_v0  ;;  %15992 = vmatpush3.msra.mxu0 %v11824_v38  ;;  %v18427_v44 = vpop.permute.xlu1 %12358  ;;  %v18613_v38 = vld [vmem:[%s19091_s3 + $0x108] sm:$0xff] }
 0x4a5   : > { %15048 = vrot.lane.b32.xlu1 %v8593_v49, %s16563_s24  ;;  %15714 = vmatmul.mubr.msk.f32.vlgmr.msra.gmra.mrb[8].mxu1 %vm281_vm1, %v18102_v2  ;;  %v12079_v13 = vpop.permute.xlu0 %12078 }
 0x4a6   : > { %14770 = vrot.lane.b32.xlu0 %v17717_v60, %s16562_s21  ;;  %10843 = vmatpush1.msra.mxu1 %v10751_v20  ;;  %v12090_v4 = vsel %vm9396_vm11, %v12079_v13, %v12081_v21 }
 0x4a7   : > { %15993 = vmatprep.mubr.msk.f32.mxu0 %vm281_vm1, %v18392_v35  ;;  %12106 = vmatprep.subr.mxu0 %v12091_v63 }
 0x4a8   : > { %11113 = vmatprep.subr.mxu1 %v11023_v7  ;;  %15994 = vmatmul.mubr.msk.f32.vlgmr.msra.gmra.mrb[4].mxu0 %vm281_vm1, %v18414_v36  ;;  %v18448_v2 = vpop.permute.xlu1 %12892 }
 0x4a9   : > { %15314 = vperm.xlu1 %16522, %v15306_v46   ;;  %12107 = vmatpush1.msra.mxu0 %v12090_v4  ;;  %v12351_v27 = vpop.permute.xlu0 %12350 }
 0x4aa   : > { %14768 = vrot.lane.b32.xlu0 %v17677_v17, %s16562_s21  ;;  %10641 = vmatprep.mubr.f32.mxu1 %v16541_v0 }
 0x4ab   : > { %15715 = vmatmul.mubr.msk.f32.gmra.mrb[10].mxu1 %vm281_vm1, %v18117_v53  ;;  %12170 = vmatprep.mubr.f32.mxu0 %v16541_v0 }
 0x4ac   : > { %15760 = vmatmul.mubr.msk.f32.vlgmr.msra.gmra.mrb[6].mxu0 %vm281_vm1, %v18453_v23  ;;  %10906 = vmatprep.mubr.f32.mxu1 %v16541_v0  ;;  %v11545_v3 = vpop.permute.xlu1 %11544 }
 0x4ad   : > { %12176 = vmatprep.mubr.f32.mxu0 %v16541_v0  ;;  %v18465_v10 = vpop.permute.xlu0 %12086  ;;  %v11553_v51 = vsel %vm876_vm2, %v11545_v3, %v18310_v1 }
 0x4ae   : > { %14776 = vrot.lane.b32.xlu0 %v17914_v16, %s16562_s21  ;;  %v12094_v53 = vsel %vm9396_vm11, %v18465_v10, %v18374_v25 }
 0x4af   : > { %15722 = vmatmul.mubr.msk.f32.vlgmr.msra.gmra.mrb[8].mxu1 %vm281_vm1, %v18152_v54  ;;  %15996 = vmatprep.subr.mxu0 %v12094_v53  ;;  %v12361_v54 = vsel %vm9667_vm13, %v12351_v27, %v18367_v37 }
 0x4b0   : > { %11114 = vmatpush1.msra.mxu1 %v11022_v32  ;;  %15761 = vmatmul.mubr.msk.f32.gmra.mrb[8].mxu0 %vm281_vm1, %v18470_v47  ;;  %v12629_v55 = vpop.permute.xlu1 %12628 }
 0x4b1   : > { %11361 = vmatprep.subr.mxu1 %v17728_v61  ;;  %10912 = vmatprep.mubr.f32.mxu1 %v16541_v0  ;;  %v12349_v58 = vpop.permute.xlu0 %12348 }
 0x4b2   : > { %15040 = vrot.lane.b32.xlu0 %v17717_v60, %s16563_s24  ;;  %15997 = vmatpush3.msra.mxu0 %v12094_v53  ;;  %v12360_v8 = vsel %vm9667_vm13, %v12349_v58, %v12351_v27 }
 0x4b3   : > { %15723 = vmatmul.mubr.msk.f32.gmra.mrb[10].mxu1 %vm281_vm1, %v18168_v57  ;;  %15998 = vmatprep.mubr.msk.f32.mxu0 %vm281_vm1, %v18453_v23  ;;  %v18502_v57 = vld [vmem:[%s19091_s3 + $0xe0] sm:$0xff] }
 0x4b4   : > { %12376 = vmatprep.subr.mxu0 %v12361_v54  ;;  %15999 = vmatmul.mubr.msk.f32.vlgmr.msra.gmra.mrb[4].mxu0 %vm281_vm1, %v18470_v47  ;;  %v18496_v50 = vpop.permute.xlu1 %13160 }
 0x4b5   : > { %12377 = vmatpush1.msra.mxu0 %v12360_v8  ;;  %11177 = vmatprep.mubr.f32.mxu1 %v16541_v0  ;;  %v12621_v18 = vpop.permute.xlu0 %12620  ;;  %v18684_v8 = vld [vmem:[%s19091_s3 + $0x120] sm:$0xff] }
 0x4b6   : > { %15038 = vrot.lane.b32.xlu0 %v17677_v17, %s16563_s24  ;;  %12440 = vmatprep.mubr.f32.mxu0 %v16541_v0  ;;  %v12631_v49 = vsel %vm3532_vm10, %v12621_v18, %v18409_v6 }
 0x4b7   : > { %15730 = vmatmul.mubr.msk.f32.vlgmr.msra.gmra.mrb[8].mxu1 %vm281_vm1, %v18203_v48 }
 0x4b8   : > { %11362 = vmatpush1.msra.mxu1 %v17717_v60  ;;  %15768 = vmatmul.mubr.msk.f32.vlgmr.msra.gmra.mrb[6].mxu0 %vm281_vm1, %v18502_v57  ;;  %v11815_v11 = vpop.permute.xlu1 %11814 }
 0x4b9   : > { %11643 = vmatprep.subr.mxu1 %v11553_v51  ;;  %11183 = vmatprep.mubr.f32.mxu1 %v16541_v0  ;;  %v18515_v12 = vpop.permute.xlu0 %12356  ;;  %v11823_v25 = vsel %vm1540_vm4, %v11815_v11, %v18342_v33  ;;  %v18566_v33 = vld [vmem:[%s19091_s3 + $0xf8] sm:$0xff] }
 0x4ba   : > { %15046 = vrot.lane.b32.xlu0 %v17914_v16, %s16563_s24  ;;  %12446 = vmatprep.mubr.f32.mxu0 %v16541_v0  ;;  %v12364_v48 = vsel %vm9667_vm13, %v18515_v12, %v18427_v44 }
 0x4bb   : > { %15731 = vmatmul.mubr.msk.f32.gmra.mrb[10].mxu1 %vm281_vm1, %v18221_v30  ;;  %16001 = vmatprep.subr.mxu0 %v12364_v48  ;;  %v11552_v30 = vsel %vm876_vm2, %v18250_v45, %v11545_v3 }
 0x4bc   : > { %15769 = vmatmul.mubr.msk.f32.gmra.mrb[8].mxu0 %vm281_vm1, %v18520_v28  ;;  %11425 = vmatprep.mubr.f32.mxu1 %v16541_v0  ;;  %v12899_v1 = vpop.permute.xlu1 %12898 }
 0x4bd   : > { %16002 = vmatpush3.msra.mxu0 %v12364_v48  ;;  %16003 = vmatprep.mubr.msk.f32.mxu0 %vm281_vm1, %v18502_v57  ;;  %v12619_v39 = vpop.permute.xlu0 %12618 }
 0x4be   : > { %12646 = vmatprep.subr.mxu0 %v12631_v49  ;;  %v12630_v22 = vsel %vm3532_vm10, %v12619_v39, %v12621_v18 }
 0x4bf   : > { %15738 = vmatmul.mubr.msk.f32.vlgmr.msra.gmra.mrb[8].mxu1 %vm281_vm1, %v18255_v31 }
 0x4c0   : > { %11644 = vmatpush1.msra.mxu1 %v11552_v30  ;;  %16004 = vmatmul.mubr.msk.f32.vlgmr.msra.gmra.mrb[4].mxu0 %vm281_vm1, %v18520_v28  ;;  %v13159_v62 = vpop.permute.xlu1 %13158 }
 0x4c1   : > { %11913 = vmatprep.subr.mxu1 %v11823_v25  ;;  %12647 = vmatpush1.msra.mxu0 %v12630_v22  ;;  %v12891_v14 = vpop.permute.xlu0 %12890  ;;  %v13170_v4 = vsel %vm4860_vm14, %v13159_v62, %v18496_v50  ;;  %v15806_v25 = vld [vmem:[%s19091_s3 + $0x130] sm:$0xff] }
 0x4c2   : > { %11431 = vmatprep.mubr.f32.mxu1 %v16541_v0  ;;  %12710 = vmatprep.mubr.f32.mxu0 %v16541_v0  ;;  %v12901_v52 = vsel %vm4196_vm12, %v12891_v14, %v18448_v2 }
 0x4c3   : > { %15739 = vmatmul.mubr.msk.f32.gmra.mrb[10].mxu1 %vm281_vm1, %v18276_v42  ;;  %v11822_v42 = vsel %vm1540_vm4, %v18360_v5, %v11815_v11 }
 0x4c4   : > { %15776 = vmatmul.mubr.msk.f32.vlgmr.msra.gmra.mrb[6].mxu0 %vm281_vm1, %v18549_v9  ;;  %11707 = vmatprep.mubr.f32.mxu1 %v16541_v0  ;;  %v18558_v45 = vpop.permute.xlu1 %13430 }
 0x4c5   : > { %12716 = vmatprep.mubr.f32.mxu0 %v16541_v0  ;;  %v18561_v31 = vpop.permute.xlu0 %12626 }
 0x4c6   : > { %v12634_v26 = vsel %vm3532_vm10, %v18561_v31, %v12629_v55 }
 0x4c7   : > { %15746 = vmatmul.mubr.msk.f32.vlgmr.msra.gmra.mrb[8].mxu1 %vm281_vm1, %v18303_v56  ;;  %16006 = vmatprep.subr.mxu0 %v12634_v26 }
 0x4c8   : > { %11914 = vmatpush1.msra.mxu1 %v11822_v42  ;;  %15777 = vmatmul.mubr.msk.f32.gmra.mrb[8].mxu0 %vm281_vm1, %v18566_v33  ;;  %v18576_v29 = vpop.permute.xlu1 %13166 }
 0x4c9   : > { %16007 = vmatpush3.msra.mxu0 %v12634_v26  ;;  %16008 = vmatprep.mubr.msk.f32.mxu0 %vm281_vm1, %v18549_v9  ;;  %v12889_v15 = vpop.permute.xlu0 %12888 }
 0x4ca   : > { %12916 = vmatprep.subr.mxu0 %v12901_v52  ;;  %v12900_v5 = vsel %vm4196_vm12, %v12889_v15, %v12891_v14  ;;  %11713 = vmatprep.mubr.f32.mxu1 %v16541_v0  ;;  %v15814_v15 = vld [vmem:[%s19091_s3 + $0x140] sm:$0xff] }
 0x4cb   : > { %15747 = vmatmul.mubr.msk.f32.gmra.mrb[10].mxu1 %vm281_vm1, %v18321_v59  ;;  %v15305_v59 = vld [vmem:[%s19092_s4] sm:$0xff] }
 0x4cc   : > { %16009 = vmatmul.mubr.msk.f32.vlgmr.msra.gmra.mrb[4].mxu0 %vm281_vm1, %v18566_v33  ;;  %v13429_v56 = vpop.permute.xlu1 %13428  ;;  %11977 = vmatprep.mubr.f32.mxu1 %v16541_v0 }
 0x4cd   : > { %12917 = vmatpush1.msra.mxu0 %v12900_v5  ;;  %12980 = vmatprep.mubr.f32.mxu0 %v16541_v0  ;;  %v18590_v21 = vpop.permute.xlu0 %13162  ;;  %v13440_v58 = vsel %vm10748_vm15, %v13429_v56, %v18558_v45 }
 0x4ce   : > { %15309 = vperm.xlu0 %16523, %v15305_v59   ;;  %v13171_v20 = vsel %vm4860_vm14, %v18496_v50, %v18590_v21 }
 0x4cf   : > { %15754 = vmatmul.mubr.msk.f32.vlgmr.msra.gmra.mrb[8].mxu1 %vm281_vm1, %v18392_v35 }
 0x4d0   : > { %15784 = vmatmul.mubr.msk.f32.vlgmr.msra.gmra.mrb[6].mxu0 %vm281_vm1, %v18595_v40  ;;  %v18604_v43 = vpop.permute.xlu1 %13436  ;;  %11983 = vmatprep.mubr.f32.mxu1 %v16541_v0 }
 0x4d1   : > { %12986 = vmatprep.mubr.f32.mxu0 %v16541_v0  ;;  %v18608_v41 = vpop.permute.xlu0 %12896 }
 0x4d2   : > { %v12904_v35 = vsel %vm4196_vm12, %v18608_v41, %v12899_v1 }
 0x4d3   : > { %16011 = vmatprep.subr.mxu0 %v12904_v35  ;;  %15755 = vmatmul.mubr.msk.f32.gmra.mrb[10].mxu1 %vm281_vm1, %v18414_v36 }
 0x4d4   : > { %15785 = vmatmul.mubr.msk.f32.gmra.mrb[8].mxu0 %vm281_vm1, %v18613_v38  ;;  %v12895_v44 = vpop.permute.xlu1 %12894  ;;  %12247 = vmatprep.mubr.f32.mxu1 %v16541_v0 }
 0x4d5   : > { %16012 = vmatpush3.msra.mxu0 %v12904_v35  ;;  %16013 = vmatprep.mubr.msk.f32.mxu0 %vm281_vm1, %v18595_v40  ;;  %v12085_v13 = vpop.permute.xlu0 %12084  ;;  %v12903_v51 = vsel %vm4196_vm12, %v12895_v44, %v18608_v41  ;;  %v12902_v11 = vsel %vm4196_vm12, %v18448_v2, %v12895_v44 }
 0x4d6   : > { %13186 = vmatprep.subr.mxu0 %v13171_v20  ;;  %v12092_v63 = vsel %vm9396_vm11, %v18336_v24, %v12085_v13  ;;  %v12093_v36 = vsel %vm9396_vm11, %v12085_v13, %v18465_v10  ;;  %v18642_v24 = vld [vmem:[%s19091_s3 + $0x110] sm:$0xff]  ;;  %v15823_v20 = vld [vmem:[%s19091_s3 + $0x158] sm:$0xff] }
 0x4d7   : > { %12183 = vmatprep.subr.mxu1 %v12093_v36 }
 0x4d8   : > { %16014 = vmatmul.mubr.msk.f32.vlgmr.msra.gmra.mrb[4].mxu0 %vm281_vm1, %v18613_v38  ;;  %12184 = vmatpush1.msra.mxu1 %v12092_v63  ;;  %v18635_v46 = vpop.permute.xlu1 %13702 }
 0x4d9   : > { %13187 = vmatpush1.msra.mxu0 %v13170_v4  ;;  %15762 = vmatmul.mubr.msk.f32.vlgmr.msra.gmra.mrb[8].mxu1 %vm281_vm1, %v18453_v23  ;;  %v12355_v7 = vpop.permute.xlu0 %12354 }
 0x4da   : > { %v12362_v27 = vsel %vm9667_vm13, %v18367_v37, %v12355_v7  ;;  %v12363_v3 = vsel %vm9667_vm13, %v12355_v7, %v18515_v12  ;;  %13250 = vmatprep.mubr.f32.mxu0 %v16541_v0  ;;  %12253 = vmatprep.mubr.f32.mxu1 %v16541_v0  ;;  %v18658_v37 = vld [vmem:[%s19091_s3 + $0x118] sm:$0xff]  ;;  %v18706_v12 = vld [vmem:[%s19091_s3 + $0x128] sm:$0xff] }
 0x4db   : > { %12453 = vmatprep.subr.mxu1 %v12363_v3  ;;  %v15830_v3 = vld [vmem:[%s19091_s3 + $0x160] sm:$0xff] }
 0x4dc   : > { %12454 = vmatpush1.msra.mxu1 %v12362_v27  ;;  %15792 = vmatmul.mubr.msk.f32.vlgmr.msra.gmra.mrb[6].mxu0 %vm281_vm1, %v18642_v24  ;;  %v13165_v23 = vpop.permute.xlu1 %13164 }
 0x4dd   : > { %15763 = vmatmul.mubr.msk.f32.gmra.mrb[10].mxu1 %vm281_vm1, %v18470_v47  ;;  %v13169_v10 = vpop.permute.xlu0 %13168  ;;  %13256 = vmatprep.mubr.f32.mxu0 %v16541_v0  ;;  %v13172_v39 = vsel %vm4860_vm14, %v18590_v21, %v13165_v23  ;;  %v15815_v21 = vld [vmem:[%s19091_s3 + $0x148] sm:$0xff] }
 0x4de   : > { %v13174_v53 = vsel %vm4860_vm14, %v18576_v29, %v13169_v10  ;;  %12517 = vmatprep.mubr.f32.mxu1 %v16541_v0 }
 0x4df   : > { %16016 = vmatprep.subr.mxu0 %v13174_v53 }
 0x4e0   : > { %15793 = vmatmul.mubr.msk.f32.gmra.mrb[8].mxu0 %vm281_vm1, %v18658_v37 }
 0x4e1   : > { %16017 = vmatpush3.msra.mxu0 %v13174_v53  ;;  %v13709_v32 = vpop.permute.xlu1 %13708  ;;  %15770 = vmatmul.mubr.msk.f32.vlgmr.msra.gmra.mrb[8].mxu1 %vm281_vm1, %v18502_v57  ;;  %v15831_v53 = vld [vmem:[%s19091_s3 + $0x168] sm:$0xff] }
 0x4e2   : > { %v18667_v47 = vpop.permute.xlu0 %13432  ;;  %16018 = vmatprep.mubr.msk.f32.mxu0 %vm281_vm1, %v18642_v24  ;;  %12523 = vmatprep.mubr.f32.mxu1 %v16541_v0 }
 0x4e3   : > { %v13441_v55 = vsel %vm10748_vm15, %v18558_v45, %v18667_v47 }
 0x4e4   : > { %13456 = vmatprep.subr.mxu0 %v13441_v55  ;;  %16019 = vmatmul.mubr.msk.f32.vlgmr.msra.gmra.mrb[4].mxu0 %vm281_vm1, %v18658_v37 }
 0x4e5   : > { %13457 = vmatpush1.msra.mxu0 %v13440_v58  ;;  %15771 = vmatmul.mubr.msk.f32.gmra.mrb[10].mxu1 %vm281_vm1, %v18520_v28  ;;  %v13173_v28 = vsel %vm4860_vm14, %v13165_v23, %v18576_v29 }
 0x4e6   : > { %13520 = vmatprep.mubr.f32.mxu0 %v16541_v0  ;;  %12787 = vmatprep.mubr.f32.mxu1 %v16541_v0  ;;  %v18688_v54 = vpop.permute.xlu1 %13704 }
 0x4e7   : > { %v12625_v50 = vpop.permute.xlu0 %12624 }
 0x4e8   : > { %v12632_v18 = vsel %vm3532_vm10, %v18409_v6, %v12625_v50  ;;  %v12633_v57 = vsel %vm3532_vm10, %v12625_v50, %v18561_v31  ;;  %15800 = vmatmul.mubr.msk.f32.vlgmr.msra.gmra.mrb[6].mxu0 %vm281_vm1, %v18684_v8 }
 0x4e9   : > { %12723 = vmatprep.subr.mxu1 %v12633_v57  ;;  %13526 = vmatprep.mubr.f32.mxu0 %v16541_v0  ;;  %v15838_v57 = vld [vmem:[%s19091_s3 + $0x170] sm:$0xff] }
 0x4ea   : > { %12724 = vmatpush1.msra.mxu1 %v12632_v18 }
 0x4eb   : > { %15778 = vmatmul.mubr.msk.f32.vlgmr.msra.gmra.mrb[8].mxu1 %vm281_vm1, %v18549_v9  ;;  %12993 = vmatprep.subr.mxu1 %v12903_v51  ;;  %v13439_v6 = vpop.permute.xlu0 %13438  ;;  %v18713_v2 = vpop.permute.xlu1 %14232  ;;  %v15807_v9 = vld [vmem:[%s19091_s3 + $0x138] sm:$0xff] }
 0x4ec   : > { %12994 = vmatpush1.msra.mxu1 %v12902_v11  ;;  %v13444_v48 = vsel %vm10748_vm15, %v18604_v43, %v13439_v6  ;;  %12793 = vmatprep.mubr.f32.mxu1 %v16541_v0  ;;  %v15839_v6 = vld [vmem:[%s19091_s3 + $0x178] sm:$0xff] }
 0x4ed   : > { %13263 = vmatprep.subr.mxu1 %v13173_v28  ;;  %16021 = vmatprep.subr.mxu0 %v13444_v48 }
 0x4ee   : > { %15801 = vmatmul.mubr.msk.f32.gmra.mrb[8].mxu0 %vm281_vm1, %v18706_v12 }
 0x4ef   : > { %16022 = vmatpush3.msra.mxu0 %v13444_v48  ;;  %15779 = vmatmul.mubr.msk.f32.gmra.mrb[10].mxu1 %vm281_vm1, %v18566_v33  ;;  %v18728_v22 = vpop.permute.xlu1 %14236 }
 0x4f0   : > { %v13701_v1 = vpop.permute.xlu0 %13700  ;;  %16023 = vmatprep.mubr.msk.f32.mxu0 %vm281_vm1, %v18684_v8  ;;  %13057 = vmatprep.mubr.f32.mxu1 %v16541_v0 }
 0x4f1   : > { %v13711_v49 = vsel %vm11019_vm5, %v13701_v1, %v18635_v46 }
 0x4f2   : > { %13726 = vmatprep.subr.mxu0 %v13711_v49  ;;  %16024 = vmatmul.mubr.msk.f32.vlgmr.msra.gmra.mrb[4].mxu0 %vm281_vm1, %v18706_v12 }
 0x4f3   : > { %15786 = vmatmul.mubr.msk.f32.vlgmr.msra.gmra.mrb[8].mxu1 %vm281_vm1, %v18595_v40  ;;  %13790 = vmatprep.mubr.f32.mxu0 %v16541_v0  ;;  %v18746_v45 = vpop.permute.xlu1 %14500 }
 0x4f4   : > { %13264 = vmatpush1.msra.mxu1 %v13172_v39  ;;  %v13699_v30 = vpop.permute.xlu0 %13698  ;;  %13063 = vmatprep.mubr.f32.mxu1 %v16541_v0 }
 0x4f5   : > { %v13710_v62 = vsel %vm11019_vm5, %v13699_v30, %v13701_v1  ;;  %v15847_v30 = vld [vmem:[%s19091_s3 + $0x188] sm:$0xff] }
 0x4f6   : > { %13727 = vmatpush1.msra.mxu0 %v13710_v62 }
 0x4f7   : > { %15808 = vmatmul.mubr.msk.f32.vlgmr.msra.gmra.mrb[6].mxu0 %vm281_vm1, %v15806_v25  ;;  %15787 = vmatmul.mubr.msk.f32.gmra.mrb[10].mxu1 %vm281_vm1, %v18613_v38  ;;  %v18759_v29 = vpop.permute.xlu1 %14498  ;;  %v15822_v38 = vld [vmem:[%s19091_s3 + $0x150] sm:$0xff] }
 0x4f8   : > { %v13707_v14 = vpop.permute.xlu0 %13706  ;;  %13796 = vmatprep.mubr.f32.mxu0 %v16541_v0  ;;  %13327 = vmatprep.mubr.f32.mxu1 %v16541_v0 }
 0x4f9   : > { %v13714_v31 = vsel %vm11019_vm5, %v13707_v14, %v13709_v32 }
 0x4fa   : > { %16026 = vmatprep.subr.mxu0 %v13714_v31 }
 0x4fb   : > { %15809 = vmatmul.mubr.msk.f32.gmra.mrb[8].mxu0 %vm281_vm1, %v15807_v9  ;;  %15794 = vmatmul.mubr.msk.f32.vlgmr.msra.gmra.mrb[8].mxu1 %vm281_vm1, %v18642_v24  ;;  %v14507_v40 = vpop.permute.xlu1 %14506 }
 0x4fc   : > { %16027 = vmatpush3.msra.mxu0 %v13714_v31  ;;  %v13435_v33 = vpop.permute.xlu0 %13434  ;;  %16028 = vmatprep.mubr.msk.f32.mxu0 %vm281_vm1, %v15806_v25 }
 0x4fd   : > { %13974 = vmatprep.subr.mxu0 %v17717_v60  ;;  %v13442_v26 = vsel %vm10748_vm15, %v18667_v47, %v13435_v33  ;;  %v13443_v42 = vsel %vm10748_vm15, %v13435_v33, %v18604_v43  ;;  %13333 = vmatprep.mubr.f32.mxu1 %v16541_v0  ;;  %v13713_v60 = vsel %vm11019_vm5, %v18688_v54, %v13707_v14 }
 0x4fe   : > { %13533 = vmatprep.subr.mxu1 %v13443_v42 }
 0x4ff   : > { %13534 = vmatpush1.msra.mxu1 %v13442_v26  ;;  %16029 = vmatmul.mubr.msk.f32.vlgmr.msra.gmra.mrb[4].mxu0 %vm281_vm1, %v15807_v9  ;;  %v14505_v59 = vpop.permute.xlu1 %14504 }
 0x500   : > { %13975 = vmatpush1.msra.mxu0 %v17677_v17  ;;  %15795 = vmatmul.mubr.msk.f32.gmra.mrb[10].mxu1 %vm281_vm1, %v18658_v37  ;;  %v14231_v52 = vpop.permute.xlu0 %14230  ;;  %v13712_v17 = vsel %vm11019_vm5, %v18635_v46, %v18688_v54  ;;  %v14513_v4 = vsel %vm1540_vm4, %v14505_v59, %v14507_v40  ;;  %v14510_v46 = vsel %vm1540_vm4, %v18759_v29, %v18746_v45 }
 0x501   : > { %13803 = vmatprep.subr.mxu1 %v13713_v60  ;;  %16031 = vmatprep.subr.mxu0 %v17914_v16  ;;  %v14241_v5 = vsel %vm876_vm2, %v14231_v52, %v18713_v2 }
 0x502   : > { %14038 = vmatprep.mubr.f32.mxu0 %v16541_v0  ;;  %13597 = vmatprep.mubr.f32.mxu1 %v16541_v0 }
 0x503   : > { %15816 = vmatmul.mubr.msk.f32.vlgmr.msra.gmra.mrb[6].mxu0 %vm281_vm1, %v15814_v15  ;;  %v14773_v13 = vpop.permute.xlu1 %14772 }
 0x504   : > { %16032 = vmatpush3.msra.mxu0 %v17914_v16  ;;  %15802 = vmatmul.mubr.msk.f32.vlgmr.msra.gmra.mrb[8].mxu1 %vm281_vm1, %v18684_v8  ;;  %v14229_v56 = vpop.permute.xlu0 %14228 }
 0x505   : > { %13804 = vmatpush1.msra.mxu1 %v13712_v17  ;;  %14256 = vmatprep.subr.mxu0 %v14241_v5  ;;  %v14240_v43 = vsel %vm876_vm2, %v14229_v56, %v14231_v52 }
 0x506   : > { %14051 = vmatprep.subr.mxu1 %v17697_v34  ;;  %14044 = vmatprep.mubr.f32.mxu0 %v16541_v0 }
 0x507   : > { %13603 = vmatprep.mubr.f32.mxu1 %v16541_v0  ;;  %15817 = vmatmul.mubr.msk.f32.gmra.mrb[8].mxu0 %vm281_vm1, %v15815_v21  ;;  %v14775_v7 = vpop.permute.xlu1 %14774 }
 0x508   : > { %15803 = vmatmul.mubr.msk.f32.gmra.mrb[10].mxu1 %vm281_vm1, %v18706_v12  ;;  %v14239_v16 = vpop.permute.xlu0 %14238  ;;  %16033 = vmatprep.mubr.msk.f32.mxu0 %vm281_vm1, %v15814_v15  ;;  %v14782_v54 = vsel %vm9396_vm11, %v14773_v13, %v14775_v7 }
 0x509   : > { %13867 = vmatprep.mubr.f32.mxu1 %v16541_v0  ;;  %v14244_v34 = vsel %vm876_vm2, %v18728_v22, %v14239_v16 }
 0x50b   : > { %16034 = vmatmul.mubr.msk.f32.vlgmr.msra.gmra.mrb[4].mxu0 %vm281_vm1, %v15815_v21  ;;  %v14779_v32 = vpop.permute.xlu1 %14778 }
 0x50c   : > { %14257 = vmatpush1.msra.mxu0 %v14240_v43  ;;  %15810 = vmatmul.mubr.msk.f32.vlgmr.msra.gmra.mrb[8].mxu1 %vm281_vm1, %v15806_v25  ;;  %v14503_v41 = vpop.permute.xlu0 %14502 }
 0x50d   : > { %14052 = vmatpush1.msra.mxu1 %v17728_v61  ;;  %16036 = vmatprep.subr.mxu0 %v14244_v34  ;;  %v14511_v35 = vsel %vm1540_vm4, %v18746_v45, %v14503_v41  ;;  %v14512_v23 = vsel %vm1540_vm4, %v14503_v41, %v14505_v59 }
 0x50e   : > { %14320 = vmatprep.mubr.f32.mxu0 %v16541_v0  ;;  %13873 = vmatprep.mubr.f32.mxu1 %v16541_v0 }
 0x50f   : > { %15824 = vmatmul.mubr.msk.f32.vlgmr.msra.gmra.mrb[6].mxu0 %vm281_vm1, %v15822_v38  ;;  %v15043_v58 = vpop.permute.xlu1 %15042 }
 0x510   : > { %16037 = vmatpush3.msra.mxu0 %v14244_v34  ;;  %15811 = vmatmul.mubr.msk.f32.gmra.mrb[10].mxu1 %vm281_vm1, %v15807_v9  ;;  %v14235_v44 = vpop.permute.xlu0 %14234 }
 0x511   : > { %14526 = vmatprep.subr.mxu0 %v14511_v35  ;;  %14326 = vmatprep.mubr.f32.mxu0 %v16541_v0  ;;  %v14243_v61 = vsel %vm876_vm2, %v14235_v44, %v18728_v22  ;;  %v14242_v63 = vsel %vm876_vm2, %v18713_v2, %v14235_v44  ;;  %v15846_v22 = vld [vmem:[%s19091_s3 + $0x180] sm:$0xff]  ;;  %vm15398_vm2 = vcmp.lt.s32.totalorder %v17642_v19, 64 }
 0x512   : > { %14333 = vmatprep.subr.mxu1 %v14243_v61  ;;  %14115 = vmatprep.mubr.f32.mxu1 %v16541_v0 }
 0x513   : > { %15825 = vmatmul.mubr.msk.f32.gmra.mrb[8].mxu0 %vm281_vm1, %v15823_v20  ;;  %v15045_v12 = vpop.permute.xlu1 %15044 }
 0x514   : > { %15818 = vmatmul.mubr.msk.f32.vlgmr.msra.gmra.mrb[8].mxu1 %vm281_vm1, %v15814_v15  ;;  %v14509_v36 = vpop.permute.xlu0 %14508  ;;  %16038 = vmatprep.mubr.msk.f32.mxu0 %vm281_vm1, %v15822_v38  ;;  %v15052_v2 = vsel %vm9667_vm13, %v15043_v58, %v15045_v12 }
 0x515   : > { %14334 = vmatpush1.msra.mxu1 %v14242_v63  ;;  %14121 = vmatprep.mubr.f32.mxu1 %v16541_v0  ;;  %v14514_v24 = vsel %vm1540_vm4, %v14507_v40, %v14509_v36  ;;  %vm15429_vm4 = vcmp.lt.s32.totalorder %v17642_v19, 62 }
 0x516   : > { %14603 = vmatprep.subr.mxu1 %v14513_v4 }
 0x517   : > { %16039 = vmatmul.mubr.msk.f32.vlgmr.msra.gmra.mrb[4].mxu0 %vm281_vm1, %v15823_v20  ;;  %v15049_v1 = vpop.permute.xlu1 %15048 }
 0x518   : > { %14527 = vmatpush1.msra.mxu0 %v14510_v46  ;;  %15819 = vmatmul.mubr.msk.f32.gmra.mrb[10].mxu1 %vm281_vm1, %v15815_v21  ;;  %v14771_v27 = vpop.permute.xlu0 %14770 }
 0x519   : > { %16041 = vmatprep.subr.mxu0 %v14514_v24  ;;  %14590 = vmatprep.mubr.f32.mxu0 %v16541_v0  ;;  %v14781_v10 = vsel %vm9396_vm11, %v14771_v27, %v14773_v13 }
 0x51a   : > { %14397 = vmatprep.mubr.f32.mxu1 %v16541_v0 }
 0x51b   : > { %15832 = vmatmul.mubr.msk.f32.vlgmr.msra.gmra.mrb[6].mxu0 %vm281_vm1, %v15830_v3 }
 0x51c   : > { %16042 = vmatpush3.msra.mxu0 %v14514_v24  ;;  %15826 = vmatmul.mubr.msk.f32.vlgmr.msra.gmra.mrb[8].mxu1 %vm281_vm1, %v15822_v38  ;;  %v14769_v37 = vpop.permute.xlu0 %14768 }
 0x51d   : > { %14604 = vmatpush1.msra.mxu1 %v14512_v23  ;;  %14796 = vmatprep.subr.mxu0 %v14781_v10  ;;  %v14780_v8 = vsel %vm9396_vm11, %v14769_v37, %v14771_v27 }
 0x51e   : > { %14596 = vmatprep.mubr.f32.mxu0 %v16541_v0  ;;  %14403 = vmatprep.mubr.f32.mxu1 %v16541_v0 }
 0x51f   : > { %15833 = vmatmul.mubr.msk.f32.gmra.mrb[8].mxu0 %vm281_vm1, %v15831_v53 }
 0x520   : > { %15827 = vmatmul.mubr.msk.f32.gmra.mrb[10].mxu1 %vm281_vm1, %v15823_v20  ;;  %v14777_v47 = vpop.permute.xlu0 %14776  ;;  %16043 = vmatprep.mubr.msk.f32.mxu0 %vm281_vm1, %v15830_v3 }
 0x521   : > { %v14783_v55 = vsel %vm9396_vm11, %v14775_v7, %v14777_v47  ;;  %14667 = vmatprep.mubr.f32.mxu1 %v16541_v0  ;;  %v14784_v50 = vsel %vm9396_vm11, %v14777_v47, %v14779_v32 }
 0x522   : > { %14873 = vmatprep.subr.mxu1 %v14783_v55 }
 0x523   : > { %16044 = vmatmul.mubr.msk.f32.vlgmr.msra.gmra.mrb[4].mxu0 %vm281_vm1, %v15831_v53 }
 0x524   : > { %14797 = vmatpush1.msra.mxu0 %v14780_v8  ;;  %15834 = vmatmul.mubr.msk.f32.vlgmr.msra.gmra.mrb[8].mxu1 %vm281_vm1, %v15830_v3  ;;  %v15041_v18 = vpop.permute.xlu0 %15040 }
 0x525   : > { %14874 = vmatpush1.msra.mxu1 %v14782_v54  ;;  %16046 = vmatprep.subr.mxu0 %v14784_v50  ;;  %v15051_v51 = vsel %vm9667_vm13, %v15041_v18, %v15043_v58 }
 0x526   : > { %14860 = vmatprep.mubr.f32.mxu0 %v16541_v0  ;;  %14673 = vmatprep.mubr.f32.mxu1 %v16541_v0 }
 0x527   : > { %15840 = vmatmul.mubr.msk.f32.vlgmr.msra.gmra.mrb[6].mxu0 %vm281_vm1, %v15838_v57 }
 0x528   : > { %16047 = vmatpush3.msra.mxu0 %v14784_v50  ;;  %15835 = vmatmul.mubr.msk.f32.gmra.mrb[10].mxu1 %vm281_vm1, %v15831_v53  ;;  %v15039_v11 = vpop.permute.xlu0 %15038  ;;  %v15315_v52 = vpop.permute.xlu1 %15314 }
 0x529   : > { %15066 = vmatprep.subr.mxu0 %v15051_v51  ;;  %14866 = vmatprep.mubr.f32.mxu0 %v16541_v0  ;;  %v15050_v49 = vsel %vm9667_vm13, %v15039_v11, %v15041_v18 }
 0x52a   : > { %14937 = vmatprep.mubr.f32.mxu1 %v16541_v0 }
 0x52b   : > { %15841 = vmatmul.mubr.msk.f32.gmra.mrb[8].mxu0 %vm281_vm1, %v15839_v6 }
 0x52c   : > { %15842 = vmatmul.mubr.msk.f32.vlgmr.msra.gmra.mrb[8].mxu1 %vm281_vm1, %v15838_v57  ;;  %v15047_v28 = vpop.permute.xlu0 %15046  ;;  %16048 = vmatprep.mubr.msk.f32.mxu0 %vm281_vm1, %v15838_v57 }
 0x52d   : > { %v15053_v48 = vsel %vm9667_vm13, %v15045_v12, %v15047_v28  ;;  %14943 = vmatprep.mubr.f32.mxu1 %v16541_v0  ;;  %v15054_v39 = vsel %vm9667_vm13, %v15047_v28, %v15049_v1 }
 0x52e   : > { %15143 = vmatprep.subr.mxu1 %v15053_v48 }
 0x52f   : > { %16049 = vmatmul.mubr.msk.f32.vlgmr.msra.gmra.mrb[4].mxu0 %vm281_vm1, %v15839_v6  ;;  %15144 = vmatpush1.msra.mxu1 %v15052_v2 }
 0x530   : > { %15067 = vmatpush1.msra.mxu0 %v15050_v49  ;;  %15843 = vmatmul.mubr.msk.f32.gmra.mrb[10].mxu1 %vm281_vm1, %v15839_v6 }
 0x531   : > { %16051 = vmatprep.subr.mxu0 %v15054_v39  ;;  %15130 = vmatprep.mubr.f32.mxu0 %v16541_v0 }
 0x532   : > { %15207 = vmatprep.mubr.f32.mxu1 %v16541_v0 }
 0x533   : > { %15848 = vmatmul.mubr.msk.f32.vlgmr.msra.gmra.mrb[6].mxu0 %vm281_vm1, %v15846_v22 }
 0x534   : > { %16052 = vmatpush3.msra.mxu0 %v15054_v39  ;;  %15850 = vmatmul.mubr.msk.f32.vlgmr.msra.gmra.mrb[8].mxu1 %vm281_vm1, %v15846_v22 }
 0x535   : > { %15136 = vmatprep.mubr.f32.mxu0 %v16541_v0  ;;  %15213 = vmatprep.mubr.f32.mxu1 %v16541_v0 }
 0x537   : > { %15849 = vmatmul.mubr.msk.f32.gmra.mrb[8].mxu0 %vm281_vm1, %v15847_v30 }
 0x538   : > { %15851 = vmatmul.mubr.msk.f32.gmra.mrb[10].mxu1 %vm281_vm1, %v15847_v30  ;;  %16053 = vmatprep.mubr.msk.f32.mxu0 %vm281_vm1, %v15846_v22 }
 0x53b   : > { %16054 = vmatmul.mubr.msk.f32.vlgmr.msra.gmra.mrb[4].mxu0 %vm281_vm1, %v15847_v30  ;;  %vm15357_vm1 = vcmp.lt.s32.totalorder %v17642_v19, 126 }
 0x54a   : > { %v10020_v25 = vpop.f32.mrb[4].mxu1 }
 0x54b   : > { %v10022_v62 = vpop.f32.mrb[5].mxu1 }
 0x54d   : > { %v15310_v45 = vpop.permute.xlu0 %15309 }
 0x54e   : > { %v10026_v14 = vpop.f32.mrb[6].mxu1 }
 0x54f   : > { %v10028_v9 = vpop.f32.mrb[7].mxu1 }
 0x606   : > { %v15132_v31 = vpop.f32.mrb[6].mxu0 }
 0x607   : > { %v16056_v33 = vadd.f32 %v15132_v31, %v10020_v25  ;;  %v15134_v26 = vpop.f32.mrb[7].mxu0  ;;  %v15209_v42 = vpop.f32.mrb[8].mxu1 }
 0x608   : > { %v16057_v29 = vadd.f32 %v15134_v26, %v10022_v62  ;;  %v15211_v60 = vpop.f32.mrb[9].mxu1  ;;  %v15319_v0 = vadd.f32 %v15310_v45, %v15209_v42 }
 0x609   : > { %v15320_v38 = vadd.f32 %v15310_v45, %v15211_v60  ;;  %v15317_v13 = vadd.f32 %v16056_v33, %v15310_v45 }
 0x60a   : > { %v15138_v15 = vpop.f32.mrb[8].mxu0  ;;  %v18891_v17 = vmax.f32 %v15319_v0, 0.0  ;;  %v15318_v4 = vadd.f32 %v16057_v29, %v15310_v45 }
 0x60b   : > { %v16058_v5 = vadd.f32 %v15138_v15, %v10026_v14  ;;  %v15140_v56 = vpop.f32.mrb[9].mxu0  ;;  %v15215_v21 = vpop.f32.mrb[10].mxu1  ;;  %v18905_v35 = vmax.f32 %v15320_v38, 0.0  ;;  %v18921_v63 = vmax.f32 %v15317_v13, 0.0 }
 0x60c   : > { %v16059_v40 = vadd.f32 %v15140_v56, %v10028_v9  ;;  %v15324_v16 = vadd.f32 %v15315_v52, %v15215_v21  ;;  %v15217_v59 = vpop.f32.mrb[11].mxu1  ;;  %15345 = vrot.lane.b32.xlu1 %v18891_v17, %s16543_s25  ;;  %v18937_v7 = vmax.f32 %v15318_v4, 0.0 }
 0x60d   : > { %v15325_v44 = vadd.f32 %v15315_v52, %v15217_v59  ;;  %v15322_v61 = vadd.f32 %v16058_v5, %v15315_v52 }
 0x60e   : > { %v18895_v43 = vmax.f32 %v15324_v16, 0.0  ;;  %v16055_v34 = vpop.f32.mrb[4].mxu0  ;;  %v15323_v46 = vadd.f32 %v16059_v40, %v15315_v52 }
 0x60f   : > { %v15286_v41 = vpop.f32.mrb[5].mxu0  ;;  %v18911_v20 = vmax.f32 %v15325_v44, 0.0  ;;  %v18927_v36 = vmax.f32 %v15322_v61, 0.0  ;;  %v15326_v3 = vadd.f32 %v16055_v34, %v15315_v52 }
 0x610   : > { %15347 = vrot.lane.b32.xlu0 %v18895_v43, %s16543_s25  ;;  %15386 = vrot.lane.b32.xlu1 %v18891_v17, %s16551_s16  ;;  %v18943_v24 = vmax.f32 %v15323_v46, 0.0  ;;  %v15321_v27 = vadd.f32 %v15310_v45, %v15286_v41 }
 0x611   : > { %v18959_v10 = vmax.f32 %v15326_v3, 0.0 }
 0x612   : > { %v18953_v23 = vmax.f32 %v15321_v27, 0.0 }
 0x614   : > { %15388 = vrot.lane.b32.xlu0 %v18895_v43, %s16551_s16  ;;  %15417 = vrot.lane.b32.xlu1 %v18891_v17, %s16553_s7 }
 0x618   : > { %15419 = vrot.lane.b32.xlu0 %v18895_v43, %s16553_s7  ;;  %15349 = vrot.lane.b32.xlu1 %v18905_v35, %s16543_s25 }
 0x61c   : > { %15351 = vrot.lane.b32.xlu0 %v18911_v20, %s16543_s25  ;;  %15390 = vrot.lane.b32.xlu1 %v18905_v35, %s16551_s16 }
 0x620   : > { %15392 = vrot.lane.b32.xlu0 %v18911_v20, %s16551_s16  ;;  %15421 = vrot.lane.b32.xlu1 %v18905_v35, %s16553_s7 }
 0x624   : > { %15423 = vrot.lane.b32.xlu0 %v18911_v20, %s16553_s7  ;;  %15337 = vrot.lane.b32.xlu1 %v18921_v63, %s16543_s25 }
 0x628   : > { %15339 = vrot.lane.b32.xlu0 %v18927_v36, %s16543_s25  ;;  %15378 = vrot.lane.b32.xlu1 %v18921_v63, %s16551_s16 }
 0x62c   : > { %15380 = vrot.lane.b32.xlu0 %v18927_v36, %s16551_s16  ;;  %15409 = vrot.lane.b32.xlu1 %v18921_v63, %s16553_s7 }
 0x630   : > { %15411 = vrot.lane.b32.xlu0 %v18927_v36, %s16553_s7  ;;  %15341 = vrot.lane.b32.xlu1 %v18937_v7, %s16543_s25 }
 0x634   : > { %15343 = vrot.lane.b32.xlu0 %v18943_v24, %s16543_s25  ;;  %15382 = vrot.lane.b32.xlu1 %v18937_v7, %s16551_s16 }
 0x638   : > { %15384 = vrot.lane.b32.xlu0 %v18943_v24, %s16551_s16  ;;  %15413 = vrot.lane.b32.xlu1 %v18937_v7, %s16553_s7 }
 0x63c   : > { %15415 = vrot.lane.b32.xlu0 %v18943_v24, %s16553_s7  ;;  %15353 = vrot.lane.b32.xlu1 %v18953_v23, %s16543_s25 }
 0x640   : > { %15355 = vrot.lane.b32.xlu0 %v18959_v10, %s16543_s25  ;;  %15394 = vrot.lane.b32.xlu1 %v18953_v23, %s16551_s16 }
 0x644   : > { %15396 = vrot.lane.b32.xlu0 %v18959_v10, %s16551_s16  ;;  %15425 = vrot.lane.b32.xlu1 %v18953_v23, %s16553_s7 }
 0x648   : > { %15427 = vrot.lane.b32.xlu0 %v18959_v10, %s16553_s7  ;;  %s19002_s7 = scalar_lea.vmem %s19093_s5, %s16488_s20 }
 0x67e   : > { %v15346_v37 = vpop.permute.xlu1 %15345 }
 0x682   : > { %v15387_v53 = vpop.permute.xlu1 %15386  ;;  %v15348_v32 = vpop.permute.xlu0 %15347 }
 0x686   : > { %v15418_v47 = vpop.permute.xlu1 %15417  ;;  %v15389_v55 = vpop.permute.xlu0 %15388 }
 0x68a   : > { %v18971_v58 = vpop.permute.xlu1 %15349  ;;  %v15420_v8 = vpop.permute.xlu0 %15419 }
 0x68b   : > { %v15360_v18 = vsel %vm15357_vm1, %v15346_v37, %v18971_v58 }
 0x68c   : > { %v15370_v12 = vmax.f32 %v18891_v17, %v15360_v18 }
 0x68e   : > { %v18974_v54 = vpop.permute.xlu1 %15390  ;;  %v18976_v50 = vpop.permute.xlu0 %15351 }
 0x68f   : > { %v15401_v11 = vsel %vm15398_vm2, %v15387_v53, %v18974_v54  ;;  %v15361_v48 = vsel %vm15357_vm1, %v15348_v32, %v18976_v50 }
 0x690   : > { %v15375_v30 = vmax.f32 %v18895_v43, %v15361_v48 }
 0x692   : > { %v18983_v57 = vpop.permute.xlu1 %15421  ;;  %v18985_v51 = vpop.permute.xlu0 %15392 }
 0x693   : > { %v15432_v6 = vsel %vm15429_vm4, %v15418_v47, %v18983_v57  ;;  %v15402_v39 = vsel %vm15398_vm2, %v15389_v55, %v18985_v51 }
 0x694   : > { %v15442_v28 = vmax.f32 %v15401_v11, %v15432_v6 }
 0x696   : > { %v15452_v2 = vmax.f32 %v15370_v12, %v15442_v28  ;;  %v15338_v1 = vpop.permute.xlu1 %15337  ;;  %v19004_v49 = vpop.permute.xlu0 %15423 }
 0x697   : > { %v15433_v22 = vsel %vm15429_vm4, %v15420_v8, %v19004_v49 }
 0x698   : > { %15462 = vst [vmem:[%s19002_s7 + $0x10] sm:$0xff] %v15452_v2  ;;  %v15447_v25 = vmax.f32 %v15402_v39, %v15433_v22 }
 0x69a   : > { %v15457_v62 = vmax.f32 %v15375_v30, %v15447_v25  ;;  %v15379_v14 = vpop.permute.xlu1 %15378  ;;  %v15340_v9 = vpop.permute.xlu0 %15339 }
 0x69c   : > { %15467 = vst [vmem:[%s19002_s7 + $0x38] sm:$0xff] %v15457_v62 }
 0x69e   : > { %v15410_v45 = vpop.permute.xlu1 %15409  ;;  %v15381_v31 = vpop.permute.xlu0 %15380 }
 0x6a2   : > { %v15342_v33 = vpop.permute.xlu1 %15341  ;;  %v15412_v26 = vpop.permute.xlu0 %15411 }
 0x6a3   : > { %v15362_v60 = vsel %vm15357_vm1, %v15342_v33, %v15346_v37  ;;  %v15364_v0 = vsel %vm15357_vm1, %v15338_v1, %v15342_v33 }
 0x6a4   : > { %v15368_v40 = vmax.f32 %v18921_v63, %v15364_v0  ;;  %v15369_v16 = vmax.f32 %v18937_v7, %v15362_v60 }
 0x6a6   : > { %v15383_v42 = vpop.permute.xlu1 %15382  ;;  %v15344_v29 = vpop.permute.xlu0 %15343 }
 0x6a7   : > { %v15403_v17 = vsel %vm15398_vm2, %v15383_v42, %v15387_v53  ;;  %v15405_v5 = vsel %vm15398_vm2, %v15379_v14, %v15383_v42  ;;  %v15363_v34 = vsel %vm15357_vm1, %v15344_v29, %v15348_v32  ;;  %v15365_v41 = vsel %vm15357_vm1, %v15340_v9, %v15344_v29 }
 0x6a8   : > { %v15373_v27 = vmax.f32 %v18927_v36, %v15365_v41  ;;  %v15374_v3 = vmax.f32 %v18943_v24, %v15363_v34 }
 0x6aa   : > { %v15414_v52 = vpop.permute.xlu1 %15413  ;;  %v15385_v15 = vpop.permute.xlu0 %15384 }
 0x6ab   : > { %v15434_v56 = vsel %vm15429_vm4, %v15414_v52, %v15418_v47  ;;  %v15436_v21 = vsel %vm15429_vm4, %v15410_v45, %v15414_v52  ;;  %v15404_v63 = vsel %vm15398_vm2, %v15385_v15, %v15389_v55  ;;  %v15406_v4 = vsel %vm15398_vm2, %v15381_v31, %v15385_v15 }
 0x6ac   : > { %v15440_v59 = vmax.f32 %v15405_v5, %v15436_v21  ;;  %v15441_v43 = vmax.f32 %v15403_v17, %v15434_v56 }
 0x6ae   : > { %v15450_v38 = vmax.f32 %v15368_v40, %v15440_v59  ;;  %v15451_v44 = vmax.f32 %v15369_v16, %v15441_v43  ;;  %v15354_v13 = vpop.permute.xlu1 %15353  ;;  %v15416_v61 = vpop.permute.xlu0 %15415 }
 0x6af   : > { %v15435_v46 = vsel %vm15429_vm4, %v15416_v61, %v15420_v8  ;;  %v15437_v7 = vsel %vm15429_vm4, %v15412_v26, %v15416_v61  ;;  %v15358_v8 = vsel %vm15357_vm1, %v18971_v58, %v15354_v13  ;;  %v15366_v11 = vsel %vm15357_vm1, %v15354_v13, %v15338_v1 }
 0x6b0   : > { %15460 = vst [vmem:[%s19002_s7] sm:$0xff] %v15450_v38  ;;  %15461 = vst [vmem:[%s19002_s7 + $0x8] sm:$0xff] %v15451_v44  ;;  %v15445_v37 = vmax.f32 %v15406_v4, %v15437_v7  ;;  %v15446_v53 = vmax.f32 %v15404_v63, %v15435_v46  ;;  %v15371_v58 = vmax.f32 %v18905_v35, %v15358_v8 }
 0x6b1   : > { %v15372_v2 = vmax.f32 %v18953_v23, %v15366_v11 }
 0x6b2   : > { %v15455_v32 = vmax.f32 %v15373_v27, %v15445_v37  ;;  %v15456_v47 = vmax.f32 %v15374_v3, %v15446_v53  ;;  %v15395_v55 = vpop.permute.xlu1 %15394  ;;  %v15356_v18 = vpop.permute.xlu0 %15355 }
 0x6b3   : > { %v15399_v24 = vsel %vm15398_vm2, %v18974_v54, %v15395_v55  ;;  %v15407_v12 = vsel %vm15398_vm2, %v15395_v55, %v15379_v14  ;;  %v15359_v54 = vsel %vm15357_vm1, %v18976_v50, %v15356_v18  ;;  %v15367_v22 = vsel %vm15357_vm1, %v15356_v18, %v15340_v9 }
 0x6b4   : > { %15465 = vst [vmem:[%s19002_s7 + $0x28] sm:$0xff] %v15455_v32  ;;  %15466 = vst [vmem:[%s19002_s7 + $0x30] sm:$0xff] %v15456_v47  ;;  %v15376_v14 = vmax.f32 %v18911_v20, %v15359_v54  ;;  %v15377_v9 = vmax.f32 %v18959_v10, %v15367_v22 }
 0x6b6   : > { %v15426_v36 = vpop.permute.xlu1 %15425  ;;  %v15397_v6 = vpop.permute.xlu0 %15396 }
 0x6b7   : > { %v15430_v28 = vsel %vm15429_vm4, %v18983_v57, %v15426_v36  ;;  %v15438_v48 = vsel %vm15429_vm4, %v15426_v36, %v15410_v45  ;;  %v15400_v35 = vsel %vm15398_vm2, %v18985_v51, %v15397_v6  ;;  %v15408_v23 = vsel %vm15398_vm2, %v15397_v6, %v15381_v31 }
 0x6b8   : > { %v15443_v1 = vmax.f32 %v15399_v24, %v15430_v28  ;;  %v15444_v39 = vmax.f32 %v15407_v12, %v15438_v48 }
 0x6ba   : > { %v15453_v57 = vmax.f32 %v15371_v58, %v15443_v1  ;;  %v15454_v30 = vmax.f32 %v15372_v2, %v15444_v39  ;;  %v15428_v25 = vpop.permute.xlu0 %15427 }
 0x6bb   : > { %v15431_v62 = vsel %vm15429_vm4, %v19004_v49, %v15428_v25  ;;  %v15439_v50 = vsel %vm15429_vm4, %v15428_v25, %v15412_v26 }
 0x6bc   : > { %15463 = vst [vmem:[%s19002_s7 + $0x18] sm:$0xff] %v15453_v57  ;;  %15464 = vst [vmem:[%s19002_s7 + $0x20] sm:$0xff] %v15454_v30  ;;  %v15448_v45 = vmax.f32 %v15400_v35, %v15431_v62  ;;  %v15449_v33 = vmax.f32 %v15408_v23, %v15439_v50 }
 0x6be   : > { %v15458_v42 = vmax.f32 %v15376_v14, %v15448_v45  ;;  %v15459_v51 = vmax.f32 %v15377_v9, %v15449_v33 }
 0x6c0   : > { %15468 = vst [vmem:[%s19002_s7 + $0x40] sm:$0xff] %v15458_v42  ;;  %15469 = vst [vmem:[%s19002_s7 + $0x48] sm:$0xff] %v15459_v51 }
 0x6c1 PF: > { %s15_s18 = sadd.s32 1, %s16539_s18  }
 0x6c2   : > { %p12_p4 = scmp.ge.s32.totalorder %s15_s18, 4  }
 0x6c4   :  { %14 = sbr.rel (!%p12_p4) target bundleno = 1 (0x1), region = 118 }

</bundles_post_ra>
